<compile_context>
chip_gen: v7x
topology: tpu7x:2x2x1
jax: 0.10.0
libtpu: 0.0.40
codegen_flags: <defaults>
</compile_context>

<pallas_src>
import functools
import math

import jax
import jax.numpy as jnp
from jax.experimental import pallas as pl
from jax.experimental.pallas import tpu as pltpu


# ------------------------- in-kernel helper math -------------------------

def _layer_norm(y, gamma, beta):
    """LayerNorm over the last axis (f32 math, biased var, eps=1e-5, like torch)."""
    mean = jnp.mean(y, axis=-1, keepdims=True)
    var = jnp.mean(jnp.square(y - mean), axis=-1, keepdims=True)
    return (y - mean) * jax.lax.rsqrt(var + 1e-5) * gamma + beta


def _mha_out(q, k, v, wo_ref, nhead):
    """Multi-head attention + output projection (bias added by caller).

    q: (Lq, D) f32, k/v: (Lk, D) f32, wo_ref: (D, D) bf16 Ref.
    Heads are lane slices (no HBM transposes); each head's attention output
    is folded straight into the out-projection (no lane concatenate).
    """
    Lq, D = q.shape
    dh = D // nhead
    scale = 1.0 / math.sqrt(dh)
    acc = jnp.zeros((Lq, D), jnp.float32)
    for h in range(nhead):
        lo, hi = h * dh, (h + 1) * dh
        qh = (q[:, lo:hi] * scale).astype(jnp.bfloat16)   # fold 1/sqrt(dh) into q
        kh = k[:, lo:hi].astype(jnp.bfloat16)
        vh = v[:, lo:hi].astype(jnp.bfloat16)
        s = jax.lax.dot_general(qh, kh, (((1,), (1,)), ((), ())),
                                preferred_element_type=jnp.float32)
        m = jnp.max(s, axis=-1, keepdims=True)
        p = jnp.exp(s - m)                                # softmax kept in f32
        p = p * pl.reciprocal(jnp.sum(p, axis=-1, keepdims=True), approx=True)
        oh = jnp.dot(p.astype(jnp.bfloat16), vh,
                     preferred_element_type=jnp.float32)
        acc = acc + jnp.dot(oh.astype(jnp.bfloat16), wo_ref[lo:hi, :],
                            preferred_element_type=jnp.float32)
    return acc


# ----------------------------- Pallas kernels -----------------------------

def _self_attn_ln_kernel(x_ref, wqkv_ref, bqkv_ref, wo_ref, bo_ref,
                         g_ref, b_ref, o_ref, *, nhead):
    # out = LayerNorm(x + SelfAttn(x)); single fused (D, 3D) QKV matmul.
    x = x_ref[0]                                          # (L, D) f32
    D = x.shape[-1]
    qkv = jnp.dot(x.astype(jnp.bfloat16), wqkv_ref[...],
                  preferred_element_type=jnp.float32) + bqkv_ref[...]
    attn = _mha_out(qkv[:, :D], qkv[:, D:2 * D], qkv[:, 2 * D:], wo_ref, nhead)
    o_ref[0] = _layer_norm(x + attn + bo_ref[...], g_ref[...], b_ref[...])


def _cross_attn_ln_kernel(xq_ref, mem_ref, wq_ref, bq_ref, wkv_ref, bkv_ref,
                          wo_ref, bo_ref, g_ref, b_ref, o_ref, *, nhead):
    # out = LayerNorm(xq + CrossAttn(xq, mem)); fused (D, 2D) KV matmul.
    xq = xq_ref[0]                                        # (Lq, D)
    mem = mem_ref[0]                                      # (Lk, D)
    D = xq.shape[-1]
    q = jnp.dot(xq.astype(jnp.bfloat16), wq_ref[...],
                preferred_element_type=jnp.float32) + bq_ref[...]
    kv = jnp.dot(mem.astype(jnp.bfloat16), wkv_ref[...],
                 preferred_element_type=jnp.float32) + bkv_ref[...]
    attn = _mha_out(q, kv[:, :D], kv[:, D:], wo_ref, nhead)
    o_ref[0] = _layer_norm(xq + attn + bo_ref[...], g_ref[...], b_ref[...])


def _ffn_ln_kernel(x_ref, w1_ref, b1_ref, w2_ref, b2_ref, g_ref, b_ref, o_ref):
    # out = LayerNorm(x + W2(relu(W1 x + b1)) + b2); hidden never leaves VMEM.
    x = x_ref[0]
    h = jnp.dot(x.astype(jnp.bfloat16), w1_ref[...],
                preferred_element_type=jnp.float32) + b1_ref[...]
    h = jnp.maximum(h, 0.0)
    y = jnp.dot(h.astype(jnp.bfloat16), w2_ref[...],
                preferred_element_type=jnp.float32) + b2_ref[...]
    o_ref[0] = _layer_norm(x + y, g_ref[...], b_ref[...])


def _layer_norm_kernel(x_ref, g_ref, b_ref, o_ref):
    # plain LayerNorm (no zeros-residual DMA)
    o_ref[...] = _layer_norm(x_ref[...], g_ref[...], b_ref[...])


def _ln_project_kernel(x_ref, g_ref, b_ref, w_ref, bias_ref, o_ref):
    # out tile = (LayerNorm(x tile)) @ W tile + bias tile   (final vocab proj)
    xn = _layer_norm(x_ref[...], g_ref[...], b_ref[...])
    o_ref[...] = jnp.dot(xn.astype(jnp.bfloat16), w_ref[...],
                         preferred_element_type=jnp.float32) + bias_ref[...]


# ----------------------------- kernel wrappers -----------------------------

_VMEM = pl.BlockSpec(memory_space=pltpu.MemorySpace.VMEM)
_PARALLEL_1D = pltpu.CompilerParams(dimension_semantics=("parallel",))
_PARALLEL_2D = pltpu.CompilerParams(dimension_semantics=("parallel", "parallel"))


def _replicated_spec(arr):
    """Full array, same block every grid step (weights / biases / LN params)."""
    zeros = (0,) * arr.ndim
    return pl.BlockSpec(arr.shape, lambda b, _z=zeros: _z)


def _batch_spec(shape):
    """(1, L, D) block per batch element of a (B, L, D) array."""
    trailing = (0,) * (len(shape) - 1)
    return pl.BlockSpec((1,) + tuple(shape[1:]), lambda b, _t=trailing: (b,) + _t)


def self_attn_block(x, ap, gamma, beta, nhead):
    """x: (B, L, D) -> LayerNorm(x + SelfAttn(x)). One pallas_call, grid over B."""
    B, L, D = x.shape
    args = (x, ap["wqkv"], ap["bqkv"], ap["wo"], ap["bo"], gamma, beta)
    return pl.pallas_call(
        functools.partial(_self_attn_ln_kernel, nhead=nhead),
        out_shape=jax.ShapeDtypeStruct((B, L, D), jnp.float32),
        grid=(B,),
        in_specs=[_batch_spec(x.shape)] + [_replicated_spec(a) for a in args[1:]],
        out_specs=_batch_spec((B, L, D)),
        compiler_params=_PARALLEL_1D,
    )(*args)


def cross_attn_block(x, mem, ap, gamma, beta, nhead):
    """x: (B, Lq, D), mem: (B, Lk, D) -> LayerNorm(x + CrossAttn(x, mem))."""
    B, Lq, D = x.shape
    args = (x, mem, ap["wq"], ap["bq"], ap["wkv"], ap["bkv"],
            ap["wo"], ap["bo"], gamma, beta)
    return pl.pallas_call(
        functools.partial(_cross_attn_ln_kernel, nhead=nhead),
        out_shape=jax.ShapeDtypeStruct((B, Lq, D), jnp.float32),
        grid=(B,),
        in_specs=[_batch_spec(x.shape), _batch_spec(mem.shape)]
                 + [_replicated_spec(a) for a in args[2:]],
        out_specs=_batch_spec((B, Lq, D)),
        compiler_params=_PARALLEL_1D,
    )(*args)


def ffn_block(x, w1, b1, w2, b2, gamma, beta):
    """x: (B, L, D) -> LayerNorm(x + FFN(x)). One pallas_call, grid over B."""
    B, L, D = x.shape
    args = (x, w1, b1, w2, b2, gamma, beta)
    return pl.pallas_call(
        _ffn_ln_kernel,
        out_shape=jax.ShapeDtypeStruct((B, L, D), jnp.float32),
        grid=(B,),
        in_specs=[_batch_spec(x.shape)] + [_replicated_spec(a) for a in args[1:]],
        out_specs=_batch_spec((B, L, D)),
        compiler_params=_PARALLEL_1D,
    )(*args)


def layernorm(x2d, gamma, beta):
    """Plain LayerNorm on a (M, D) slab (final encoder norm)."""
    M, D = x2d.shape
    return pl.pallas_call(
        _layer_norm_kernel,
        out_shape=jax.ShapeDtypeStruct((M, D), jnp.float32),
        in_specs=[_VMEM, _VMEM, _VMEM],
        out_specs=_VMEM,
    )(x2d, gamma, beta)


def ln_project(y2d, gamma, beta, w_pad, b_pad, tm=8, tn=128):
    """Final decoder norm fused with the vocab projection, tiled (tm, tn) grid."""
    M, D = y2d.shape
    Np = w_pad.shape[1]
    Mp = ((M + tm - 1) // tm) * tm
    if Mp != M:
        y2d = jnp.pad(y2d, ((0, Mp - M), (0, 0)))
    out = pl.pallas_call(
        _ln_project_kernel,
        out_shape=jax.ShapeDtypeStruct((Mp, Np), jnp.float32),
        grid=(Mp // tm, Np // tn),
        in_specs=[
            pl.BlockSpec((tm, D), lambda i, j: (i, 0)),
            pl.BlockSpec((1, D), lambda i, j: (0, 0)),
            pl.BlockSpec((1, D), lambda i, j: (0, 0)),
            pl.BlockSpec((D, tn), lambda i, j: (0, j)),
            pl.BlockSpec((1, tn), lambda i, j: (0, j)),
        ],
        out_specs=pl.BlockSpec((tm, tn), lambda i, j: (i, j)),
        compiler_params=_PARALLEL_2D,
    )(y2d, gamma, beta, w_pad, b_pad)
    return out[:M]


# ----------------------------- model forward -----------------------------

@functools.partial(jax.jit, static_argnames=("nhead", "tgt_vocab"))
def transformer_forward(params, src, tgt, *, nhead, tgt_vocab):
    pe = params["pe"]
    # embedding lookup + positional encoding (glue ops)
    x = params["src_embedding"][src] + pe[None, : src.shape[1], :]
    y = params["tgt_embedding"][tgt] + pe[None, : tgt.shape[1], :]

    # encoder stack
    for lp in params["encoder_layers"]:
        x = self_attn_block(x, lp["self_attn"], lp["norm1_g"], lp["norm1_b"], nhead)
        x = ffn_block(x, lp["w1"], lp["b1"], lp["w2"], lp["b2"],
                      lp["norm2_g"], lp["norm2_b"])
    B, Ls, D = x.shape
    memory = layernorm(x.reshape(B * Ls, D),
                       params["encoder_norm_g"],
                       params["encoder_norm_b"]).reshape(B, Ls, D)

    # decoder stack
    for lp in params["decoder_layers"]:
        y = self_attn_block(y, lp["self_attn"], lp["norm1_g"], lp["norm1_b"], nhead)
        y = cross_attn_block(y, memory, lp["cross_attn"],
                             lp["norm2_g"], lp["norm2_b"], nhead)
        y = ffn_block(y, lp["w1"], lp["b1"], lp["w2"], lp["b2"],
                      lp["norm3_g"], lp["norm3_b"])

    # final decoder LayerNorm fused into the vocab projection
    Bt, Lt, _ = y.shape
    logits = ln_project(y.reshape(Bt * Lt, D),
                        params["decoder_norm_g"], params["decoder_norm_b"],
                        params["fc_out_w"], params["fc_out_b"])
    return logits[:, :tgt_vocab].reshape(Bt, Lt, tgt_vocab)


# ----------------------------- parameter init -----------------------------

def make_positional_encoding(max_len, d_model):
    position = jnp.arange(max_len, dtype=jnp.float32)[:, None]
    div_term = jnp.exp(
        jnp.arange(0, d_model, 2, dtype=jnp.float32) * (-math.log(10000.0) / d_model)
    )
    pe = jnp.zeros((max_len, d_model), jnp.float32)
    pe = pe.at[:, 0::2].set(jnp.sin(position * div_term))
    pe = pe.at[:, 1::2].set(jnp.cos(position * div_term))
    return pe


def init_params(key, src_vocab, tgt_vocab, d_model, nhead, num_layers, ffn,
                max_len=64, vocab_tile=128):
    """All weights stored pre-transposed to (K, N) bf16, biases as (1, N) f32,
    QKV / KV projections pre-fused — no per-forward weight preprocessing."""
    keys = iter(jax.random.split(key, 1024))

    def normal(shape):
        return 0.02 * jax.random.normal(next(keys), shape, dtype=jnp.float32)

    def wmat(k_in, n_out):
        # torch nn.Linear weight is (N, K); we store W.T = (K, N) in bf16.
        return normal((k_in, n_out)).astype(jnp.bfloat16)

    def bias(n):
        return normal((1, n))

    ones = lambda: jnp.ones((1, d_model), jnp.float32)
    zeros = lambda: jnp.zeros((1, d_model), jnp.float32)

    def self_attn():
        # torch in_proj_weight (3D, D) + in_proj_bias (3D,) -> fused (D, 3D)/(1, 3D)
        return {"wqkv": wmat(d_model, 3 * d_model), "bqkv": bias(3 * d_model),
                "wo": wmat(d_model, d_model), "bo": bias(d_model)}

    def cross_attn():
        return {"wq": wmat(d_model, d_model), "bq": bias(d_model),
                "wkv": wmat(d_model, 2 * d_model), "bkv": bias(2 * d_model),
                "wo": wmat(d_model, d_model), "bo": bias(d_model)}

    def enc_layer():
        return {"self_attn": self_attn(),
                "w1": wmat(d_model, ffn), "b1": bias(ffn),
                "w2": wmat(ffn, d_model), "b2": bias(d_model),
                "norm1_g": ones(), "norm1_b": zeros(),
                "norm2_g": ones(), "norm2_b": zeros()}

    def dec_layer():
        p = enc_layer()
        p["cross_attn"] = cross_attn()
        p["norm3_g"] = ones()
        p["norm3_b"] = zeros()
        return p

    # final vocab projection padded up to a lane-dense multiple of 128 columns
    n_pad = ((tgt_vocab + vocab_tile - 1) // vocab_tile) * vocab_tile
    fc_w = jnp.zeros((d_model, n_pad), jnp.float32)
    fc_w = fc_w.at[:, :tgt_vocab].set(normal((d_model, tgt_vocab))).astype(jnp.bfloat16)
    fc_b = jnp.zeros((1, n_pad), jnp.float32)
    fc_b = fc_b.at[:, :tgt_vocab].set(normal((1, tgt_vocab)))

    return {
        "src_embedding": normal((src_vocab, d_model)),
        "tgt_embedding": normal((tgt_vocab, d_model)),
        "pe": make_positional_encoding(max_len, d_model),
        "encoder_layers": [enc_layer() for _ in range(num_layers)],
        "decoder_layers": [dec_layer() for _ in range(num_layers)],
        "encoder_norm_g": ones(), "encoder_norm_b": zeros(),
        "decoder_norm_g": ones(), "decoder_norm_b": zeros(),
        "fc_out_w": fc_w, "fc_out_b": fc_b,
    }


# ----------------------------- main -----------------------------

if __name__ == "__main__":
    # small shapes consistent with the module (d_model scaled down, lane-dense)
    SRC_VOCAB, TGT_VOCAB = 50, 60
    D_MODEL, NHEAD, NUM_LAYERS, FFN = 128, 4, 2, 256
    BATCH, SRC_LEN, TGT_LEN = 2, 10, 8

    key = jax.random.PRNGKey(0)
    k_param, k_src, k_tgt = jax.random.split(key, 3)

    params = init_params(k_param, SRC_VOCAB, TGT_VOCAB, D_MODEL, NHEAD,
                         NUM_LAYERS, FFN)
    src = jax.random.randint(k_src, (BATCH, SRC_LEN), 0, SRC_VOCAB, dtype=jnp.int32)
    tgt = jax.random.randint(k_tgt, (BATCH, TGT_LEN), 0, TGT_VOCAB, dtype=jnp.int32)

    out = transformer_forward(params, src, tgt, nhead=NHEAD, tgt_vocab=TGT_VOCAB)
    out = jax.block_until_ready(out)

    assert out.shape == (BATCH, TGT_LEN, TGT_VOCAB), out.shape
    assert bool(jnp.all(jnp.isfinite(out)))
    print("KERNEL_OK")
</pallas_src>

<mosaic_0001>
module attributes {stable_mosaic.version = 11 : i64} {
  func.func @_ffn_ln_kernel(%arg0: i32, %arg1: memref<1x10x128xf32, #tpu.memory_space<vmem>>, %arg2: memref<128x256xbf16, #tpu.memory_space<vmem>>, %arg3: memref<1x256xf32, #tpu.memory_space<vmem>>, %arg4: memref<256x128xbf16, #tpu.memory_space<vmem>>, %arg5: memref<1x128xf32, #tpu.memory_space<vmem>>, %arg6: memref<1x128xf32, #tpu.memory_space<vmem>>, %arg7: memref<1x128xf32, #tpu.memory_space<vmem>>, %arg8: memref<1x10x128xf32, #tpu.memory_space<vmem>>) attributes {dimension_semantics = [#tpu.dimension_semantics<parallel>], iteration_bounds = array<i64: 2>, scalar_prefetch = 0 : i64, scratch_operands = 0 : i64, tpu.core_type = #tpu.core_type<tc>, window_params = [{transform_indices = @transform_0, window_bounds = array<i64: 1, 10, 128>}, {pipeline_mode = #tpu.pipeline_mode<synchronous>, transform_indices = @transform_1, window_bounds = array<i64: 128, 256>}, {pipeline_mode = #tpu.pipeline_mode<synchronous>, transform_indices = @transform_2, window_bounds = array<i64: 1, 256>}, {pipeline_mode = #tpu.pipeline_mode<synchronous>, transform_indices = @transform_3, window_bounds = array<i64: 256, 128>}, {pipeline_mode = #tpu.pipeline_mode<synchronous>, transform_indices = @transform_4, window_bounds = array<i64: 1, 128>}, {pipeline_mode = #tpu.pipeline_mode<synchronous>, transform_indices = @transform_5, window_bounds = array<i64: 1, 128>}, {pipeline_mode = #tpu.pipeline_mode<synchronous>, transform_indices = @transform_6, window_bounds = array<i64: 1, 128>}, {transform_indices = @transform_7, window_bounds = array<i64: 1, 10, 128>}]} {
    %c0 = arith.constant 0 : index
    %c0_0 = arith.constant 0 : index
    %c0_1 = arith.constant 0 : index
    %0 = vector.load %arg1[%c0, %c0_0, %c0_1] : memref<1x10x128xf32, #tpu.memory_space<vmem>>, vector<1x10x128xf32>
    %1 = vector.shape_cast %0 : vector<1x10x128xf32> to vector<10x128xf32>
    %2 = arith.truncf %1 : vector<10x128xf32> to vector<10x128xbf16>
    %c0_2 = arith.constant 0 : index
    %c0_3 = arith.constant 0 : index
    %3 = vector.load %arg2[%c0_2, %c0_3] : memref<128x256xbf16, #tpu.memory_space<vmem>>, vector<128x256xbf16>
    %cst = arith.constant dense<0.000000e+00> : vector<10x256xf32>
    %4 = tpu.matmul %2, %3, %cst {dimension_numbers = #tpu.dot_dimension_numbers<[1], [0], [0], [1], [0, 0, 1, 1], [], []>} : vector<10x128xbf16>, vector<128x256xbf16>, vector<10x256xf32> -> vector<10x256xf32>
    %c0_4 = arith.constant 0 : index
    %c0_5 = arith.constant 0 : index
    %5 = vector.load %arg3[%c0_4, %c0_5] : memref<1x256xf32, #tpu.memory_space<vmem>>, vector<1x256xf32>
    %6 = vector.broadcast %5 : vector<1x256xf32> to vector<10x256xf32>
    %7 = arith.addf %4, %6 : vector<10x256xf32>
    %cst_6 = arith.constant 0.000000e+00 : f32
    %8 = vector.broadcast %cst_6 : f32 to vector<10x256xf32>
    %9 = arith.maximumf %7, %8 : vector<10x256xf32>
    %10 = arith.truncf %9 : vector<10x256xf32> to vector<10x256xbf16>
    %c0_7 = arith.constant 0 : index
    %c0_8 = arith.constant 0 : index
    %11 = vector.load %arg4[%c0_7, %c0_8] : memref<256x128xbf16, #tpu.memory_space<vmem>>, vector<256x128xbf16>
    %cst_9 = arith.constant dense<0.000000e+00> : vector<10x128xf32>
    %12 = tpu.matmul %10, %11, %cst_9 {dimension_numbers = #tpu.dot_dimension_numbers<[1], [0], [0], [1], [0, 0, 1, 1], [], []>} : vector<10x256xbf16>, vector<256x128xbf16>, vector<10x128xf32> -> vector<10x128xf32>
    %c0_10 = arith.constant 0 : index
    %c0_11 = arith.constant 0 : index
    %13 = vector.load %arg5[%c0_10, %c0_11] : memref<1x128xf32, #tpu.memory_space<vmem>>, vector<1x128xf32>
    %14 = vector.broadcast %13 : vector<1x128xf32> to vector<10x128xf32>
    %15 = arith.addf %12, %14 : vector<10x128xf32>
    %16 = arith.addf %1, %15 : vector<10x128xf32>
    %c0_12 = arith.constant 0 : index
    %c0_13 = arith.constant 0 : index
    %17 = vector.load %arg6[%c0_12, %c0_13] : memref<1x128xf32, #tpu.memory_space<vmem>>, vector<1x128xf32>
    %c0_14 = arith.constant 0 : index
    %c0_15 = arith.constant 0 : index
    %18 = vector.load %arg7[%c0_14, %c0_15] : memref<1x128xf32, #tpu.memory_space<vmem>>, vector<1x128xf32>
    %cst_16 = arith.constant dense<0.000000e+00> : vector<10xf32>
    %19 = vector.multi_reduction <add>, %16, %cst_16 [1] : vector<10x128xf32> to vector<10xf32>
    %20 = vector.shape_cast %19 : vector<10xf32> to vector<10x1xf32>
    %cst_17 = arith.constant 1.280000e+02 : f32
    %21 = vector.broadcast %cst_17 : f32 to vector<10x1xf32>
    %22 = arith.divf %20, %21 : vector<10x1xf32>
    %23 = vector.broadcast %22 : vector<10x1xf32> to vector<10x128xf32>
    %24 = arith.subf %16, %23 : vector<10x128xf32>
    %25 = arith.mulf %24, %24 : vector<10x128xf32>
    %cst_18 = arith.constant dense<0.000000e+00> : vector<10xf32>
    %26 = vector.multi_reduction <add>, %25, %cst_18 [1] : vector<10x128xf32> to vector<10xf32>
    %27 = vector.shape_cast %26 : vector<10xf32> to vector<10x1xf32>
    %cst_19 = arith.constant 1.280000e+02 : f32
    %28 = vector.broadcast %cst_19 : f32 to vector<10x1xf32>
    %29 = arith.divf %27, %28 : vector<10x1xf32>
    %30 = vector.broadcast %22 : vector<10x1xf32> to vector<10x128xf32>
    %31 = arith.subf %16, %30 : vector<10x128xf32>
    %cst_20 = arith.constant 9.99999974E-6 : f32
    %32 = vector.broadcast %cst_20 : f32 to vector<10x1xf32>
    %33 = arith.addf %29, %32 : vector<10x1xf32>
    %34 = math.rsqrt %33 : vector<10x1xf32>
    %35 = vector.broadcast %34 : vector<10x1xf32> to vector<10x128xf32>
    %36 = arith.mulf %31, %35 : vector<10x128xf32>
    %37 = vector.broadcast %17 : vector<1x128xf32> to vector<10x128xf32>
    %38 = arith.mulf %36, %37 : vector<10x128xf32>
    %39 = vector.broadcast %18 : vector<1x128xf32> to vector<10x128xf32>
    %40 = arith.addf %38, %39 : vector<10x128xf32>
    %c0_21 = arith.constant 0 : index
    %c0_22 = arith.constant 0 : index
    %c0_23 = arith.constant 0 : index
    %41 = vector.load %arg8[%c0_21, %c0_22, %c0_23] : memref<1x10x128xf32, #tpu.memory_space<vmem>>, vector<1x10x128xf32>
    %42 = vector.shape_cast %41 : vector<1x10x128xf32> to vector<10x128xf32>
    %43 = vector.shape_cast %40 : vector<10x128xf32> to vector<1x10x128xf32>
    tpu.vector_store %arg8[%c0_21, %c0_22, %c0_23], %43 {strides = array<i32>} : memref<1x10x128xf32, #tpu.memory_space<vmem>>, vector<1x10x128xf32>,
    return
  }
  func.func @transform_0(%arg0: i32) -> (i32, i32, i32) {
    %c0_i32 = arith.constant 0 : i32
    %c0_i32_0 = arith.constant 0 : i32
    %c0_i32_1 = arith.constant 0 : i32
    return %arg0, %c0_i32, %c0_i32_0 : i32, i32, i32
  }
  func.func @transform_1(%arg0: i32) -> (i32, i32) {
    %c0_i32 = arith.constant 0 : i32
    %c0_i32_0 = arith.constant 0 : i32
    %c0_i32_1 = arith.constant 0 : i32
    return %c0_i32, %c0_i32_0 : i32, i32
  }
  func.func @transform_2(%arg0: i32) -> (i32, i32) {
    %c0_i32 = arith.constant 0 : i32
    %c0_i32_0 = arith.constant 0 : i32
    %c0_i32_1 = arith.constant 0 : i32
    return %c0_i32, %c0_i32_0 : i32, i32
  }
  func.func @transform_3(%arg0: i32) -> (i32, i32) {
    %c0_i32 = arith.constant 0 : i32
    %c0_i32_0 = arith.constant 0 : i32
    %c0_i32_1 = arith.constant 0 : i32
    return %c0_i32, %c0_i32_0 : i32, i32
  }
  func.func @transform_4(%arg0: i32) -> (i32, i32) {
    %c0_i32 = arith.constant 0 : i32
    %c0_i32_0 = arith.constant 0 : i32
    %c0_i32_1 = arith.constant 0 : i32
    return %c0_i32, %c0_i32_0 : i32, i32
  }
  func.func @transform_5(%arg0: i32) -> (i32, i32) {
    %c0_i32 = arith.constant 0 : i32
    %c0_i32_0 = arith.constant 0 : i32
    %c0_i32_1 = arith.constant 0 : i32
    return %c0_i32, %c0_i32_0 : i32, i32
  }
  func.func @transform_6(%arg0: i32) -> (i32, i32) {
    %c0_i32 = arith.constant 0 : i32
    %c0_i32_0 = arith.constant 0 : i32
    %c0_i32_1 = arith.constant 0 : i32
    return %c0_i32, %c0_i32_0 : i32, i32
  }
  func.func @transform_7(%arg0: i32) -> (i32, i32, i32) {
    %c0_i32 = arith.constant 0 : i32
    %c0_i32_0 = arith.constant 0 : i32
    %c0_i32_1 = arith.constant 0 : i32
    return %arg0, %c0_i32, %c0_i32_0 : i32, i32, i32
  }
}

module attributes {stable_mosaic.version = 11 : i64} {
  func.func @_self_attn_ln_kernel(%arg0: i32, %arg1: memref<1x10x128xf32, #tpu.memory_space<vmem>>, %arg2: memref<128x384xbf16, #tpu.memory_space<vmem>>, %arg3: memref<1x384xf32, #tpu.memory_space<vmem>>, %arg4: memref<128x128xbf16, #tpu.memory_space<vmem>>, %arg5: memref<1x128xf32, #tpu.memory_space<vmem>>, %arg6: memref<1x128xf32, #tpu.memory_space<vmem>>, %arg7: memref<1x128xf32, #tpu.memory_space<vmem>>, %arg8: memref<1x10x128xf32, #tpu.memory_space<vmem>>) attributes {dimension_semantics = [#tpu.dimension_semantics<parallel>], iteration_bounds = array<i64: 2>, scalar_prefetch = 0 : i64, scratch_operands = 0 : i64, tpu.core_type = #tpu.core_type<tc>, window_params = [{transform_indices = @transform_0, window_bounds = array<i64: 1, 10, 128>}, {pipeline_mode = #tpu.pipeline_mode<synchronous>, transform_indices = @transform_1, window_bounds = array<i64: 128, 384>}, {pipeline_mode = #tpu.pipeline_mode<synchronous>, transform_indices = @transform_2, window_bounds = array<i64: 1, 384>}, {pipeline_mode = #tpu.pipeline_mode<synchronous>, transform_indices = @transform_3, window_bounds = array<i64: 128, 128>}, {pipeline_mode = #tpu.pipeline_mode<synchronous>, transform_indices = @transform_4, window_bounds = array<i64: 1, 128>}, {pipeline_mode = #tpu.pipeline_mode<synchronous>, transform_indices = @transform_5, window_bounds = array<i64: 1, 128>}, {pipeline_mode = #tpu.pipeline_mode<synchronous>, transform_indices = @transform_6, window_bounds = array<i64: 1, 128>}, {transform_indices = @transform_7, window_bounds = array<i64: 1, 10, 128>}]} {
    %c0 = arith.constant 0 : index
    %c0_0 = arith.constant 0 : index
    %c0_1 = arith.constant 0 : index
    %0 = vector.load %arg1[%c0, %c0_0, %c0_1] : memref<1x10x128xf32, #tpu.memory_space<vmem>>, vector<1x10x128xf32>
    %1 = vector.shape_cast %0 : vector<1x10x128xf32> to vector<10x128xf32>
    %2 = arith.truncf %1 : vector<10x128xf32> to vector<10x128xbf16>
    %c0_2 = arith.constant 0 : index
    %c0_3 = arith.constant 0 : index
    %3 = vector.load %arg2[%c0_2, %c0_3] : memref<128x384xbf16, #tpu.memory_space<vmem>>, vector<128x384xbf16>
    %cst = arith.constant dense<0.000000e+00> : vector<10x384xf32>
    %4 = tpu.matmul %2, %3, %cst {dimension_numbers = #tpu.dot_dimension_numbers<[1], [0], [0], [1], [0, 0, 1, 1], [], []>} : vector<10x128xbf16>, vector<128x384xbf16>, vector<10x384xf32> -> vector<10x384xf32>
    %c0_4 = arith.constant 0 : index
    %c0_5 = arith.constant 0 : index
    %5 = vector.load %arg3[%c0_4, %c0_5] : memref<1x384xf32, #tpu.memory_space<vmem>>, vector<1x384xf32>
    %6 = vector.broadcast %5 : vector<1x384xf32> to vector<10x384xf32>
    %7 = arith.addf %4, %6 : vector<10x384xf32>
    %8 = vector.extract_strided_slice %7 {offsets = [0, 0], sizes = [10, 128], strides = [1, 1]} : vector<10x384xf32> to vector<10x128xf32>
    %9 = vector.extract_strided_slice %7 {offsets = [0, 128], sizes = [10, 128], strides = [1, 1]} : vector<10x384xf32> to vector<10x128xf32>
    %10 = vector.extract_strided_slice %7 {offsets = [0, 256], sizes = [10, 128], strides = [1, 1]} : vector<10x384xf32> to vector<10x128xf32>
    %cst_6 = arith.constant 0.000000e+00 : f32
    %11 = vector.broadcast %cst_6 : f32 to vector<10x128xf32>
    %12 = vector.extract_strided_slice %8 {offsets = [0, 0], sizes = [10, 32], strides = [1, 1]} : vector<10x128xf32> to vector<10x32xf32>
    %cst_7 = arith.constant 0.176776692 : f32
    %13 = vector.broadcast %cst_7 : f32 to vector<10x32xf32>
    %14 = arith.mulf %12, %13 : vector<10x32xf32>
    %15 = arith.truncf %14 : vector<10x32xf32> to vector<10x32xbf16>
    %16 = vector.extract_strided_slice %9 {offsets = [0, 0], sizes = [10, 32], strides = [1, 1]} : vector<10x128xf32> to vector<10x32xf32>
    %17 = arith.truncf %16 : vector<10x32xf32> to vector<10x32xbf16>
    %18 = vector.extract_strided_slice %10 {offsets = [0, 0], sizes = [10, 32], strides = [1, 1]} : vector<10x128xf32> to vector<10x32xf32>
    %19 = arith.truncf %18 : vector<10x32xf32> to vector<10x32xbf16>
    %cst_8 = arith.constant dense<0.000000e+00> : vector<10x10xf32>
    %20 = tpu.matmul %15, %17, %cst_8 {dimension_numbers = #tpu.dot_dimension_numbers<[1], [1], [0], [0], [0, 0, 1, 0], [], []>} : vector<10x32xbf16>, vector<10x32xbf16>, vector<10x10xf32> -> vector<10x10xf32>
    %cst_9 = arith.constant dense<0xFF800000> : vector<10xf32>
    %21 = vector.multi_reduction <maximumf>, %20, %cst_9 [1] : vector<10x10xf32> to vector<10xf32>
    %22 = vector.shape_cast %21 : vector<10xf32> to vector<10x1xf32>
    %23 = vector.broadcast %22 : vector<10x1xf32> to vector<10x10xf32>
    %24 = arith.subf %20, %23 : vector<10x10xf32>
    %25 = math.exp %24 : vector<10x10xf32>
    %cst_10 = arith.constant dense<0.000000e+00> : vector<10xf32>
    %26 = vector.multi_reduction <add>, %25, %cst_10 [1] : vector<10x10xf32> to vector<10xf32>
    %27 = vector.shape_cast %26 : vector<10xf32> to vector<10x1xf32>
    %28 = tpu.reciprocal %27 {approx = true} : vector<10x1xf32> -> vector<10x1xf32>
    %29 = vector.broadcast %28 : vector<10x1xf32> to vector<10x10xf32>
    %30 = arith.mulf %25, %29 : vector<10x10xf32>
    %31 = arith.truncf %30 : vector<10x10xf32> to vector<10x10xbf16>
    %cst_11 = arith.constant dense<0.000000e+00> : vector<10x32xf32>
    %32 = tpu.matmul %31, %19, %cst_11 {dimension_numbers = #tpu.dot_dimension_numbers<[1], [0], [0], [1], [0, 0, 1, 1], [], []>} : vector<10x10xbf16>, vector<10x32xbf16>, vector<10x32xf32> -> vector<10x32xf32>
    %33 = arith.truncf %32 : vector<10x32xf32> to vector<10x32xbf16>
    %c0_12 = arith.constant 0 : index
    %c0_13 = arith.constant 0 : index
    %34 = vector.load %arg4[%c0_12, %c0_13] : memref<128x128xbf16, #tpu.memory_space<vmem>>, vector<32x128xbf16>
    %cst_14 = arith.constant dense<0.000000e+00> : vector<10x128xf32>
    %35 = tpu.matmul %33, %34, %cst_14 {dimension_numbers = #tpu.dot_dimension_numbers<[1], [0], [0], [1], [0, 0, 1, 1], [], []>} : vector<10x32xbf16>, vector<32x128xbf16>, vector<10x128xf32> -> vector<10x128xf32>
    %36 = arith.addf %11, %35 : vector<10x128xf32>
    %37 = vector.extract_strided_slice %8 {offsets = [0, 32], sizes = [10, 32], strides = [1, 1]} : vector<10x128xf32> to vector<10x32xf32>
    %cst_15 = arith.constant 0.176776692 : f32
    %38 = vector.broadcast %cst_15 : f32 to vector<10x32xf32>
    %39 = arith.mulf %37, %38 : vector<10x32xf32>
    %40 = arith.truncf %39 : vector<10x32xf32> to vector<10x32xbf16>
    %41 = vector.extract_strided_slice %9 {offsets = [0, 32], sizes = [10, 32], strides = [1, 1]} : vector<10x128xf32> to vector<10x32xf32>
    %42 = arith.truncf %41 : vector<10x32xf32> to vector<10x32xbf16>
    %43 = vector.extract_strided_slice %10 {offsets = [0, 32], sizes = [10, 32], strides = [1, 1]} : vector<10x128xf32> to vector<10x32xf32>
    %44 = arith.truncf %43 : vector<10x32xf32> to vector<10x32xbf16>
    %cst_16 = arith.constant dense<0.000000e+00> : vector<10x10xf32>
    %45 = tpu.matmul %40, %42, %cst_16 {dimension_numbers = #tpu.dot_dimension_numbers<[1], [1], [0], [0], [0, 0, 1, 0], [], []>} : vector<10x32xbf16>, vector<10x32xbf16>, vector<10x10xf32> -> vector<10x10xf32>
    %cst_17 = arith.constant dense<0xFF800000> : vector<10xf32>
    %46 = vector.multi_reduction <maximumf>, %45, %cst_17 [1] : vector<10x10xf32> to vector<10xf32>
    %47 = vector.shape_cast %46 : vector<10xf32> to vector<10x1xf32>
    %48 = vector.broadcast %47 : vector<10x1xf32> to vector<10x10xf32>
    %49 = arith.subf %45, %48 : vector<10x10xf32>
    %50 = math.exp %49 : vector<10x10xf32>
    %cst_18 = arith.constant dense<0.000000e+00> : vector<10xf32>
    %51 = vector.multi_reduction <add>, %50, %cst_18 [1] : vector<10x10xf32> to vector<10xf32>
    %52 = vector.shape_cast %51 : vector<10xf32> to vector<10x1xf32>
    %53 = tpu.reciprocal %52 {approx = true} : vector<10x1xf32> -> vector<10x1xf32>
    %54 = vector.broadcast %53 : vector<10x1xf32> to vector<10x10xf32>
    %55 = arith.mulf %50, %54 : vector<10x10xf32>
    %56 = arith.truncf %55 : vector<10x10xf32> to vector<10x10xbf16>
    %cst_19 = arith.constant dense<0.000000e+00> : vector<10x32xf32>
    %57 = tpu.matmul %56, %44, %cst_19 {dimension_numbers = #tpu.dot_dimension_numbers<[1], [0], [0], [1], [0, 0, 1, 1], [], []>} : vector<10x10xbf16>, vector<10x32xbf16>, vector<10x32xf32> -> vector<10x32xf32>
    %58 = arith.truncf %57 : vector<10x32xf32> to vector<10x32xbf16>
    %c32 = arith.constant 32 : index
    %c0_20 = arith.constant 0 : index
    %59 = vector.load %arg4[%c32, %c0_20] : memref<128x128xbf16, #tpu.memory_space<vmem>>, vector<32x128xbf16>
    %cst_21 = arith.constant dense<0.000000e+00> : vector<10x128xf32>
    %60 = tpu.matmul %58, %59, %cst_21 {dimension_numbers = #tpu.dot_dimension_numbers<[1], [0], [0], [1], [0, 0, 1, 1], [], []>} : vector<10x32xbf16>, vector<32x128xbf16>, vector<10x128xf32> -> vector<10x128xf32>
    %61 = arith.addf %36, %60 : vector<10x128xf32>
    %62 = vector.extract_strided_slice %8 {offsets = [0, 64], sizes = [10, 32], strides = [1, 1]} : vector<10x128xf32> to vector<10x32xf32>
    %cst_22 = arith.constant 0.176776692 : f32
    %63 = vector.broadcast %cst_22 : f32 to vector<10x32xf32>
    %64 = arith.mulf %62, %63 : vector<10x32xf32>
    %65 = arith.truncf %64 : vector<10x32xf32> to vector<10x32xbf16>
    %66 = vector.extract_strided_slice %9 {offsets = [0, 64], sizes = [10, 32], strides = [1, 1]} : vector<10x128xf32> to vector<10x32xf32>
    %67 = arith.truncf %66 : vector<10x32xf32> to vector<10x32xbf16>
    %68 = vector.extract_strided_slice %10 {offsets = [0, 64], sizes = [10, 32], strides = [1, 1]} : vector<10x128xf32> to vector<10x32xf32>
    %69 = arith.truncf %68 : vector<10x32xf32> to vector<10x32xbf16>
    %cst_23 = arith.constant dense<0.000000e+00> : vector<10x10xf32>
    %70 = tpu.matmul %65, %67, %cst_23 {dimension_numbers = #tpu.dot_dimension_numbers<[1], [1], [0], [0], [0, 0, 1, 0], [], []>} : vector<10x32xbf16>, vector<10x32xbf16>, vector<10x10xf32> -> vector<10x10xf32>
    %cst_24 = arith.constant dense<0xFF800000> : vector<10xf32>
    %71 = vector.multi_reduction <maximumf>, %70, %cst_24 [1] : vector<10x10xf32> to vector<10xf32>
    %72 = vector.shape_cast %71 : vector<10xf32> to vector<10x1xf32>
    %73 = vector.broadcast %72 : vector<10x1xf32> to vector<10x10xf32>
    %74 = arith.subf %70, %73 : vector<10x10xf32>
    %75 = math.exp %74 : vector<10x10xf32>
    %cst_25 = arith.constant dense<0.000000e+00> : vector<10xf32>
    %76 = vector.multi_reduction <add>, %75, %cst_25 [1] : vector<10x10xf32> to vector<10xf32>
    %77 = vector.shape_cast %76 : vector<10xf32> to vector<10x1xf32>
    %78 = tpu.reciprocal %77 {approx = true} : vector<10x1xf32> -> vector<10x1xf32>
    %79 = vector.broadcast %78 : vector<10x1xf32> to vector<10x10xf32>
    %80 = arith.mulf %75, %79 : vector<10x10xf32>
    %81 = arith.truncf %80 : vector<10x10xf32> to vector<10x10xbf16>
    %cst_26 = arith.constant dense<0.000000e+00> : vector<10x32xf32>
    %82 = tpu.matmul %81, %69, %cst_26 {dimension_numbers = #tpu.dot_dimension_numbers<[1], [0], [0], [1], [0, 0, 1, 1], [], []>} : vector<10x10xbf16>, vector<10x32xbf16>, vector<10x32xf32> -> vector<10x32xf32>
    %83 = arith.truncf %82 : vector<10x32xf32> to vector<10x32xbf16>
    %c64 = arith.constant 64 : index
    %c0_27 = arith.constant 0 : index
    %84 = vector.load %arg4[%c64, %c0_27] : memref<128x128xbf16, #tpu.memory_space<vmem>>, vector<32x128xbf16>
    %cst_28 = arith.constant dense<0.000000e+00> : vector<10x128xf32>
    %85 = tpu.matmul %83, %84, %cst_28 {dimension_numbers = #tpu.dot_dimension_numbers<[1], [0], [0], [1], [0, 0, 1, 1], [], []>} : vector<10x32xbf16>, vector<32x128xbf16>, vector<10x128xf32> -> vector<10x128xf32>
    %86 = arith.addf %61, %85 : vector<10x128xf32>
    %87 = vector.extract_strided_slice %8 {offsets = [0, 96], sizes = [10, 32], strides = [1, 1]} : vector<10x128xf32> to vector<10x32xf32>
    %cst_29 = arith.constant 0.176776692 : f32
    %88 = vector.broadcast %cst_29 : f32 to vector<10x32xf32>
    %89 = arith.mulf %87, %88 : vector<10x32xf32>
    %90 = arith.truncf %89 : vector<10x32xf32> to vector<10x32xbf16>
    %91 = vector.extract_strided_slice %9 {offsets = [0, 96], sizes = [10, 32], strides = [1, 1]} : vector<10x128xf32> to vector<10x32xf32>
    %92 = arith.truncf %91 : vector<10x32xf32> to vector<10x32xbf16>
    %93 = vector.extract_strided_slice %10 {offsets = [0, 96], sizes = [10, 32], strides = [1, 1]} : vector<10x128xf32> to vector<10x32xf32>
    %94 = arith.truncf %93 : vector<10x32xf32> to vector<10x32xbf16>
    %cst_30 = arith.constant dense<0.000000e+00> : vector<10x10xf32>
    %95 = tpu.matmul %90, %92, %cst_30 {dimension_numbers = #tpu.dot_dimension_numbers<[1], [1], [0], [0], [0, 0, 1, 0], [], []>} : vector<10x32xbf16>, vector<10x32xbf16>, vector<10x10xf32> -> vector<10x10xf32>
    %cst_31 = arith.constant dense<0xFF800000> : vector<10xf32>
    %96 = vector.multi_reduction <maximumf>, %95, %cst_31 [1] : vector<10x10xf32> to vector<10xf32>
    %97 = vector.shape_cast %96 : vector<10xf32> to vector<10x1xf32>
    %98 = vector.broadcast %97 : vector<10x1xf32> to vector<10x10xf32>
    %99 = arith.subf %95, %98 : vector<10x10xf32>
    %100 = math.exp %99 : vector<10x10xf32>
    %cst_32 = arith.constant dense<0.000000e+00> : vector<10xf32>
    %101 = vector.multi_reduction <add>, %100, %cst_32 [1] : vector<10x10xf32> to vector<10xf32>
    %102 = vector.shape_cast %101 : vector<10xf32> to vector<10x1xf32>
    %103 = tpu.reciprocal %102 {approx = true} : vector<10x1xf32> -> vector<10x1xf32>
    %104 = vector.broadcast %103 : vector<10x1xf32> to vector<10x10xf32>
    %105 = arith.mulf %100, %104 : vector<10x10xf32>
    %106 = arith.truncf %105 : vector<10x10xf32> to vector<10x10xbf16>
    %cst_33 = arith.constant dense<0.000000e+00> : vector<10x32xf32>
    %107 = tpu.matmul %106, %94, %cst_33 {dimension_numbers = #tpu.dot_dimension_numbers<[1], [0], [0], [1], [0, 0, 1, 1], [], []>} : vector<10x10xbf16>, vector<10x32xbf16>, vector<10x32xf32> -> vector<10x32xf32>
    %108 = arith.truncf %107 : vector<10x32xf32> to vector<10x32xbf16>
    %c96 = arith.constant 96 : index
    %c0_34 = arith.constant 0 : index
    %109 = vector.load %arg4[%c96, %c0_34] : memref<128x128xbf16, #tpu.memory_space<vmem>>, vector<32x128xbf16>
    %cst_35 = arith.constant dense<0.000000e+00> : vector<10x128xf32>
    %110 = tpu.matmul %108, %109, %cst_35 {dimension_numbers = #tpu.dot_dimension_numbers<[1], [0], [0], [1], [0, 0, 1, 1], [], []>} : vector<10x32xbf16>, vector<32x128xbf16>, vector<10x128xf32> -> vector<10x128xf32>
    %111 = arith.addf %86, %110 : vector<10x128xf32>
    %112 = arith.addf %1, %111 : vector<10x128xf32>
    %c0_36 = arith.constant 0 : index
    %c0_37 = arith.constant 0 : index
    %113 = vector.load %arg5[%c0_36, %c0_37] : memref<1x128xf32, #tpu.memory_space<vmem>>, vector<1x128xf32>
    %114 = vector.broadcast %113 : vector<1x128xf32> to vector<10x128xf32>
    %115 = arith.addf %112, %114 : vector<10x128xf32>
    %c0_38 = arith.constant 0 : index
    %c0_39 = arith.constant 0 : index
    %116 = vector.load %arg6[%c0_38, %c0_39] : memref<1x128xf32, #tpu.memory_space<vmem>>, vector<1x128xf32>
    %c0_40 = arith.constant 0 : index
    %c0_41 = arith.constant 0 : index
    %117 = vector.load %arg7[%c0_40, %c0_41] : memref<1x128xf32, #tpu.memory_space<vmem>>, vector<1x128xf32>
    %cst_42 = arith.constant dense<0.000000e+00> : vector<10xf32>
    %118 = vector.multi_reduction <add>, %115, %cst_42 [1] : vector<10x128xf32> to vector<10xf32>
    %119 = vector.shape_cast %118 : vector<10xf32> to vector<10x1xf32>
    %cst_43 = arith.constant 1.280000e+02 : f32
    %120 = vector.broadcast %cst_43 : f32 to vector<10x1xf32>
    %121 = arith.divf %119, %120 : vector<10x1xf32>
    %122 = vector.broadcast %121 : vector<10x1xf32> to vector<10x128xf32>
    %123 = arith.subf %115, %122 : vector<10x128xf32>
    %124 = arith.mulf %123, %123 : vector<10x128xf32>
    %cst_44 = arith.constant dense<0.000000e+00> : vector<10xf32>
    %125 = vector.multi_reduction <add>, %124, %cst_44 [1] : vector<10x128xf32> to vector<10xf32>
    %126 = vector.shape_cast %125 : vector<10xf32> to vector<10x1xf32>
    %cst_45 = arith.constant 1.280000e+02 : f32
    %127 = vector.broadcast %cst_45 : f32 to vector<10x1xf32>
    %128 = arith.divf %126, %127 : vector<10x1xf32>
    %129 = vector.broadcast %121 : vector<10x1xf32> to vector<10x128xf32>
    %130 = arith.subf %115, %129 : vector<10x128xf32>
    %cst_46 = arith.constant 9.99999974E-6 : f32
    %131 = vector.broadcast %cst_46 : f32 to vector<10x1xf32>
    %132 = arith.addf %128, %131 : vector<10x1xf32>
    %133 = math.rsqrt %132 : vector<10x1xf32>
    %134 = vector.broadcast %133 : vector<10x1xf32> to vector<10x128xf32>
    %135 = arith.mulf %130, %134 : vector<10x128xf32>
    %136 = vector.broadcast %116 : vector<1x128xf32> to vector<10x128xf32>
    %137 = arith.mulf %135, %136 : vector<10x128xf32>
    %138 = vector.broadcast %117 : vector<1x128xf32> to vector<10x128xf32>
    %139 = arith.addf %137, %138 : vector<10x128xf32>
    %c0_47 = arith.constant 0 : index
    %c0_48 = arith.constant 0 : index
    %c0_49 = arith.constant 0 : index
    %140 = vector.load %arg8[%c0_47, %c0_48, %c0_49] : memref<1x10x128xf32, #tpu.memory_space<vmem>>, vector<1x10x128xf32>
    %141 = vector.shape_cast %140 : vector<1x10x128xf32> to vector<10x128xf32>
    %142 = vector.shape_cast %139 : vector<10x128xf32> to vector<1x10x128xf32>
    tpu.vector_store %arg8[%c0_47, %c0_48, %c0_49], %142 {strides = array<i32>} : memref<1x10x128xf32, #tpu.memory_space<vmem>>, vector<1x10x128xf32>,
    return
  }
  func.func @transform_0(%arg0: i32) -> (i32, i32, i32) {
    %c0_i32 = arith.constant 0 : i32
    %c0_i32_0 = arith.constant 0 : i32
    %c0_i32_1 = arith.constant 0 : i32
    return %arg0, %c0_i32, %c0_i32_0 : i32, i32, i32
  }
  func.func @transform_1(%arg0: i32) -> (i32, i32) {
    %c0_i32 = arith.constant 0 : i32
    %c0_i32_0 = arith.constant 0 : i32
    %c0_i32_1 = arith.constant 0 : i32
    return %c0_i32, %c0_i32_0 : i32, i32
  }
  func.func @transform_2(%arg0: i32) -> (i32, i32) {
    %c0_i32 = arith.constant 0 : i32
    %c0_i32_0 = arith.constant 0 : i32
    %c0_i32_1 = arith.constant 0 : i32
    return %c0_i32, %c0_i32_0 : i32, i32
  }
  func.func @transform_3(%arg0: i32) -> (i32, i32) {
    %c0_i32 = arith.constant 0 : i32
    %c0_i32_0 = arith.constant 0 : i32
    %c0_i32_1 = arith.constant 0 : i32
    return %c0_i32, %c0_i32_0 : i32, i32
  }
  func.func @transform_4(%arg0: i32) -> (i32, i32) {
    %c0_i32 = arith.constant 0 : i32
    %c0_i32_0 = arith.constant 0 : i32
    %c0_i32_1 = arith.constant 0 : i32
    return %c0_i32, %c0_i32_0 : i32, i32
  }
  func.func @transform_5(%arg0: i32) -> (i32, i32) {
    %c0_i32 = arith.constant 0 : i32
    %c0_i32_0 = arith.constant 0 : i32
    %c0_i32_1 = arith.constant 0 : i32
    return %c0_i32, %c0_i32_0 : i32, i32
  }
  func.func @transform_6(%arg0: i32) -> (i32, i32) {
    %c0_i32 = arith.constant 0 : i32
    %c0_i32_0 = arith.constant 0 : i32
    %c0_i32_1 = arith.constant 0 : i32
    return %c0_i32, %c0_i32_0 : i32, i32
  }
  func.func @transform_7(%arg0: i32) -> (i32, i32, i32) {
    %c0_i32 = arith.constant 0 : i32
    %c0_i32_0 = arith.constant 0 : i32
    %c0_i32_1 = arith.constant 0 : i32
    return %arg0, %c0_i32, %c0_i32_0 : i32, i32, i32
  }
}

module attributes {stable_mosaic.version = 11 : i64} {
  func.func @_layer_norm_kernel(%arg0: memref<20x128xf32, #tpu.memory_space<vmem>>, %arg1: memref<1x128xf32, #tpu.memory_space<vmem>>, %arg2: memref<1x128xf32, #tpu.memory_space<vmem>>, %arg3: memref<20x128xf32, #tpu.memory_space<vmem>>) attributes {dimension_semantics = [], scalar_prefetch = 0 : i64, scratch_operands = 0 : i64, tpu.core_type = #tpu.core_type<tc>} {
    %c0 = arith.constant 0 : index
    %c0_0 = arith.constant 0 : index
    %0 = vector.load %arg0[%c0, %c0_0] : memref<20x128xf32, #tpu.memory_space<vmem>>, vector<20x128xf32>
    %c0_1 = arith.constant 0 : index
    %c0_2 = arith.constant 0 : index
    %1 = vector.load %arg1[%c0_1, %c0_2] : memref<1x128xf32, #tpu.memory_space<vmem>>, vector<1x128xf32>
    %c0_3 = arith.constant 0 : index
    %c0_4 = arith.constant 0 : index
    %2 = vector.load %arg2[%c0_3, %c0_4] : memref<1x128xf32, #tpu.memory_space<vmem>>, vector<1x128xf32>
    %cst = arith.constant dense<0.000000e+00> : vector<20xf32>
    %3 = vector.multi_reduction <add>, %0, %cst [1] : vector<20x128xf32> to vector<20xf32>
    %4 = vector.shape_cast %3 : vector<20xf32> to vector<20x1xf32>
    %cst_5 = arith.constant 1.280000e+02 : f32
    %5 = vector.broadcast %cst_5 : f32 to vector<20x1xf32>
    %6 = arith.divf %4, %5 : vector<20x1xf32>
    %7 = vector.broadcast %6 : vector<20x1xf32> to vector<20x128xf32>
    %8 = arith.subf %0, %7 : vector<20x128xf32>
    %9 = arith.mulf %8, %8 : vector<20x128xf32>
    %cst_6 = arith.constant dense<0.000000e+00> : vector<20xf32>
    %10 = vector.multi_reduction <add>, %9, %cst_6 [1] : vector<20x128xf32> to vector<20xf32>
    %11 = vector.shape_cast %10 : vector<20xf32> to vector<20x1xf32>
    %cst_7 = arith.constant 1.280000e+02 : f32
    %12 = vector.broadcast %cst_7 : f32 to vector<20x1xf32>
    %13 = arith.divf %11, %12 : vector<20x1xf32>
    %14 = vector.broadcast %6 : vector<20x1xf32> to vector<20x128xf32>
    %15 = arith.subf %0, %14 : vector<20x128xf32>
    %cst_8 = arith.constant 9.99999974E-6 : f32
    %16 = vector.broadcast %cst_8 : f32 to vector<20x1xf32>
    %17 = arith.addf %13, %16 : vector<20x1xf32>
    %18 = math.rsqrt %17 : vector<20x1xf32>
    %19 = vector.broadcast %18 : vector<20x1xf32> to vector<20x128xf32>
    %20 = arith.mulf %15, %19 : vector<20x128xf32>
    %21 = vector.broadcast %1 : vector<1x128xf32> to vector<20x128xf32>
    %22 = arith.mulf %20, %21 : vector<20x128xf32>
    %23 = vector.broadcast %2 : vector<1x128xf32> to vector<20x128xf32>
    %24 = arith.addf %22, %23 : vector<20x128xf32>
    %c0_9 = arith.constant 0 : index
    %c0_10 = arith.constant 0 : index
    %25 = vector.load %arg3[%c0_9, %c0_10] : memref<20x128xf32, #tpu.memory_space<vmem>>, vector<20x128xf32>
    tpu.vector_store %arg3[%c0_9, %c0_10], %24 {strides = array<i32>} : memref<20x128xf32, #tpu.memory_space<vmem>>, vector<20x128xf32>,
    return
  }
}

module attributes {stable_mosaic.version = 11 : i64} {
  func.func @_self_attn_ln_kernel(%arg0: i32, %arg1: memref<1x8x128xf32, #tpu.memory_space<vmem>>, %arg2: memref<128x384xbf16, #tpu.memory_space<vmem>>, %arg3: memref<1x384xf32, #tpu.memory_space<vmem>>, %arg4: memref<128x128xbf16, #tpu.memory_space<vmem>>, %arg5: memref<1x128xf32, #tpu.memory_space<vmem>>, %arg6: memref<1x128xf32, #tpu.memory_space<vmem>>, %arg7: memref<1x128xf32, #tpu.memory_space<vmem>>, %arg8: memref<1x8x128xf32, #tpu.memory_space<vmem>>) attributes {dimension_semantics = [#tpu.dimension_semantics<parallel>], iteration_bounds = array<i64: 2>, scalar_prefetch = 0 : i64, scratch_operands = 0 : i64, tpu.core_type = #tpu.core_type<tc>, window_params = [{transform_indices = @transform_0, window_bounds = array<i64: 1, 8, 128>}, {pipeline_mode = #tpu.pipeline_mode<synchronous>, transform_indices = @transform_1, window_bounds = array<i64: 128, 384>}, {pipeline_mode = #tpu.pipeline_mode<synchronous>, transform_indices = @transform_2, window_bounds = array<i64: 1, 384>}, {pipeline_mode = #tpu.pipeline_mode<synchronous>, transform_indices = @transform_3, window_bounds = array<i64: 128, 128>}, {pipeline_mode = #tpu.pipeline_mode<synchronous>, transform_indices = @transform_4, window_bounds = array<i64: 1, 128>}, {pipeline_mode = #tpu.pipeline_mode<synchronous>, transform_indices = @transform_5, window_bounds = array<i64: 1, 128>}, {pipeline_mode = #tpu.pipeline_mode<synchronous>, transform_indices = @transform_6, window_bounds = array<i64: 1, 128>}, {transform_indices = @transform_7, window_bounds = array<i64: 1, 8, 128>}]} {
    %c0 = arith.constant 0 : index
    %c0_0 = arith.constant 0 : index
    %c0_1 = arith.constant 0 : index
    %0 = vector.load %arg1[%c0, %c0_0, %c0_1] : memref<1x8x128xf32, #tpu.memory_space<vmem>>, vector<1x8x128xf32>
    %1 = vector.shape_cast %0 : vector<1x8x128xf32> to vector<8x128xf32>
    %2 = arith.truncf %1 : vector<8x128xf32> to vector<8x128xbf16>
    %c0_2 = arith.constant 0 : index
    %c0_3 = arith.constant 0 : index
    %3 = vector.load %arg2[%c0_2, %c0_3] : memref<128x384xbf16, #tpu.memory_space<vmem>>, vector<128x384xbf16>
    %cst = arith.constant dense<0.000000e+00> : vector<8x384xf32>
    %4 = tpu.matmul %2, %3, %cst {dimension_numbers = #tpu.dot_dimension_numbers<[1], [0], [0], [1], [0, 0, 1, 1], [], []>} : vector<8x128xbf16>, vector<128x384xbf16>, vector<8x384xf32> -> vector<8x384xf32>
    %c0_4 = arith.constant 0 : index
    %c0_5 = arith.constant 0 : index
    %5 = vector.load %arg3[%c0_4, %c0_5] : memref<1x384xf32, #tpu.memory_space<vmem>>, vector<1x384xf32>
    %6 = vector.broadcast %5 : vector<1x384xf32> to vector<8x384xf32>
    %7 = arith.addf %4, %6 : vector<8x384xf32>
    %8 = vector.extract_strided_slice %7 {offsets = [0, 0], sizes = [8, 128], strides = [1, 1]} : vector<8x384xf32> to vector<8x128xf32>
    %9 = vector.extract_strided_slice %7 {offsets = [0, 128], sizes = [8, 128], strides = [1, 1]} : vector<8x384xf32> to vector<8x128xf32>
    %10 = vector.extract_strided_slice %7 {offsets = [0, 256], sizes = [8, 128], strides = [1, 1]} : vector<8x384xf32> to vector<8x128xf32>
    %cst_6 = arith.constant 0.000000e+00 : f32
    %11 = vector.broadcast %cst_6 : f32 to vector<8x128xf32>
    %12 = vector.extract_strided_slice %8 {offsets = [0, 0], sizes = [8, 32], strides = [1, 1]} : vector<8x128xf32> to vector<8x32xf32>
    %cst_7 = arith.constant 0.176776692 : f32
    %13 = vector.broadcast %cst_7 : f32 to vector<8x32xf32>
    %14 = arith.mulf %12, %13 : vector<8x32xf32>
    %15 = arith.truncf %14 : vector<8x32xf32> to vector<8x32xbf16>
    %16 = vector.extract_strided_slice %9 {offsets = [0, 0], sizes = [8, 32], strides = [1, 1]} : vector<8x128xf32> to vector<8x32xf32>
    %17 = arith.truncf %16 : vector<8x32xf32> to vector<8x32xbf16>
    %18 = vector.extract_strided_slice %10 {offsets = [0, 0], sizes = [8, 32], strides = [1, 1]} : vector<8x128xf32> to vector<8x32xf32>
    %19 = arith.truncf %18 : vector<8x32xf32> to vector<8x32xbf16>
    %cst_8 = arith.constant dense<0.000000e+00> : vector<8x8xf32>
    %20 = tpu.matmul %15, %17, %cst_8 {dimension_numbers = #tpu.dot_dimension_numbers<[1], [1], [0], [0], [0, 0, 1, 0], [], []>} : vector<8x32xbf16>, vector<8x32xbf16>, vector<8x8xf32> -> vector<8x8xf32>
    %cst_9 = arith.constant dense<0xFF800000> : vector<8xf32>
    %21 = vector.multi_reduction <maximumf>, %20, %cst_9 [1] : vector<8x8xf32> to vector<8xf32>
    %22 = vector.shape_cast %21 : vector<8xf32> to vector<8x1xf32>
    %23 = vector.broadcast %22 : vector<8x1xf32> to vector<8x8xf32>
    %24 = arith.subf %20, %23 : vector<8x8xf32>
    %25 = math.exp %24 : vector<8x8xf32>
    %cst_10 = arith.constant dense<0.000000e+00> : vector<8xf32>
    %26 = vector.multi_reduction <add>, %25, %cst_10 [1] : vector<8x8xf32> to vector<8xf32>
    %27 = vector.shape_cast %26 : vector<8xf32> to vector<8x1xf32>
    %28 = tpu.reciprocal %27 {approx = true} : vector<8x1xf32> -> vector<8x1xf32>
    %29 = vector.broadcast %28 : vector<8x1xf32> to vector<8x8xf32>
    %30 = arith.mulf %25, %29 : vector<8x8xf32>
    %31 = arith.truncf %30 : vector<8x8xf32> to vector<8x8xbf16>
    %cst_11 = arith.constant dense<0.000000e+00> : vector<8x32xf32>
    %32 = tpu.matmul %31, %19, %cst_11 {dimension_numbers = #tpu.dot_dimension_numbers<[1], [0], [0], [1], [0, 0, 1, 1], [], []>} : vector<8x8xbf16>, vector<8x32xbf16>, vector<8x32xf32> -> vector<8x32xf32>
    %33 = arith.truncf %32 : vector<8x32xf32> to vector<8x32xbf16>
    %c0_12 = arith.constant 0 : index
    %c0_13 = arith.constant 0 : index
    %34 = vector.load %arg4[%c0_12, %c0_13] : memref<128x128xbf16, #tpu.memory_space<vmem>>, vector<32x128xbf16>
    %cst_14 = arith.constant dense<0.000000e+00> : vector<8x128xf32>
    %35 = tpu.matmul %33, %34, %cst_14 {dimension_numbers = #tpu.dot_dimension_numbers<[1], [0], [0], [1], [0, 0, 1, 1], [], []>} : vector<8x32xbf16>, vector<32x128xbf16>, vector<8x128xf32> -> vector<8x128xf32>
    %36 = arith.addf %11, %35 : vector<8x128xf32>
    %37 = vector.extract_strided_slice %8 {offsets = [0, 32], sizes = [8, 32], strides = [1, 1]} : vector<8x128xf32> to vector<8x32xf32>
    %cst_15 = arith.constant 0.176776692 : f32
    %38 = vector.broadcast %cst_15 : f32 to vector<8x32xf32>
    %39 = arith.mulf %37, %38 : vector<8x32xf32>
    %40 = arith.truncf %39 : vector<8x32xf32> to vector<8x32xbf16>
    %41 = vector.extract_strided_slice %9 {offsets = [0, 32], sizes = [8, 32], strides = [1, 1]} : vector<8x128xf32> to vector<8x32xf32>
    %42 = arith.truncf %41 : vector<8x32xf32> to vector<8x32xbf16>
    %43 = vector.extract_strided_slice %10 {offsets = [0, 32], sizes = [8, 32], strides = [1, 1]} : vector<8x128xf32> to vector<8x32xf32>
    %44 = arith.truncf %43 : vector<8x32xf32> to vector<8x32xbf16>
    %cst_16 = arith.constant dense<0.000000e+00> : vector<8x8xf32>
    %45 = tpu.matmul %40, %42, %cst_16 {dimension_numbers = #tpu.dot_dimension_numbers<[1], [1], [0], [0], [0, 0, 1, 0], [], []>} : vector<8x32xbf16>, vector<8x32xbf16>, vector<8x8xf32> -> vector<8x8xf32>
    %cst_17 = arith.constant dense<0xFF800000> : vector<8xf32>
    %46 = vector.multi_reduction <maximumf>, %45, %cst_17 [1] : vector<8x8xf32> to vector<8xf32>
    %47 = vector.shape_cast %46 : vector<8xf32> to vector<8x1xf32>
    %48 = vector.broadcast %47 : vector<8x1xf32> to vector<8x8xf32>
    %49 = arith.subf %45, %48 : vector<8x8xf32>
    %50 = math.exp %49 : vector<8x8xf32>
    %cst_18 = arith.constant dense<0.000000e+00> : vector<8xf32>
    %51 = vector.multi_reduction <add>, %50, %cst_18 [1] : vector<8x8xf32> to vector<8xf32>
    %52 = vector.shape_cast %51 : vector<8xf32> to vector<8x1xf32>
    %53 = tpu.reciprocal %52 {approx = true} : vector<8x1xf32> -> vector<8x1xf32>
    %54 = vector.broadcast %53 : vector<8x1xf32> to vector<8x8xf32>
    %55 = arith.mulf %50, %54 : vector<8x8xf32>
    %56 = arith.truncf %55 : vector<8x8xf32> to vector<8x8xbf16>
    %cst_19 = arith.constant dense<0.000000e+00> : vector<8x32xf32>
    %57 = tpu.matmul %56, %44, %cst_19 {dimension_numbers = #tpu.dot_dimension_numbers<[1], [0], [0], [1], [0, 0, 1, 1], [], []>} : vector<8x8xbf16>, vector<8x32xbf16>, vector<8x32xf32> -> vector<8x32xf32>
    %58 = arith.truncf %57 : vector<8x32xf32> to vector<8x32xbf16>
    %c32 = arith.constant 32 : index
    %c0_20 = arith.constant 0 : index
    %59 = vector.load %arg4[%c32, %c0_20] : memref<128x128xbf16, #tpu.memory_space<vmem>>, vector<32x128xbf16>
    %cst_21 = arith.constant dense<0.000000e+00> : vector<8x128xf32>
    %60 = tpu.matmul %58, %59, %cst_21 {dimension_numbers = #tpu.dot_dimension_numbers<[1], [0], [0], [1], [0, 0, 1, 1], [], []>} : vector<8x32xbf16>, vector<32x128xbf16>, vector<8x128xf32> -> vector<8x128xf32>
    %61 = arith.addf %36, %60 : vector<8x128xf32>
    %62 = vector.extract_strided_slice %8 {offsets = [0, 64], sizes = [8, 32], strides = [1, 1]} : vector<8x128xf32> to vector<8x32xf32>
    %cst_22 = arith.constant 0.176776692 : f32
    %63 = vector.broadcast %cst_22 : f32 to vector<8x32xf32>
    %64 = arith.mulf %62, %63 : vector<8x32xf32>
    %65 = arith.truncf %64 : vector<8x32xf32> to vector<8x32xbf16>
    %66 = vector.extract_strided_slice %9 {offsets = [0, 64], sizes = [8, 32], strides = [1, 1]} : vector<8x128xf32> to vector<8x32xf32>
    %67 = arith.truncf %66 : vector<8x32xf32> to vector<8x32xbf16>
    %68 = vector.extract_strided_slice %10 {offsets = [0, 64], sizes = [8, 32], strides = [1, 1]} : vector<8x128xf32> to vector<8x32xf32>
    %69 = arith.truncf %68 : vector<8x32xf32> to vector<8x32xbf16>
    %cst_23 = arith.constant dense<0.000000e+00> : vector<8x8xf32>
    %70 = tpu.matmul %65, %67, %cst_23 {dimension_numbers = #tpu.dot_dimension_numbers<[1], [1], [0], [0], [0, 0, 1, 0], [], []>} : vector<8x32xbf16>, vector<8x32xbf16>, vector<8x8xf32> -> vector<8x8xf32>
    %cst_24 = arith.constant dense<0xFF800000> : vector<8xf32>
    %71 = vector.multi_reduction <maximumf>, %70, %cst_24 [1] : vector<8x8xf32> to vector<8xf32>
    %72 = vector.shape_cast %71 : vector<8xf32> to vector<8x1xf32>
    %73 = vector.broadcast %72 : vector<8x1xf32> to vector<8x8xf32>
    %74 = arith.subf %70, %73 : vector<8x8xf32>
    %75 = math.exp %74 : vector<8x8xf32>
    %cst_25 = arith.constant dense<0.000000e+00> : vector<8xf32>
    %76 = vector.multi_reduction <add>, %75, %cst_25 [1] : vector<8x8xf32> to vector<8xf32>
    %77 = vector.shape_cast %76 : vector<8xf32> to vector<8x1xf32>
    %78 = tpu.reciprocal %77 {approx = true} : vector<8x1xf32> -> vector<8x1xf32>
    %79 = vector.broadcast %78 : vector<8x1xf32> to vector<8x8xf32>
    %80 = arith.mulf %75, %79 : vector<8x8xf32>
    %81 = arith.truncf %80 : vector<8x8xf32> to vector<8x8xbf16>
    %cst_26 = arith.constant dense<0.000000e+00> : vector<8x32xf32>
    %82 = tpu.matmul %81, %69, %cst_26 {dimension_numbers = #tpu.dot_dimension_numbers<[1], [0], [0], [1], [0, 0, 1, 1], [], []>} : vector<8x8xbf16>, vector<8x32xbf16>, vector<8x32xf32> -> vector<8x32xf32>
    %83 = arith.truncf %82 : vector<8x32xf32> to vector<8x32xbf16>
    %c64 = arith.constant 64 : index
    %c0_27 = arith.constant 0 : index
    %84 = vector.load %arg4[%c64, %c0_27] : memref<128x128xbf16, #tpu.memory_space<vmem>>, vector<32x128xbf16>
    %cst_28 = arith.constant dense<0.000000e+00> : vector<8x128xf32>
    %85 = tpu.matmul %83, %84, %cst_28 {dimension_numbers = #tpu.dot_dimension_numbers<[1], [0], [0], [1], [0, 0, 1, 1], [], []>} : vector<8x32xbf16>, vector<32x128xbf16>, vector<8x128xf32> -> vector<8x128xf32>
    %86 = arith.addf %61, %85 : vector<8x128xf32>
    %87 = vector.extract_strided_slice %8 {offsets = [0, 96], sizes = [8, 32], strides = [1, 1]} : vector<8x128xf32> to vector<8x32xf32>
    %cst_29 = arith.constant 0.176776692 : f32
    %88 = vector.broadcast %cst_29 : f32 to vector<8x32xf32>
    %89 = arith.mulf %87, %88 : vector<8x32xf32>
    %90 = arith.truncf %89 : vector<8x32xf32> to vector<8x32xbf16>
    %91 = vector.extract_strided_slice %9 {offsets = [0, 96], sizes = [8, 32], strides = [1, 1]} : vector<8x128xf32> to vector<8x32xf32>
    %92 = arith.truncf %91 : vector<8x32xf32> to vector<8x32xbf16>
    %93 = vector.extract_strided_slice %10 {offsets = [0, 96], sizes = [8, 32], strides = [1, 1]} : vector<8x128xf32> to vector<8x32xf32>
    %94 = arith.truncf %93 : vector<8x32xf32> to vector<8x32xbf16>
    %cst_30 = arith.constant dense<0.000000e+00> : vector<8x8xf32>
    %95 = tpu.matmul %90, %92, %cst_30 {dimension_numbers = #tpu.dot_dimension_numbers<[1], [1], [0], [0], [0, 0, 1, 0], [], []>} : vector<8x32xbf16>, vector<8x32xbf16>, vector<8x8xf32> -> vector<8x8xf32>
    %cst_31 = arith.constant dense<0xFF800000> : vector<8xf32>
    %96 = vector.multi_reduction <maximumf>, %95, %cst_31 [1] : vector<8x8xf32> to vector<8xf32>
    %97 = vector.shape_cast %96 : vector<8xf32> to vector<8x1xf32>
    %98 = vector.broadcast %97 : vector<8x1xf32> to vector<8x8xf32>
    %99 = arith.subf %95, %98 : vector<8x8xf32>
    %100 = math.exp %99 : vector<8x8xf32>
    %cst_32 = arith.constant dense<0.000000e+00> : vector<8xf32>
    %101 = vector.multi_reduction <add>, %100, %cst_32 [1] : vector<8x8xf32> to vector<8xf32>
    %102 = vector.shape_cast %101 : vector<8xf32> to vector<8x1xf32>
    %103 = tpu.reciprocal %102 {approx = true} : vector<8x1xf32> -> vector<8x1xf32>
    %104 = vector.broadcast %103 : vector<8x1xf32> to vector<8x8xf32>
    %105 = arith.mulf %100, %104 : vector<8x8xf32>
    %106 = arith.truncf %105 : vector<8x8xf32> to vector<8x8xbf16>
    %cst_33 = arith.constant dense<0.000000e+00> : vector<8x32xf32>
    %107 = tpu.matmul %106, %94, %cst_33 {dimension_numbers = #tpu.dot_dimension_numbers<[1], [0], [0], [1], [0, 0, 1, 1], [], []>} : vector<8x8xbf16>, vector<8x32xbf16>, vector<8x32xf32> -> vector<8x32xf32>
    %108 = arith.truncf %107 : vector<8x32xf32> to vector<8x32xbf16>
    %c96 = arith.constant 96 : index
    %c0_34 = arith.constant 0 : index
    %109 = vector.load %arg4[%c96, %c0_34] : memref<128x128xbf16, #tpu.memory_space<vmem>>, vector<32x128xbf16>
    %cst_35 = arith.constant dense<0.000000e+00> : vector<8x128xf32>
    %110 = tpu.matmul %108, %109, %cst_35 {dimension_numbers = #tpu.dot_dimension_numbers<[1], [0], [0], [1], [0, 0, 1, 1], [], []>} : vector<8x32xbf16>, vector<32x128xbf16>, vector<8x128xf32> -> vector<8x128xf32>
    %111 = arith.addf %86, %110 : vector<8x128xf32>
    %112 = arith.addf %1, %111 : vector<8x128xf32>
    %c0_36 = arith.constant 0 : index
    %c0_37 = arith.constant 0 : index
    %113 = vector.load %arg5[%c0_36, %c0_37] : memref<1x128xf32, #tpu.memory_space<vmem>>, vector<1x128xf32>
    %114 = vector.broadcast %113 : vector<1x128xf32> to vector<8x128xf32>
    %115 = arith.addf %112, %114 : vector<8x128xf32>
    %c0_38 = arith.constant 0 : index
    %c0_39 = arith.constant 0 : index
    %116 = vector.load %arg6[%c0_38, %c0_39] : memref<1x128xf32, #tpu.memory_space<vmem>>, vector<1x128xf32>
    %c0_40 = arith.constant 0 : index
    %c0_41 = arith.constant 0 : index
    %117 = vector.load %arg7[%c0_40, %c0_41] : memref<1x128xf32, #tpu.memory_space<vmem>>, vector<1x128xf32>
    %cst_42 = arith.constant dense<0.000000e+00> : vector<8xf32>
    %118 = vector.multi_reduction <add>, %115, %cst_42 [1] : vector<8x128xf32> to vector<8xf32>
    %119 = vector.shape_cast %118 : vector<8xf32> to vector<8x1xf32>
    %cst_43 = arith.constant 1.280000e+02 : f32
    %120 = vector.broadcast %cst_43 : f32 to vector<8x1xf32>
    %121 = arith.divf %119, %120 : vector<8x1xf32>
    %122 = vector.broadcast %121 : vector<8x1xf32> to vector<8x128xf32>
    %123 = arith.subf %115, %122 : vector<8x128xf32>
    %124 = arith.mulf %123, %123 : vector<8x128xf32>
    %cst_44 = arith.constant dense<0.000000e+00> : vector<8xf32>
    %125 = vector.multi_reduction <add>, %124, %cst_44 [1] : vector<8x128xf32> to vector<8xf32>
    %126 = vector.shape_cast %125 : vector<8xf32> to vector<8x1xf32>
    %cst_45 = arith.constant 1.280000e+02 : f32
    %127 = vector.broadcast %cst_45 : f32 to vector<8x1xf32>
    %128 = arith.divf %126, %127 : vector<8x1xf32>
    %129 = vector.broadcast %121 : vector<8x1xf32> to vector<8x128xf32>
    %130 = arith.subf %115, %129 : vector<8x128xf32>
    %cst_46 = arith.constant 9.99999974E-6 : f32
    %131 = vector.broadcast %cst_46 : f32 to vector<8x1xf32>
    %132 = arith.addf %128, %131 : vector<8x1xf32>
    %133 = math.rsqrt %132 : vector<8x1xf32>
    %134 = vector.broadcast %133 : vector<8x1xf32> to vector<8x128xf32>
    %135 = arith.mulf %130, %134 : vector<8x128xf32>
    %136 = vector.broadcast %116 : vector<1x128xf32> to vector<8x128xf32>
    %137 = arith.mulf %135, %136 : vector<8x128xf32>
    %138 = vector.broadcast %117 : vector<1x128xf32> to vector<8x128xf32>
    %139 = arith.addf %137, %138 : vector<8x128xf32>
    %c0_47 = arith.constant 0 : index
    %c0_48 = arith.constant 0 : index
    %c0_49 = arith.constant 0 : index
    %140 = vector.load %arg8[%c0_47, %c0_48, %c0_49] : memref<1x8x128xf32, #tpu.memory_space<vmem>>, vector<1x8x128xf32>
    %141 = vector.shape_cast %140 : vector<1x8x128xf32> to vector<8x128xf32>
    %142 = vector.shape_cast %139 : vector<8x128xf32> to vector<1x8x128xf32>
    tpu.vector_store %arg8[%c0_47, %c0_48, %c0_49], %142 {strides = array<i32>} : memref<1x8x128xf32, #tpu.memory_space<vmem>>, vector<1x8x128xf32>,
    return
  }
  func.func @transform_0(%arg0: i32) -> (i32, i32, i32) {
    %c0_i32 = arith.constant 0 : i32
    %c0_i32_0 = arith.constant 0 : i32
    %c0_i32_1 = arith.constant 0 : i32
    return %arg0, %c0_i32, %c0_i32_0 : i32, i32, i32
  }
  func.func @transform_1(%arg0: i32) -> (i32, i32) {
    %c0_i32 = arith.constant 0 : i32
    %c0_i32_0 = arith.constant 0 : i32
    %c0_i32_1 = arith.constant 0 : i32
    return %c0_i32, %c0_i32_0 : i32, i32
  }
  func.func @transform_2(%arg0: i32) -> (i32, i32) {
    %c0_i32 = arith.constant 0 : i32
    %c0_i32_0 = arith.constant 0 : i32
    %c0_i32_1 = arith.constant 0 : i32
    return %c0_i32, %c0_i32_0 : i32, i32
  }
  func.func @transform_3(%arg0: i32) -> (i32, i32) {
    %c0_i32 = arith.constant 0 : i32
    %c0_i32_0 = arith.constant 0 : i32
    %c0_i32_1 = arith.constant 0 : i32
    return %c0_i32, %c0_i32_0 : i32, i32
  }
  func.func @transform_4(%arg0: i32) -> (i32, i32) {
    %c0_i32 = arith.constant 0 : i32
    %c0_i32_0 = arith.constant 0 : i32
    %c0_i32_1 = arith.constant 0 : i32
    return %c0_i32, %c0_i32_0 : i32, i32
  }
  func.func @transform_5(%arg0: i32) -> (i32, i32) {
    %c0_i32 = arith.constant 0 : i32
    %c0_i32_0 = arith.constant 0 : i32
    %c0_i32_1 = arith.constant 0 : i32
    return %c0_i32, %c0_i32_0 : i32, i32
  }
  func.func @transform_6(%arg0: i32) -> (i32, i32) {
    %c0_i32 = arith.constant 0 : i32
    %c0_i32_0 = arith.constant 0 : i32
    %c0_i32_1 = arith.constant 0 : i32
    return %c0_i32, %c0_i32_0 : i32, i32
  }
  func.func @transform_7(%arg0: i32) -> (i32, i32, i32) {
    %c0_i32 = arith.constant 0 : i32
    %c0_i32_0 = arith.constant 0 : i32
    %c0_i32_1 = arith.constant 0 : i32
    return %arg0, %c0_i32, %c0_i32_0 : i32, i32, i32
  }
}

module attributes {stable_mosaic.version = 11 : i64} {
  func.func @_cross_attn_ln_kernel(%arg0: i32, %arg1: memref<1x8x128xf32, #tpu.memory_space<vmem>>, %arg2: memref<1x10x128xf32, #tpu.memory_space<vmem>>, %arg3: memref<128x128xbf16, #tpu.memory_space<vmem>>, %arg4: memref<1x128xf32, #tpu.memory_space<vmem>>, %arg5: memref<128x256xbf16, #tpu.memory_space<vmem>>, %arg6: memref<1x256xf32, #tpu.memory_space<vmem>>, %arg7: memref<128x128xbf16, #tpu.memory_space<vmem>>, %arg8: memref<1x128xf32, #tpu.memory_space<vmem>>, %arg9: memref<1x128xf32, #tpu.memory_space<vmem>>, %arg10: memref<1x128xf32, #tpu.memory_space<vmem>>, %arg11: memref<1x8x128xf32, #tpu.memory_space<vmem>>) attributes {dimension_semantics = [#tpu.dimension_semantics<parallel>], iteration_bounds = array<i64: 2>, scalar_prefetch = 0 : i64, scratch_operands = 0 : i64, tpu.core_type = #tpu.core_type<tc>, window_params = [{transform_indices = @transform_0, window_bounds = array<i64: 1, 8, 128>}, {transform_indices = @transform_1, window_bounds = array<i64: 1, 10, 128>}, {pipeline_mode = #tpu.pipeline_mode<synchronous>, transform_indices = @transform_2, window_bounds = array<i64: 128, 128>}, {pipeline_mode = #tpu.pipeline_mode<synchronous>, transform_indices = @transform_3, window_bounds = array<i64: 1, 128>}, {pipeline_mode = #tpu.pipeline_mode<synchronous>, transform_indices = @transform_4, window_bounds = array<i64: 128, 256>}, {pipeline_mode = #tpu.pipeline_mode<synchronous>, transform_indices = @transform_5, window_bounds = array<i64: 1, 256>}, {pipeline_mode = #tpu.pipeline_mode<synchronous>, transform_indices = @transform_6, window_bounds = array<i64: 128, 128>}, {pipeline_mode = #tpu.pipeline_mode<synchronous>, transform_indices = @transform_7, window_bounds = array<i64: 1, 128>}, {pipeline_mode = #tpu.pipeline_mode<synchronous>, transform_indices = @transform_8, window_bounds = array<i64: 1, 128>}, {pipeline_mode = #tpu.pipeline_mode<synchronous>, transform_indices = @transform_9, window_bounds = array<i64: 1, 128>}, {transform_indices = @transform_10, window_bounds = array<i64: 1, 8, 128>}]} {
    %c0 = arith.constant 0 : index
    %c0_0 = arith.constant 0 : index
    %c0_1 = arith.constant 0 : index
    %0 = vector.load %arg1[%c0, %c0_0, %c0_1] : memref<1x8x128xf32, #tpu.memory_space<vmem>>, vector<1x8x128xf32>
    %1 = vector.shape_cast %0 : vector<1x8x128xf32> to vector<8x128xf32>
    %c0_2 = arith.constant 0 : index
    %c0_3 = arith.constant 0 : index
    %c0_4 = arith.constant 0 : index
    %2 = vector.load %arg2[%c0_2, %c0_3, %c0_4] : memref<1x10x128xf32, #tpu.memory_space<vmem>>, vector<1x10x128xf32>
    %3 = vector.shape_cast %2 : vector<1x10x128xf32> to vector<10x128xf32>
    %4 = arith.truncf %1 : vector<8x128xf32> to vector<8x128xbf16>
    %c0_5 = arith.constant 0 : index
    %c0_6 = arith.constant 0 : index
    %5 = vector.load %arg3[%c0_5, %c0_6] : memref<128x128xbf16, #tpu.memory_space<vmem>>, vector<128x128xbf16>
    %cst = arith.constant dense<0.000000e+00> : vector<8x128xf32>
    %6 = tpu.matmul %4, %5, %cst {dimension_numbers = #tpu.dot_dimension_numbers<[1], [0], [0], [1], [0, 0, 1, 1], [], []>} : vector<8x128xbf16>, vector<128x128xbf16>, vector<8x128xf32> -> vector<8x128xf32>
    %c0_7 = arith.constant 0 : index
    %c0_8 = arith.constant 0 : index
    %7 = vector.load %arg4[%c0_7, %c0_8] : memref<1x128xf32, #tpu.memory_space<vmem>>, vector<1x128xf32>
    %8 = vector.broadcast %7 : vector<1x128xf32> to vector<8x128xf32>
    %9 = arith.addf %6, %8 : vector<8x128xf32>
    %10 = arith.truncf %3 : vector<10x128xf32> to vector<10x128xbf16>
    %c0_9 = arith.constant 0 : index
    %c0_10 = arith.constant 0 : index
    %11 = vector.load %arg5[%c0_9, %c0_10] : memref<128x256xbf16, #tpu.memory_space<vmem>>, vector<128x256xbf16>
    %cst_11 = arith.constant dense<0.000000e+00> : vector<10x256xf32>
    %12 = tpu.matmul %10, %11, %cst_11 {dimension_numbers = #tpu.dot_dimension_numbers<[1], [0], [0], [1], [0, 0, 1, 1], [], []>} : vector<10x128xbf16>, vector<128x256xbf16>, vector<10x256xf32> -> vector<10x256xf32>
    %c0_12 = arith.constant 0 : index
    %c0_13 = arith.constant 0 : index
    %13 = vector.load %arg6[%c0_12, %c0_13] : memref<1x256xf32, #tpu.memory_space<vmem>>, vector<1x256xf32>
    %14 = vector.broadcast %13 : vector<1x256xf32> to vector<10x256xf32>
    %15 = arith.addf %12, %14 : vector<10x256xf32>
    %16 = vector.extract_strided_slice %15 {offsets = [0, 0], sizes = [10, 128], strides = [1, 1]} : vector<10x256xf32> to vector<10x128xf32>
    %17 = vector.extract_strided_slice %15 {offsets = [0, 128], sizes = [10, 128], strides = [1, 1]} : vector<10x256xf32> to vector<10x128xf32>
    %cst_14 = arith.constant 0.000000e+00 : f32
    %18 = vector.broadcast %cst_14 : f32 to vector<8x128xf32>
    %19 = vector.extract_strided_slice %9 {offsets = [0, 0], sizes = [8, 32], strides = [1, 1]} : vector<8x128xf32> to vector<8x32xf32>
    %cst_15 = arith.constant 0.176776692 : f32
    %20 = vector.broadcast %cst_15 : f32 to vector<8x32xf32>
    %21 = arith.mulf %19, %20 : vector<8x32xf32>
    %22 = arith.truncf %21 : vector<8x32xf32> to vector<8x32xbf16>
    %23 = vector.extract_strided_slice %16 {offsets = [0, 0], sizes = [10, 32], strides = [1, 1]} : vector<10x128xf32> to vector<10x32xf32>
    %24 = arith.truncf %23 : vector<10x32xf32> to vector<10x32xbf16>
    %25 = vector.extract_strided_slice %17 {offsets = [0, 0], sizes = [10, 32], strides = [1, 1]} : vector<10x128xf32> to vector<10x32xf32>
    %26 = arith.truncf %25 : vector<10x32xf32> to vector<10x32xbf16>
    %cst_16 = arith.constant dense<0.000000e+00> : vector<8x10xf32>
    %27 = tpu.matmul %22, %24, %cst_16 {dimension_numbers = #tpu.dot_dimension_numbers<[1], [1], [0], [0], [0, 0, 1, 0], [], []>} : vector<8x32xbf16>, vector<10x32xbf16>, vector<8x10xf32> -> vector<8x10xf32>
    %cst_17 = arith.constant dense<0xFF800000> : vector<8xf32>
    %28 = vector.multi_reduction <maximumf>, %27, %cst_17 [1] : vector<8x10xf32> to vector<8xf32>
    %29 = vector.shape_cast %28 : vector<8xf32> to vector<8x1xf32>
    %30 = vector.broadcast %29 : vector<8x1xf32> to vector<8x10xf32>
    %31 = arith.subf %27, %30 : vector<8x10xf32>
    %32 = math.exp %31 : vector<8x10xf32>
    %cst_18 = arith.constant dense<0.000000e+00> : vector<8xf32>
    %33 = vector.multi_reduction <add>, %32, %cst_18 [1] : vector<8x10xf32> to vector<8xf32>
    %34 = vector.shape_cast %33 : vector<8xf32> to vector<8x1xf32>
    %35 = tpu.reciprocal %34 {approx = true} : vector<8x1xf32> -> vector<8x1xf32>
    %36 = vector.broadcast %35 : vector<8x1xf32> to vector<8x10xf32>
    %37 = arith.mulf %32, %36 : vector<8x10xf32>
    %38 = arith.truncf %37 : vector<8x10xf32> to vector<8x10xbf16>
    %cst_19 = arith.constant dense<0.000000e+00> : vector<8x32xf32>
    %39 = tpu.matmul %38, %26, %cst_19 {dimension_numbers = #tpu.dot_dimension_numbers<[1], [0], [0], [1], [0, 0, 1, 1], [], []>} : vector<8x10xbf16>, vector<10x32xbf16>, vector<8x32xf32> -> vector<8x32xf32>
    %40 = arith.truncf %39 : vector<8x32xf32> to vector<8x32xbf16>
    %c0_20 = arith.constant 0 : index
    %c0_21 = arith.constant 0 : index
    %41 = vector.load %arg7[%c0_20, %c0_21] : memref<128x128xbf16, #tpu.memory_space<vmem>>, vector<32x128xbf16>
    %cst_22 = arith.constant dense<0.000000e+00> : vector<8x128xf32>
    %42 = tpu.matmul %40, %41, %cst_22 {dimension_numbers = #tpu.dot_dimension_numbers<[1], [0], [0], [1], [0, 0, 1, 1], [], []>} : vector<8x32xbf16>, vector<32x128xbf16>, vector<8x128xf32> -> vector<8x128xf32>
    %43 = arith.addf %18, %42 : vector<8x128xf32>
    %44 = vector.extract_strided_slice %9 {offsets = [0, 32], sizes = [8, 32], strides = [1, 1]} : vector<8x128xf32> to vector<8x32xf32>
    %cst_23 = arith.constant 0.176776692 : f32
    %45 = vector.broadcast %cst_23 : f32 to vector<8x32xf32>
    %46 = arith.mulf %44, %45 : vector<8x32xf32>
    %47 = arith.truncf %46 : vector<8x32xf32> to vector<8x32xbf16>
    %48 = vector.extract_strided_slice %16 {offsets = [0, 32], sizes = [10, 32], strides = [1, 1]} : vector<10x128xf32> to vector<10x32xf32>
    %49 = arith.truncf %48 : vector<10x32xf32> to vector<10x32xbf16>
    %50 = vector.extract_strided_slice %17 {offsets = [0, 32], sizes = [10, 32], strides = [1, 1]} : vector<10x128xf32> to vector<10x32xf32>
    %51 = arith.truncf %50 : vector<10x32xf32> to vector<10x32xbf16>
    %cst_24 = arith.constant dense<0.000000e+00> : vector<8x10xf32>
    %52 = tpu.matmul %47, %49, %cst_24 {dimension_numbers = #tpu.dot_dimension_numbers<[1], [1], [0], [0], [0, 0, 1, 0], [], []>} : vector<8x32xbf16>, vector<10x32xbf16>, vector<8x10xf32> -> vector<8x10xf32>
    %cst_25 = arith.constant dense<0xFF800000> : vector<8xf32>
    %53 = vector.multi_reduction <maximumf>, %52, %cst_25 [1] : vector<8x10xf32> to vector<8xf32>
    %54 = vector.shape_cast %53 : vector<8xf32> to vector<8x1xf32>
    %55 = vector.broadcast %54 : vector<8x1xf32> to vector<8x10xf32>
    %56 = arith.subf %52, %55 : vector<8x10xf32>
    %57 = math.exp %56 : vector<8x10xf32>
    %cst_26 = arith.constant dense<0.000000e+00> : vector<8xf32>
    %58 = vector.multi_reduction <add>, %57, %cst_26 [1] : vector<8x10xf32> to vector<8xf32>
    %59 = vector.shape_cast %58 : vector<8xf32> to vector<8x1xf32>
    %60 = tpu.reciprocal %59 {approx = true} : vector<8x1xf32> -> vector<8x1xf32>
    %61 = vector.broadcast %60 : vector<8x1xf32> to vector<8x10xf32>
    %62 = arith.mulf %57, %61 : vector<8x10xf32>
    %63 = arith.truncf %62 : vector<8x10xf32> to vector<8x10xbf16>
    %cst_27 = arith.constant dense<0.000000e+00> : vector<8x32xf32>
    %64 = tpu.matmul %63, %51, %cst_27 {dimension_numbers = #tpu.dot_dimension_numbers<[1], [0], [0], [1], [0, 0, 1, 1], [], []>} : vector<8x10xbf16>, vector<10x32xbf16>, vector<8x32xf32> -> vector<8x32xf32>
    %65 = arith.truncf %64 : vector<8x32xf32> to vector<8x32xbf16>
    %c32 = arith.constant 32 : index
    %c0_28 = arith.constant 0 : index
    %66 = vector.load %arg7[%c32, %c0_28] : memref<128x128xbf16, #tpu.memory_space<vmem>>, vector<32x128xbf16>
    %cst_29 = arith.constant dense<0.000000e+00> : vector<8x128xf32>
    %67 = tpu.matmul %65, %66, %cst_29 {dimension_numbers = #tpu.dot_dimension_numbers<[1], [0], [0], [1], [0, 0, 1, 1], [], []>} : vector<8x32xbf16>, vector<32x128xbf16>, vector<8x128xf32> -> vector<8x128xf32>
    %68 = arith.addf %43, %67 : vector<8x128xf32>
    %69 = vector.extract_strided_slice %9 {offsets = [0, 64], sizes = [8, 32], strides = [1, 1]} : vector<8x128xf32> to vector<8x32xf32>
    %cst_30 = arith.constant 0.176776692 : f32
    %70 = vector.broadcast %cst_30 : f32 to vector<8x32xf32>
    %71 = arith.mulf %69, %70 : vector<8x32xf32>
    %72 = arith.truncf %71 : vector<8x32xf32> to vector<8x32xbf16>
    %73 = vector.extract_strided_slice %16 {offsets = [0, 64], sizes = [10, 32], strides = [1, 1]} : vector<10x128xf32> to vector<10x32xf32>
    %74 = arith.truncf %73 : vector<10x32xf32> to vector<10x32xbf16>
    %75 = vector.extract_strided_slice %17 {offsets = [0, 64], sizes = [10, 32], strides = [1, 1]} : vector<10x128xf32> to vector<10x32xf32>
    %76 = arith.truncf %75 : vector<10x32xf32> to vector<10x32xbf16>
    %cst_31 = arith.constant dense<0.000000e+00> : vector<8x10xf32>
    %77 = tpu.matmul %72, %74, %cst_31 {dimension_numbers = #tpu.dot_dimension_numbers<[1], [1], [0], [0], [0, 0, 1, 0], [], []>} : vector<8x32xbf16>, vector<10x32xbf16>, vector<8x10xf32> -> vector<8x10xf32>
    %cst_32 = arith.constant dense<0xFF800000> : vector<8xf32>
    %78 = vector.multi_reduction <maximumf>, %77, %cst_32 [1] : vector<8x10xf32> to vector<8xf32>
    %79 = vector.shape_cast %78 : vector<8xf32> to vector<8x1xf32>
    %80 = vector.broadcast %79 : vector<8x1xf32> to vector<8x10xf32>
    %81 = arith.subf %77, %80 : vector<8x10xf32>
    %82 = math.exp %81 : vector<8x10xf32>
    %cst_33 = arith.constant dense<0.000000e+00> : vector<8xf32>
    %83 = vector.multi_reduction <add>, %82, %cst_33 [1] : vector<8x10xf32> to vector<8xf32>
    %84 = vector.shape_cast %83 : vector<8xf32> to vector<8x1xf32>
    %85 = tpu.reciprocal %84 {approx = true} : vector<8x1xf32> -> vector<8x1xf32>
    %86 = vector.broadcast %85 : vector<8x1xf32> to vector<8x10xf32>
    %87 = arith.mulf %82, %86 : vector<8x10xf32>
    %88 = arith.truncf %87 : vector<8x10xf32> to vector<8x10xbf16>
    %cst_34 = arith.constant dense<0.000000e+00> : vector<8x32xf32>
    %89 = tpu.matmul %88, %76, %cst_34 {dimension_numbers = #tpu.dot_dimension_numbers<[1], [0], [0], [1], [0, 0, 1, 1], [], []>} : vector<8x10xbf16>, vector<10x32xbf16>, vector<8x32xf32> -> vector<8x32xf32>
    %90 = arith.truncf %89 : vector<8x32xf32> to vector<8x32xbf16>
    %c64 = arith.constant 64 : index
    %c0_35 = arith.constant 0 : index
    %91 = vector.load %arg7[%c64, %c0_35] : memref<128x128xbf16, #tpu.memory_space<vmem>>, vector<32x128xbf16>
    %cst_36 = arith.constant dense<0.000000e+00> : vector<8x128xf32>
    %92 = tpu.matmul %90, %91, %cst_36 {dimension_numbers = #tpu.dot_dimension_numbers<[1], [0], [0], [1], [0, 0, 1, 1], [], []>} : vector<8x32xbf16>, vector<32x128xbf16>, vector<8x128xf32> -> vector<8x128xf32>
    %93 = arith.addf %68, %92 : vector<8x128xf32>
    %94 = vector.extract_strided_slice %9 {offsets = [0, 96], sizes = [8, 32], strides = [1, 1]} : vector<8x128xf32> to vector<8x32xf32>
    %cst_37 = arith.constant 0.176776692 : f32
    %95 = vector.broadcast %cst_37 : f32 to vector<8x32xf32>
    %96 = arith.mulf %94, %95 : vector<8x32xf32>
    %97 = arith.truncf %96 : vector<8x32xf32> to vector<8x32xbf16>
    %98 = vector.extract_strided_slice %16 {offsets = [0, 96], sizes = [10, 32], strides = [1, 1]} : vector<10x128xf32> to vector<10x32xf32>
    %99 = arith.truncf %98 : vector<10x32xf32> to vector<10x32xbf16>
    %100 = vector.extract_strided_slice %17 {offsets = [0, 96], sizes = [10, 32], strides = [1, 1]} : vector<10x128xf32> to vector<10x32xf32>
    %101 = arith.truncf %100 : vector<10x32xf32> to vector<10x32xbf16>
    %cst_38 = arith.constant dense<0.000000e+00> : vector<8x10xf32>
    %102 = tpu.matmul %97, %99, %cst_38 {dimension_numbers = #tpu.dot_dimension_numbers<[1], [1], [0], [0], [0, 0, 1, 0], [], []>} : vector<8x32xbf16>, vector<10x32xbf16>, vector<8x10xf32> -> vector<8x10xf32>
    %cst_39 = arith.constant dense<0xFF800000> : vector<8xf32>
    %103 = vector.multi_reduction <maximumf>, %102, %cst_39 [1] : vector<8x10xf32> to vector<8xf32>
    %104 = vector.shape_cast %103 : vector<8xf32> to vector<8x1xf32>
    %105 = vector.broadcast %104 : vector<8x1xf32> to vector<8x10xf32>
    %106 = arith.subf %102, %105 : vector<8x10xf32>
    %107 = math.exp %106 : vector<8x10xf32>
    %cst_40 = arith.constant dense<0.000000e+00> : vector<8xf32>
    %108 = vector.multi_reduction <add>, %107, %cst_40 [1] : vector<8x10xf32> to vector<8xf32>
    %109 = vector.shape_cast %108 : vector<8xf32> to vector<8x1xf32>
    %110 = tpu.reciprocal %109 {approx = true} : vector<8x1xf32> -> vector<8x1xf32>
    %111 = vector.broadcast %110 : vector<8x1xf32> to vector<8x10xf32>
    %112 = arith.mulf %107, %111 : vector<8x10xf32>
    %113 = arith.truncf %112 : vector<8x10xf32> to vector<8x10xbf16>
    %cst_41 = arith.constant dense<0.000000e+00> : vector<8x32xf32>
    %114 = tpu.matmul %113, %101, %cst_41 {dimension_numbers = #tpu.dot_dimension_numbers<[1], [0], [0], [1], [0, 0, 1, 1], [], []>} : vector<8x10xbf16>, vector<10x32xbf16>, vector<8x32xf32> -> vector<8x32xf32>
    %115 = arith.truncf %114 : vector<8x32xf32> to vector<8x32xbf16>
    %c96 = arith.constant 96 : index
    %c0_42 = arith.constant 0 : index
    %116 = vector.load %arg7[%c96, %c0_42] : memref<128x128xbf16, #tpu.memory_space<vmem>>, vector<32x128xbf16>
    %cst_43 = arith.constant dense<0.000000e+00> : vector<8x128xf32>
    %117 = tpu.matmul %115, %116, %cst_43 {dimension_numbers = #tpu.dot_dimension_numbers<[1], [0], [0], [1], [0, 0, 1, 1], [], []>} : vector<8x32xbf16>, vector<32x128xbf16>, vector<8x128xf32> -> vector<8x128xf32>
    %118 = arith.addf %93, %117 : vector<8x128xf32>
    %119 = arith.addf %1, %118 : vector<8x128xf32>
    %c0_44 = arith.constant 0 : index
    %c0_45 = arith.constant 0 : index
    %120 = vector.load %arg8[%c0_44, %c0_45] : memref<1x128xf32, #tpu.memory_space<vmem>>, vector<1x128xf32>
    %121 = vector.broadcast %120 : vector<1x128xf32> to vector<8x128xf32>
    %122 = arith.addf %119, %121 : vector<8x128xf32>
    %c0_46 = arith.constant 0 : index
    %c0_47 = arith.constant 0 : index
    %123 = vector.load %arg9[%c0_46, %c0_47] : memref<1x128xf32, #tpu.memory_space<vmem>>, vector<1x128xf32>
    %c0_48 = arith.constant 0 : index
    %c0_49 = arith.constant 0 : index
    %124 = vector.load %arg10[%c0_48, %c0_49] : memref<1x128xf32, #tpu.memory_space<vmem>>, vector<1x128xf32>
    %cst_50 = arith.constant dense<0.000000e+00> : vector<8xf32>
    %125 = vector.multi_reduction <add>, %122, %cst_50 [1] : vector<8x128xf32> to vector<8xf32>
    %126 = vector.shape_cast %125 : vector<8xf32> to vector<8x1xf32>
    %cst_51 = arith.constant 1.280000e+02 : f32
    %127 = vector.broadcast %cst_51 : f32 to vector<8x1xf32>
    %128 = arith.divf %126, %127 : vector<8x1xf32>
    %129 = vector.broadcast %128 : vector<8x1xf32> to vector<8x128xf32>
    %130 = arith.subf %122, %129 : vector<8x128xf32>
    %131 = arith.mulf %130, %130 : vector<8x128xf32>
    %cst_52 = arith.constant dense<0.000000e+00> : vector<8xf32>
    %132 = vector.multi_reduction <add>, %131, %cst_52 [1] : vector<8x128xf32> to vector<8xf32>
    %133 = vector.shape_cast %132 : vector<8xf32> to vector<8x1xf32>
    %cst_53 = arith.constant 1.280000e+02 : f32
    %134 = vector.broadcast %cst_53 : f32 to vector<8x1xf32>
    %135 = arith.divf %133, %134 : vector<8x1xf32>
    %136 = vector.broadcast %128 : vector<8x1xf32> to vector<8x128xf32>
    %137 = arith.subf %122, %136 : vector<8x128xf32>
    %cst_54 = arith.constant 9.99999974E-6 : f32
    %138 = vector.broadcast %cst_54 : f32 to vector<8x1xf32>
    %139 = arith.addf %135, %138 : vector<8x1xf32>
    %140 = math.rsqrt %139 : vector<8x1xf32>
    %141 = vector.broadcast %140 : vector<8x1xf32> to vector<8x128xf32>
    %142 = arith.mulf %137, %141 : vector<8x128xf32>
    %143 = vector.broadcast %123 : vector<1x128xf32> to vector<8x128xf32>
    %144 = arith.mulf %142, %143 : vector<8x128xf32>
    %145 = vector.broadcast %124 : vector<1x128xf32> to vector<8x128xf32>
    %146 = arith.addf %144, %145 : vector<8x128xf32>
    %c0_55 = arith.constant 0 : index
    %c0_56 = arith.constant 0 : index
    %c0_57 = arith.constant 0 : index
    %147 = vector.load %arg11[%c0_55, %c0_56, %c0_57] : memref<1x8x128xf32, #tpu.memory_space<vmem>>, vector<1x8x128xf32>
    %148 = vector.shape_cast %147 : vector<1x8x128xf32> to vector<8x128xf32>
    %149 = vector.shape_cast %146 : vector<8x128xf32> to vector<1x8x128xf32>
    tpu.vector_store %arg11[%c0_55, %c0_56, %c0_57], %149 {strides = array<i32>} : memref<1x8x128xf32, #tpu.memory_space<vmem>>, vector<1x8x128xf32>,
    return
  }
  func.func @transform_0(%arg0: i32) -> (i32, i32, i32) {
    %c0_i32 = arith.constant 0 : i32
    %c0_i32_0 = arith.constant 0 : i32
    %c0_i32_1 = arith.constant 0 : i32
    return %arg0, %c0_i32, %c0_i32_0 : i32, i32, i32
  }
  func.func @transform_1(%arg0: i32) -> (i32, i32, i32) {
    %c0_i32 = arith.constant 0 : i32
    %c0_i32_0 = arith.constant 0 : i32
    %c0_i32_1 = arith.constant 0 : i32
    return %arg0, %c0_i32, %c0_i32_0 : i32, i32, i32
  }
  func.func @transform_2(%arg0: i32) -> (i32, i32) {
    %c0_i32 = arith.constant 0 : i32
    %c0_i32_0 = arith.constant 0 : i32
    %c0_i32_1 = arith.constant 0 : i32
    return %c0_i32, %c0_i32_0 : i32, i32
  }
  func.func @transform_3(%arg0: i32) -> (i32, i32) {
    %c0_i32 = arith.constant 0 : i32
    %c0_i32_0 = arith.constant 0 : i32
    %c0_i32_1 = arith.constant 0 : i32
    return %c0_i32, %c0_i32_0 : i32, i32
  }
  func.func @transform_4(%arg0: i32) -> (i32, i32) {
    %c0_i32 = arith.constant 0 : i32
    %c0_i32_0 = arith.constant 0 : i32
    %c0_i32_1 = arith.constant 0 : i32
    return %c0_i32, %c0_i32_0 : i32, i32
  }
  func.func @transform_5(%arg0: i32) -> (i32, i32) {
    %c0_i32 = arith.constant 0 : i32
    %c0_i32_0 = arith.constant 0 : i32
    %c0_i32_1 = arith.constant 0 : i32
    return %c0_i32, %c0_i32_0 : i32, i32
  }
  func.func @transform_6(%arg0: i32) -> (i32, i32) {
    %c0_i32 = arith.constant 0 : i32
    %c0_i32_0 = arith.constant 0 : i32
    %c0_i32_1 = arith.constant 0 : i32
    return %c0_i32, %c0_i32_0 : i32, i32
  }
  func.func @transform_7(%arg0: i32) -> (i32, i32) {
    %c0_i32 = arith.constant 0 : i32
    %c0_i32_0 = arith.constant 0 : i32
    %c0_i32_1 = arith.constant 0 : i32
    return %c0_i32, %c0_i32_0 : i32, i32
  }
  func.func @transform_8(%arg0: i32) -> (i32, i32) {
    %c0_i32 = arith.constant 0 : i32
    %c0_i32_0 = arith.constant 0 : i32
    %c0_i32_1 = arith.constant 0 : i32
    return %c0_i32, %c0_i32_0 : i32, i32
  }
  func.func @transform_9(%arg0: i32) -> (i32, i32) {
    %c0_i32 = arith.constant 0 : i32
    %c0_i32_0 = arith.constant 0 : i32
    %c0_i32_1 = arith.constant 0 : i32
    return %c0_i32, %c0_i32_0 : i32, i32
  }
  func.func @transform_10(%arg0: i32) -> (i32, i32, i32) {
    %c0_i32 = arith.constant 0 : i32
    %c0_i32_0 = arith.constant 0 : i32
    %c0_i32_1 = arith.constant 0 : i32
    return %arg0, %c0_i32, %c0_i32_0 : i32, i32, i32
  }
}

module attributes {stable_mosaic.version = 11 : i64} {
  func.func @_ffn_ln_kernel(%arg0: i32, %arg1: memref<1x8x128xf32, #tpu.memory_space<vmem>>, %arg2: memref<128x256xbf16, #tpu.memory_space<vmem>>, %arg3: memref<1x256xf32, #tpu.memory_space<vmem>>, %arg4: memref<256x128xbf16, #tpu.memory_space<vmem>>, %arg5: memref<1x128xf32, #tpu.memory_space<vmem>>, %arg6: memref<1x128xf32, #tpu.memory_space<vmem>>, %arg7: memref<1x128xf32, #tpu.memory_space<vmem>>, %arg8: memref<1x8x128xf32, #tpu.memory_space<vmem>>) attributes {dimension_semantics = [#tpu.dimension_semantics<parallel>], iteration_bounds = array<i64: 2>, scalar_prefetch = 0 : i64, scratch_operands = 0 : i64, tpu.core_type = #tpu.core_type<tc>, window_params = [{transform_indices = @transform_0, window_bounds = array<i64: 1, 8, 128>}, {pipeline_mode = #tpu.pipeline_mode<synchronous>, transform_indices = @transform_1, window_bounds = array<i64: 128, 256>}, {pipeline_mode = #tpu.pipeline_mode<synchronous>, transform_indices = @transform_2, window_bounds = array<i64: 1, 256>}, {pipeline_mode = #tpu.pipeline_mode<synchronous>, transform_indices = @transform_3, window_bounds = array<i64: 256, 128>}, {pipeline_mode = #tpu.pipeline_mode<synchronous>, transform_indices = @transform_4, window_bounds = array<i64: 1, 128>}, {pipeline_mode = #tpu.pipeline_mode<synchronous>, transform_indices = @transform_5, window_bounds = array<i64: 1, 128>}, {pipeline_mode = #tpu.pipeline_mode<synchronous>, transform_indices = @transform_6, window_bounds = array<i64: 1, 128>}, {transform_indices = @transform_7, window_bounds = array<i64: 1, 8, 128>}]} {
    %c0 = arith.constant 0 : index
    %c0_0 = arith.constant 0 : index
    %c0_1 = arith.constant 0 : index
    %0 = vector.load %arg1[%c0, %c0_0, %c0_1] : memref<1x8x128xf32, #tpu.memory_space<vmem>>, vector<1x8x128xf32>
    %1 = vector.shape_cast %0 : vector<1x8x128xf32> to vector<8x128xf32>
    %2 = arith.truncf %1 : vector<8x128xf32> to vector<8x128xbf16>
    %c0_2 = arith.constant 0 : index
    %c0_3 = arith.constant 0 : index
    %3 = vector.load %arg2[%c0_2, %c0_3] : memref<128x256xbf16, #tpu.memory_space<vmem>>, vector<128x256xbf16>
    %cst = arith.constant dense<0.000000e+00> : vector<8x256xf32>
    %4 = tpu.matmul %2, %3, %cst {dimension_numbers = #tpu.dot_dimension_numbers<[1], [0], [0], [1], [0, 0, 1, 1], [], []>} : vector<8x128xbf16>, vector<128x256xbf16>, vector<8x256xf32> -> vector<8x256xf32>
    %c0_4 = arith.constant 0 : index
    %c0_5 = arith.constant 0 : index
    %5 = vector.load %arg3[%c0_4, %c0_5] : memref<1x256xf32, #tpu.memory_space<vmem>>, vector<1x256xf32>
    %6 = vector.broadcast %5 : vector<1x256xf32> to vector<8x256xf32>
    %7 = arith.addf %4, %6 : vector<8x256xf32>
    %cst_6 = arith.constant 0.000000e+00 : f32
    %8 = vector.broadcast %cst_6 : f32 to vector<8x256xf32>
    %9 = arith.maximumf %7, %8 : vector<8x256xf32>
    %10 = arith.truncf %9 : vector<8x256xf32> to vector<8x256xbf16>
    %c0_7 = arith.constant 0 : index
    %c0_8 = arith.constant 0 : index
    %11 = vector.load %arg4[%c0_7, %c0_8] : memref<256x128xbf16, #tpu.memory_space<vmem>>, vector<256x128xbf16>
    %cst_9 = arith.constant dense<0.000000e+00> : vector<8x128xf32>
    %12 = tpu.matmul %10, %11, %cst_9 {dimension_numbers = #tpu.dot_dimension_numbers<[1], [0], [0], [1], [0, 0, 1, 1], [], []>} : vector<8x256xbf16>, vector<256x128xbf16>, vector<8x128xf32> -> vector<8x128xf32>
    %c0_10 = arith.constant 0 : index
    %c0_11 = arith.constant 0 : index
    %13 = vector.load %arg5[%c0_10, %c0_11] : memref<1x128xf32, #tpu.memory_space<vmem>>, vector<1x128xf32>
    %14 = vector.broadcast %13 : vector<1x128xf32> to vector<8x128xf32>
    %15 = arith.addf %12, %14 : vector<8x128xf32>
    %16 = arith.addf %1, %15 : vector<8x128xf32>
    %c0_12 = arith.constant 0 : index
    %c0_13 = arith.constant 0 : index
    %17 = vector.load %arg6[%c0_12, %c0_13] : memref<1x128xf32, #tpu.memory_space<vmem>>, vector<1x128xf32>
    %c0_14 = arith.constant 0 : index
    %c0_15 = arith.constant 0 : index
    %18 = vector.load %arg7[%c0_14, %c0_15] : memref<1x128xf32, #tpu.memory_space<vmem>>, vector<1x128xf32>
    %cst_16 = arith.constant dense<0.000000e+00> : vector<8xf32>
    %19 = vector.multi_reduction <add>, %16, %cst_16 [1] : vector<8x128xf32> to vector<8xf32>
    %20 = vector.shape_cast %19 : vector<8xf32> to vector<8x1xf32>
    %cst_17 = arith.constant 1.280000e+02 : f32
    %21 = vector.broadcast %cst_17 : f32 to vector<8x1xf32>
    %22 = arith.divf %20, %21 : vector<8x1xf32>
    %23 = vector.broadcast %22 : vector<8x1xf32> to vector<8x128xf32>
    %24 = arith.subf %16, %23 : vector<8x128xf32>
    %25 = arith.mulf %24, %24 : vector<8x128xf32>
    %cst_18 = arith.constant dense<0.000000e+00> : vector<8xf32>
    %26 = vector.multi_reduction <add>, %25, %cst_18 [1] : vector<8x128xf32> to vector<8xf32>
    %27 = vector.shape_cast %26 : vector<8xf32> to vector<8x1xf32>
    %cst_19 = arith.constant 1.280000e+02 : f32
    %28 = vector.broadcast %cst_19 : f32 to vector<8x1xf32>
    %29 = arith.divf %27, %28 : vector<8x1xf32>
    %30 = vector.broadcast %22 : vector<8x1xf32> to vector<8x128xf32>
    %31 = arith.subf %16, %30 : vector<8x128xf32>
    %cst_20 = arith.constant 9.99999974E-6 : f32
    %32 = vector.broadcast %cst_20 : f32 to vector<8x1xf32>
    %33 = arith.addf %29, %32 : vector<8x1xf32>
    %34 = math.rsqrt %33 : vector<8x1xf32>
    %35 = vector.broadcast %34 : vector<8x1xf32> to vector<8x128xf32>
    %36 = arith.mulf %31, %35 : vector<8x128xf32>
    %37 = vector.broadcast %17 : vector<1x128xf32> to vector<8x128xf32>
    %38 = arith.mulf %36, %37 : vector<8x128xf32>
    %39 = vector.broadcast %18 : vector<1x128xf32> to vector<8x128xf32>
    %40 = arith.addf %38, %39 : vector<8x128xf32>
    %c0_21 = arith.constant 0 : index
    %c0_22 = arith.constant 0 : index
    %c0_23 = arith.constant 0 : index
    %41 = vector.load %arg8[%c0_21, %c0_22, %c0_23] : memref<1x8x128xf32, #tpu.memory_space<vmem>>, vector<1x8x128xf32>
    %42 = vector.shape_cast %41 : vector<1x8x128xf32> to vector<8x128xf32>
    %43 = vector.shape_cast %40 : vector<8x128xf32> to vector<1x8x128xf32>
    tpu.vector_store %arg8[%c0_21, %c0_22, %c0_23], %43 {strides = array<i32>} : memref<1x8x128xf32, #tpu.memory_space<vmem>>, vector<1x8x128xf32>,
    return
  }
  func.func @transform_0(%arg0: i32) -> (i32, i32, i32) {
    %c0_i32 = arith.constant 0 : i32
    %c0_i32_0 = arith.constant 0 : i32
    %c0_i32_1 = arith.constant 0 : i32
    return %arg0, %c0_i32, %c0_i32_0 : i32, i32, i32
  }
  func.func @transform_1(%arg0: i32) -> (i32, i32) {
    %c0_i32 = arith.constant 0 : i32
    %c0_i32_0 = arith.constant 0 : i32
    %c0_i32_1 = arith.constant 0 : i32
    return %c0_i32, %c0_i32_0 : i32, i32
  }
  func.func @transform_2(%arg0: i32) -> (i32, i32) {
    %c0_i32 = arith.constant 0 : i32
    %c0_i32_0 = arith.constant 0 : i32
    %c0_i32_1 = arith.constant 0 : i32
    return %c0_i32, %c0_i32_0 : i32, i32
  }
  func.func @transform_3(%arg0: i32) -> (i32, i32) {
    %c0_i32 = arith.constant 0 : i32
    %c0_i32_0 = arith.constant 0 : i32
    %c0_i32_1 = arith.constant 0 : i32
    return %c0_i32, %c0_i32_0 : i32, i32
  }
  func.func @transform_4(%arg0: i32) -> (i32, i32) {
    %c0_i32 = arith.constant 0 : i32
    %c0_i32_0 = arith.constant 0 : i32
    %c0_i32_1 = arith.constant 0 : i32
    return %c0_i32, %c0_i32_0 : i32, i32
  }
  func.func @transform_5(%arg0: i32) -> (i32, i32) {
    %c0_i32 = arith.constant 0 : i32
    %c0_i32_0 = arith.constant 0 : i32
    %c0_i32_1 = arith.constant 0 : i32
    return %c0_i32, %c0_i32_0 : i32, i32
  }
  func.func @transform_6(%arg0: i32) -> (i32, i32) {
    %c0_i32 = arith.constant 0 : i32
    %c0_i32_0 = arith.constant 0 : i32
    %c0_i32_1 = arith.constant 0 : i32
    return %c0_i32, %c0_i32_0 : i32, i32
  }
  func.func @transform_7(%arg0: i32) -> (i32, i32, i32) {
    %c0_i32 = arith.constant 0 : i32
    %c0_i32_0 = arith.constant 0 : i32
    %c0_i32_1 = arith.constant 0 : i32
    return %arg0, %c0_i32, %c0_i32_0 : i32, i32, i32
  }
}

module attributes {stable_mosaic.version = 11 : i64} {
  func.func @_ln_project_kernel(%arg0: i32, %arg1: i32, %arg2: memref<8x128xf32, #tpu.memory_space<vmem>>, %arg3: memref<1x128xf32, #tpu.memory_space<vmem>>, %arg4: memref<1x128xf32, #tpu.memory_space<vmem>>, %arg5: memref<128x128xbf16, #tpu.memory_space<vmem>>, %arg6: memref<1x128xf32, #tpu.memory_space<vmem>>, %arg7: memref<8x128xf32, #tpu.memory_space<vmem>>) attributes {dimension_semantics = [#tpu.dimension_semantics<parallel>, #tpu.dimension_semantics<parallel>], iteration_bounds = array<i64: 2, 1>, scalar_prefetch = 0 : i64, scratch_operands = 0 : i64, tpu.core_type = #tpu.core_type<tc>, window_params = [{transform_indices = @transform_0, window_bounds = array<i64: 8, 128>}, {pipeline_mode = #tpu.pipeline_mode<synchronous>, transform_indices = @transform_1, window_bounds = array<i64: 1, 128>}, {pipeline_mode = #tpu.pipeline_mode<synchronous>, transform_indices = @transform_2, window_bounds = array<i64: 1, 128>}, {transform_indices = @transform_3, window_bounds = array<i64: 128, 128>}, {transform_indices = @transform_4, window_bounds = array<i64: 1, 128>}, {transform_indices = @transform_5, window_bounds = array<i64: 8, 128>}]} {
    %c0 = arith.constant 0 : index
    %c0_0 = arith.constant 0 : index
    %0 = vector.load %arg2[%c0, %c0_0] : memref<8x128xf32, #tpu.memory_space<vmem>>, vector<8x128xf32>
    %c0_1 = arith.constant 0 : index
    %c0_2 = arith.constant 0 : index
    %1 = vector.load %arg3[%c0_1, %c0_2] : memref<1x128xf32, #tpu.memory_space<vmem>>, vector<1x128xf32>
    %c0_3 = arith.constant 0 : index
    %c0_4 = arith.constant 0 : index
    %2 = vector.load %arg4[%c0_3, %c0_4] : memref<1x128xf32, #tpu.memory_space<vmem>>, vector<1x128xf32>
    %cst = arith.constant dense<0.000000e+00> : vector<8xf32>
    %3 = vector.multi_reduction <add>, %0, %cst [1] : vector<8x128xf32> to vector<8xf32>
    %4 = vector.shape_cast %3 : vector<8xf32> to vector<8x1xf32>
    %cst_5 = arith.constant 1.280000e+02 : f32
    %5 = vector.broadcast %cst_5 : f32 to vector<8x1xf32>
    %6 = arith.divf %4, %5 : vector<8x1xf32>
    %7 = vector.broadcast %6 : vector<8x1xf32> to vector<8x128xf32>
    %8 = arith.subf %0, %7 : vector<8x128xf32>
    %9 = arith.mulf %8, %8 : vector<8x128xf32>
    %cst_6 = arith.constant dense<0.000000e+00> : vector<8xf32>
    %10 = vector.multi_reduction <add>, %9, %cst_6 [1] : vector<8x128xf32> to vector<8xf32>
    %11 = vector.shape_cast %10 : vector<8xf32> to vector<8x1xf32>
    %cst_7 = arith.constant 1.280000e+02 : f32
    %12 = vector.broadcast %cst_7 : f32 to vector<8x1xf32>
    %13 = arith.divf %11, %12 : vector<8x1xf32>
    %14 = vector.broadcast %6 : vector<8x1xf32> to vector<8x128xf32>
    %15 = arith.subf %0, %14 : vector<8x128xf32>
    %cst_8 = arith.constant 9.99999974E-6 : f32
    %16 = vector.broadcast %cst_8 : f32 to vector<8x1xf32>
    %17 = arith.addf %13, %16 : vector<8x1xf32>
    %18 = math.rsqrt %17 : vector<8x1xf32>
    %19 = vector.broadcast %18 : vector<8x1xf32> to vector<8x128xf32>
    %20 = arith.mulf %15, %19 : vector<8x128xf32>
    %21 = vector.broadcast %1 : vector<1x128xf32> to vector<8x128xf32>
    %22 = arith.mulf %20, %21 : vector<8x128xf32>
    %23 = vector.broadcast %2 : vector<1x128xf32> to vector<8x128xf32>
    %24 = arith.addf %22, %23 : vector<8x128xf32>
    %25 = arith.truncf %24 : vector<8x128xf32> to vector<8x128xbf16>
    %c0_9 = arith.constant 0 : index
    %c0_10 = arith.constant 0 : index
    %26 = vector.load %arg5[%c0_9, %c0_10] : memref<128x128xbf16, #tpu.memory_space<vmem>>, vector<128x128xbf16>
    %cst_11 = arith.constant dense<0.000000e+00> : vector<8x128xf32>
    %27 = tpu.matmul %25, %26, %cst_11 {dimension_numbers = #tpu.dot_dimension_numbers<[1], [0], [0], [1], [0, 0, 1, 1], [], []>} : vector<8x128xbf16>, vector<128x128xbf16>, vector<8x128xf32> -> vector<8x128xf32>
    %c0_12 = arith.constant 0 : index
    %c0_13 = arith.constant 0 : index
    %28 = vector.load %arg6[%c0_12, %c0_13] : memref<1x128xf32, #tpu.memory_space<vmem>>, vector<1x128xf32>
    %29 = vector.broadcast %28 : vector<1x128xf32> to vector<8x128xf32>
    %30 = arith.addf %27, %29 : vector<8x128xf32>
    %c0_14 = arith.constant 0 : index
    %c0_15 = arith.constant 0 : index
    %31 = vector.load %arg7[%c0_14, %c0_15] : memref<8x128xf32, #tpu.memory_space<vmem>>, vector<8x128xf32>
    tpu.vector_store %arg7[%c0_14, %c0_15], %30 {strides = array<i32>} : memref<8x128xf32, #tpu.memory_space<vmem>>, vector<8x128xf32>,
    return
  }
  func.func @transform_0(%arg0: i32, %arg1: i32) -> (i32, i32) {
    %c0_i32 = arith.constant 0 : i32
    %c0_i32_0 = arith.constant 0 : i32
    return %arg0, %c0_i32 : i32, i32
  }
  func.func @transform_1(%arg0: i32, %arg1: i32) -> (i32, i32) {
    %c0_i32 = arith.constant 0 : i32
    %c0_i32_0 = arith.constant 0 : i32
    %c0_i32_1 = arith.constant 0 : i32
    return %c0_i32, %c0_i32_0 : i32, i32
  }
  func.func @transform_2(%arg0: i32, %arg1: i32) -> (i32, i32) {
    %c0_i32 = arith.constant 0 : i32
    %c0_i32_0 = arith.constant 0 : i32
    %c0_i32_1 = arith.constant 0 : i32
    return %c0_i32, %c0_i32_0 : i32, i32
  }
  func.func @transform_3(%arg0: i32, %arg1: i32) -> (i32, i32) {
    %c0_i32 = arith.constant 0 : i32
    %c0_i32_0 = arith.constant 0 : i32
    return %c0_i32, %arg1 : i32, i32
  }
  func.func @transform_4(%arg0: i32, %arg1: i32) -> (i32, i32) {
    %c0_i32 = arith.constant 0 : i32
    %c0_i32_0 = arith.constant 0 : i32
    return %c0_i32, %arg1 : i32, i32
  }
  func.func @transform_5(%arg0: i32, %arg1: i32) -> (i32, i32) {
    %c0_i32 = arith.constant 0 : i32
    return %arg0, %arg1 : i32, i32
  }
}

</mosaic_0001>

<bundles_post_ra>
// kernel: transformer_forward.16
= control target key start
LH: loop header
LB: loop body
LE: loop exit
PB: predicated region body
PF: predicated region fallthrough
CT: control target
= control target key end

     0   :  { %vm23_vm0 = vcmask 1043456   ;;  %s135_s0 = inlined_call_operand.vmem [shape: f32[20,128], index: 0, kind: input, shape index: {}]   ;;  %s136_s1 = inlined_call_operand.vmem [shape: f32[1,128], index: 1, kind: input, shape index: {}]   ;;  %s137_s2 = inlined_call_operand.vmem [shape: f32[1,128], index: 2, kind: input, shape index: {}]   ;;  %s138_s3 = inlined_call_operand.vmem [shape: f32[20,128], index: 3, kind: output, shape index: {}]  }
   0x1   :  { %v15_v0 = vld [vmem:[%s135_s0 + $0x8] sm:$0xff]  ;;  %v16_v1 = vld [vmem:[%s135_s0 + $0x10] sm:$0xf]  ;;  %v14_v3 = vld [vmem:[%s135_s0] sm:$0xff] }
   0x2   :  { %21 = vadd.xlane.f32.xlu1 %v15_v0  ;;  %v24_v2 = vsel %vm23_vm0, %v16_v1, 0.0  ;;  %v81_v27 = vld [vmem:[%s136_s1] ss:$0 sm:$0xff] }
   0x3   :  { %25 = vadd.xlane.f32.xlu0 %v24_v2  ;;  %v82_v29 = vld [vmem:[%s137_s2] ss:$0 sm:$0xff] }
   0x7   :  { %19 = vadd.xlane.f32.xlu0 %v14_v3 }
  0x8f   :  { %v22_v4 = vpop.xlane.xlu1 %21 }
  0x90   :  { %v29_v5 = vmul.f32 0.0078125, %v22_v4  ;;  %v26_v6 = vpop.xlane.xlu0 %25 }
  0x91   :  { %v30_v8 = vmul.f32 0.0078125, %v26_v6 }
  0x92   :  { %v32_v7 = vsub.f32 %v15_v0, %v29_v5 }
  0x93   :  { %v33_v12 = vsub.f32 %v16_v1, %v30_v8 }
  0x94   :  { %v20_v9 = vpop.xlane.xlu0 %19  ;;  %v35_v10 = vmul.f32 %v32_v7, %v32_v7 }
  0x95   :  { %v28_v11 = vmul.f32 0.0078125, %v20_v9  ;;  %v36_v15 = vmul.f32 %v33_v12, %v33_v12 }
  0x96   :  { %39 = vadd.xlane.f32.xlu0 %v35_v10 }
  0x97   :  { %v31_v13 = vsub.f32 %v14_v3, %v28_v11  ;;  %v41_v16 = vsel %vm23_vm0, %v36_v15, 0.0 }
  0x99   :  { %v34_v14 = vmul.f32 %v31_v13, %v31_v13 }
  0x9b   :  { %37 = vadd.xlane.f32.xlu1 %v34_v14 }
  0x9f   :  { %42 = vadd.xlane.f32.xlu1 %v41_v16 }
 0x123   :  { %v40_v17 = vpop.xlane.xlu0 %39 }
 0x124   :  { %v45_v18 = vmul.f32 0.0078125, %v40_v17 }
 0x126   :  { %v48_v19 = vadd.f32 1e-05, %v45_v18 }
 0x128   :  { %83 = vrsqrt.f32 %v48_v19  ;;  %v38_v20 = vpop.xlane.xlu1 %37 }
 0x129   :  { %v44_v21 = vmul.f32 0.0078125, %v38_v20 }
 0x12b   :  { %v47_v22 = vadd.f32 1e-05, %v44_v21 }
 0x12c   :  { %v43_v23 = vpop.xlane.xlu1 %42 }
 0x12d   :  { %85 = vrsqrt.f32 %v47_v22  ;;  %v46_v24 = vmul.f32 0.0078125, %v43_v23 }
 0x12f   :  { %v49_v25 = vadd.f32 1e-05, %v46_v24 }
 0x131   :  { %87 = vrsqrt.f32 %v49_v25 }
 0x132   :  { %v84_v26 = vpop.eup %83 }
 0x133   :  { %v54_v28 = vmul.f32 %v84_v26, %v32_v7 }
 0x135   :  { %v63_v30 = vmul.f32 %v81_v27, %v54_v28 }
 0x137   :  { %v86_v31 = vpop.eup %85  ;;  %v72_v32 = vadd.f32 %v82_v29, %v63_v30 }
 0x138   :  { %v53_v33 = vmul.f32 %v86_v31, %v31_v13 }
 0x139   :  { %75 = vst [vmem:[%s138_s3 + $0x8] sm:$0xff] %v72_v32 }
 0x13a   :  { %v62_v34 = vmul.f32 %v81_v27, %v53_v33 }
 0x13b   :  { %v88_v35 = vpop.eup %87 }
 0x13c   :  { %v71_v36 = vadd.f32 %v82_v29, %v62_v34  ;;  %v55_v37 = vmul.f32 %v88_v35, %v33_v12 }
 0x13e   :  { %74 = vst [vmem:[%s138_s3] sm:$0xff] %v71_v36  ;;  %v64_v38 = vmul.f32 %v81_v27, %v55_v37 }
 0x140   :  { %v73_v39 = vadd.f32 %v82_v29, %v64_v38 }
 0x142   :  { %76 = vst [vmem:[%s138_s3 + $0x10] sm:$0xf] %v73_v39 }

// kernel: transformer_forward.13
= control target key start
LH: loop header
LB: loop body
LE: loop exit
PB: predicated region body
PF: predicated region fallthrough
CT: control target
= control target key end

     0   :  { %s891_s24 = smov 0   ;;  %s1029_s0 = inlined_call_operand.vmem [shape: f32[2,10,128], index: 0, kind: input, shape index: {}]   ;;  %s1030_s1 = inlined_call_operand.vmem [shape: bf16[128,256], index: 1, kind: input, shape index: {}]   ;;  %s1031_s2 = inlined_call_operand.vmem [shape: f32[1,256], index: 2, kind: input, shape index: {}]   ;;  %s1032_s3 = inlined_call_operand.vmem [shape: bf16[256,128], index: 3, kind: input, shape index: {}]   ;;  %s1033_s4 = inlined_call_operand.vmem [shape: f32[1,128], index: 4, kind: input, shape index: {}]   ;;  %s1034_s5 = inlined_call_operand.vmem [shape: f32[1,128], index: 5, kind: input, shape index: {}]   ;;  %s1035_s6 = inlined_call_operand.vmem [shape: f32[1,128], index: 6, kind: input, shape index: {}]   ;;  %s1036_s7 = inlined_call_operand.vmem [shape: f32[2,10,128], index: 7, kind: output, shape index: {}]  }
   0x1 LB: > { %s719_s25 = sadd.s32 4294967295, %s848_s24   ;;  %p723_p0 = scmp.ge.s32.totalorder %s848_s24, 1  ;;  %s848_s24 = sphi %s891_s24, %s17_s24  }
   0x2   : > { %p237_p1 = scmp.lt.s32.totalorder %s848_s24, 3 }
   0x4   : > { %p238_p2 = pnand %p723_p0, %p237_p1 }
   0x5   : > { %v798_v0 = vld [vmem:[%s1030_s1 + $0x4] ss:$8 sps:$4 sm:$0xff] (!%p238_p2)   ;;  %v800_v1 = vld [vmem:[%s1030_s1] ss:$8 sps:$4 sm:$0xff] (!%p238_p2)   ;;  %v850_v2 = vmov (!%p238_p2), 0   ;;  %p269_p3 = scmp.lt.s32.totalorder (!%p238_p2), %s719_s25, 1  ;;  %v301_v36 = vlaneseq (!%p238_p2) }
   0x6   : > { %241 = sbr.rel (%p238_p2) target bundleno = 802 (0x322), region = 48  ;;  %423 = vmatprep.mubr.bf16.mxu0 (!%p238_p2), %v850_v2  ;;  %391 = vmatprep.subr.bf16.mxu0 (!%p238_p2), %v798_v0  ;;  %v801_v3 = vld [vmem:[%s1030_s1 + $0x14] ss:$8 sps:$4 sm:$0xff] (!%p238_p2)   ;;  %v803_v4 = vld [vmem:[%s1030_s1 + $0x10] ss:$8 sps:$4 sm:$0xff] (!%p238_p2)   ;;  %v822_v10 = vld [vmem:[%s1032_s3 + $0x40] sm:$0xff] (!%p238_p2)  }
   0x7   : > { %392 = vmatpush1.bf16.msra.mxu0 (!%p238_p2), %v800_v1  ;;  %v804_v5 = vld [vmem:[%s1030_s1 + $0x24] ss:$8 sps:$4 sm:$0xff] (!%p238_p2)   ;;  %v806_v6 = vld [vmem:[%s1030_s1 + $0x20] ss:$8 sps:$4 sm:$0xff] (!%p238_p2)   ;;  %v807_v7 = vld [vmem:[%s1030_s1 + $0x34] ss:$8 sps:$4 sm:$0xff] (!%p238_p2)   ;;  %767 = vmatprep.subr.bf16.mxu1 (!%p238_p2), %v822_v10 }
   0x8   : > { %393 = vmatprep.subr.bf16.mxu0 (!%p238_p2), %v801_v3  ;;  %v809_v8 = vld [vmem:[%s1030_s1 + $0x30] ss:$8 sps:$4 sm:$0xff] (!%p238_p2)   ;;  %v810_v9 = vld [vmem:[%s1030_s1 + $0x44] ss:$8 sps:$4 sm:$0xff] (!%p238_p2)   ;;  %v812_v11 = vld [vmem:[%s1030_s1 + $0x40] ss:$8 sps:$4 sm:$0xff] (!%p238_p2)  }
   0x9   : > { %v823_v12 = vld [vmem:[%s1032_s3] sm:$0xff] (!%p238_p2)   ;;  %v813_v13 = vld [vmem:[%s1030_s1 + $0x54] ss:$8 sps:$4 sm:$0xff] (!%p238_p2)   ;;  %v824_v14 = vld [vmem:[%s1032_s3 + $0x48] sm:$0xff] (!%p238_p2)   ;;  %v302_v37 = vshrl.u32 (!%p238_p2), %v301_v36, 7  ;;  %vm622_vm0 = vcmask (!%p238_p2), 1041408  }
   0xa   : > { %768 = vmatpush3.bf16.msra.mxu1 (!%p238_p2), %v823_v12  ;;  %v825_v15 = vld [vmem:[%s1032_s3 + $0x8] sm:$0xff] (!%p238_p2)   ;;  %v826_v16 = vld [vmem:[%s1032_s3 + $0x50] sm:$0xff] (!%p238_p2)   ;;  %v828_v20 = vld [vmem:[%s1032_s3 + $0x58] sm:$0xff] (!%p238_p2)  }
   0xb   : > { %394 = vmatpush1.bf16.msra.mxu0 (!%p238_p2), %v803_v4  ;;  %769 = vmatprep.subr.bf16.mxu1 (!%p238_p2), %v824_v14  ;;  %v815_v17 = vld [vmem:[%s1030_s1 + $0x50] ss:$8 sps:$4 sm:$0xff] (!%p238_p2)   ;;  %v816_v18 = vld [vmem:[%s1030_s1 + $0x64] ss:$8 sps:$4 sm:$0xff] (!%p238_p2)   ;;  %v818_v21 = vld [vmem:[%s1030_s1 + $0x60] ss:$8 sps:$4 sm:$0xff] (!%p238_p2)  }
   0xc   : > { %395 = vmatprep.subr.bf16.mxu0 (!%p238_p2), %v804_v5  ;;  %v827_v19 = vld [vmem:[%s1032_s3 + $0x10] sm:$0xff] (!%p238_p2)   ;;  %v829_v23 = vld [vmem:[%s1032_s3 + $0x18] sm:$0xff] (!%p238_p2)   ;;  %v830_v24 = vld [vmem:[%s1032_s3 + $0x60] sm:$0xff] (!%p238_p2)   ;;  %v303_v38 = vsub.s32 (!%p238_p2), 0, %v302_v37  ;;  %v307_v40 = vsub.s32 (!%p238_p2), 1, %v302_v37 }
   0xd   : > { %s1038_s25 = smov (!%p269_p3, %s719_s25), 1  ;;  %v819_v22 = vld [vmem:[%s1030_s1 + $0x74] ss:$8 sps:$4 sm:$0xff]   ;;  %v821_v25 = vld [vmem:[%s1030_s1 + $0x70] ss:$8 sps:$4 sm:$0xff]   ;;  %v831_v28 = vld [vmem:[%s1032_s3 + $0x20] sm:$0xff]  }
   0xe   : > { %770 = vmatpush3.bf16.msra.mxu1 %v825_v15  ;;  %s765_s20 = sshll.u32 %s1038_s25, 4  ;;  %v832_v29 = vld [vmem:[%s1032_s3 + $0x68] sm:$0xff]   ;;  %v834_v32 = vld [vmem:[%s1032_s3 + $0x70] sm:$0xff]   ;;  %v836_v34 = vld [vmem:[%s1032_s3 + $0x78] sm:$0xff]  }
   0xf   : > { %396 = vmatpush1.bf16.msra.mxu0 %v806_v6  ;;  %771 = vmatprep.subr.bf16.mxu1 %v826_v16  ;;  %s273_s12 = scalar_lea.vmem %s1029_s0, %s765_s20  ;;  %v833_v31 = vld [vmem:[%s1032_s3 + $0x28] sm:$0xff]   ;;  %v835_v33 = vld [vmem:[%s1032_s3 + $0x30] sm:$0xff]   ;;  %v837_v35 = vld [vmem:[%s1032_s3 + $0x38] sm:$0xff]   ;;  %s278_s19 = scalar_lea.vmem %s1036_s7, %s765_s20 }
  0x10   : > { %397 = vmatprep.subr.bf16.mxu0 %v807_v7  ;;  %v280_v26 = vld [vmem:[%s273_s12] sm:$0xff]  ;;  %v281_v27 = vld [vmem:[%s273_s12 + $0x8] sm:$0x3] }
  0x11   : > { %v282_v30 = vpack.c.bf16 %v281_v27, %v280_v26  ;;  %v299_v39 = vld [vmem:[%s1031_s2] sm:$0x3] }
  0x12   : > { %772 = vmatpush3.bf16.msra.mxu1 %v827_v19  ;;  %v304_v41 = vrot.slane %v299_v39, %v303_v38  ;;  %v308_v42 = vrot.slane %v299_v39, %v307_v40  ;;  %v744_v63 = vld [vmem:[%s1033_s4] ss:$0 sm:$0xff] }
  0x13   : > { %398 = vmatpush1.bf16.msra.mxu0 %v809_v8  ;;  %773 = vmatprep.subr.bf16.mxu1 %v828_v20 }
  0x14   : > { %399 = vmatprep.subr.bf16.mxu0 %v810_v9 }
  0x16   : > { %774 = vmatpush3.bf16.msra.mxu1 %v829_v23  ;;  %v762_v23 = vld [vmem:[%s1035_s6] ss:$0 sm:$0xff] }
  0x17   : > { %400 = vmatpush1.bf16.msra.mxu0 %v812_v11  ;;  %775 = vmatprep.subr.bf16.mxu1 %v830_v24 }
  0x18   : > { %401 = vmatprep.subr.bf16.mxu0 %v813_v13 }
  0x1a   : > { %776 = vmatpush3.bf16.msra.mxu1 %v831_v28 }
  0x1b   : > { %402 = vmatpush1.bf16.msra.mxu0 %v815_v17  ;;  %777 = vmatprep.subr.bf16.mxu1 %v832_v29 }
  0x1c   : > { %403 = vmatprep.subr.bf16.mxu0 %v816_v18 }
  0x1e   : > { %778 = vmatpush3.bf16.msra.mxu1 %v833_v31 }
  0x1f   : > { %404 = vmatpush1.bf16.msra.mxu0 %v818_v21  ;;  %779 = vmatprep.subr.bf16.mxu1 %v834_v32  ;;  %v761_v21 = vld [vmem:[%s1034_s5] ss:$0 sm:$0xff] }
  0x20   : > { %405 = vmatprep.subr.bf16.mxu0 %v819_v22 }
  0x22   : > { %780 = vmatpush3.bf16.msra.mxu1 %v835_v33 }
  0x23   : > { %406 = vmatpush1.bf16.msra.mxu0 %v821_v25  ;;  %781 = vmatprep.subr.bf16.mxu1 %v836_v34 }
  0x26   : > { %424 = vmatmul.mubr.bf16.vlgmr.msra.gmra.mrb[0].mxu0 %v282_v30  ;;  %782 = vmatpush3.bf16.msra.mxu1 %v837_v35 }
  0xf9   : > { %v425_v43 = vpop.f32.mrb[0].mxu0 }
  0xfa   : > { %v426_v44 = vadd.f32 %v425_v43, %v304_v41  ;;  %v427_v45 = vpop.f32.mrb[1].mxu0 }
  0xfb   : > { %v428_v46 = vadd.f32 %v427_v45, %v308_v42  ;;  %v429_v47 = vpop.f32.mrb[2].mxu0 }
  0xfc   : > { %v430_v48 = vadd.f32 %v429_v47, %v304_v41  ;;  %v431_v49 = vpop.f32.mrb[3].mxu0  ;;  %v434_v51 = vmax.f32 %v426_v44, 0.0 }
  0xfd   : > { %v432_v50 = vadd.f32 %v431_v49, %v308_v42  ;;  %v435_v53 = vmax.f32 %v428_v46, 0.0 }
  0xfe   : > { %v436_v52 = vmax.f32 %v430_v48, 0.0 }
  0xff   : > { %v437_v54 = vmax.f32 %v432_v50, 0.0 }
 0x100   : > { %v438_v55 = vpack.c.bf16 %v436_v52, %v434_v51 }
 0x101   : > { %v439_v56 = vpack.c.bf16 %v437_v54, %v435_v53 }
 0x103   : > { %607 = vmatprep.mubr.bf16.mxu1 %v439_v56 }
 0x104   : > { %608 = vmatmul.mubr.bf16.vlgmr.msra.gmra.mrb[0].mxu1 %v438_v55 }
 0x1d7   : > { %v783_v57 = vpop.f32.mrb[0].mxu1 }
 0x1d8   : > { %v784_v58 = vpop.f32.mrb[1].mxu1 }
 0x1d9   : > { %v785_v59 = vadd.f32 %v784_v58, %v783_v57  ;;  %v786_v60 = vpop.f32.mrb[2].mxu1 }
 0x1da   : > { %v787_v61 = vpop.f32.mrb[3].mxu1 }
 0x1db   : > { %v788_v62 = vadd.f32 %v787_v61, %v786_v60  ;;  %v610_v2 = vadd.f32 %v785_v59, %v744_v63 }
 0x1dd   : > { %v613_v0 = vadd.f32 %v788_v62, %v744_v63  ;;  %v616_v4 = vadd.f32 %v610_v2, %v280_v26 }
 0x1df   : > { %v617_v1 = vadd.f32 %v613_v0, %v281_v27 }
 0x1e1   : > { %v623_v3 = vsel %vm622_vm0, %v617_v1, 0.0 }
 0x1e2   : > { %624 = vadd.xlane.f32.xlu0 %v623_v3 }
 0x1e6   : > { %620 = vadd.xlane.f32.xlu0 %v616_v4 }
 0x26f   : > { %v625_v5 = vpop.xlane.xlu0 %624 }
 0x270   : > { %v628_v6 = vmul.f32 0.0078125, %v625_v5 }
 0x272   : > { %v630_v9 = vsub.f32 %v617_v1, %v628_v6 }
 0x273   : > { %v621_v7 = vpop.xlane.xlu0 %620 }
 0x274   : > { %v627_v8 = vmul.f32 0.0078125, %v621_v7  ;;  %v632_v12 = vmul.f32 %v630_v9, %v630_v9 }
 0x276   : > { %v629_v10 = vsub.f32 %v616_v4, %v627_v8  ;;  %v635_v13 = vsel %vm622_vm0, %v632_v12, 0.0 }
 0x278   : > { %v631_v11 = vmul.f32 %v629_v10, %v629_v10 }
 0x27a   : > { %633 = vadd.xlane.f32.xlu1 %v631_v11 }
 0x27e   : > { %636 = vadd.xlane.f32.xlu1 %v635_v13 }
 0x307   : > { %v634_v14 = vpop.xlane.xlu1 %633 }
 0x308   : > { %v638_v15 = vmul.f32 0.0078125, %v634_v14 }
 0x30a   : > { %v640_v16 = vadd.f32 1e-05, %v638_v15 }
 0x30b   : > { %v637_v17 = vpop.xlane.xlu1 %636 }
 0x30c   : > { %838 = vrsqrt.f32 %v640_v16  ;;  %v639_v18 = vmul.f32 0.0078125, %v637_v17 }
 0x30e   : > { %v641_v19 = vadd.f32 1e-05, %v639_v18 }
 0x310   : > { %840 = vrsqrt.f32 %v641_v19 }
 0x316   : > { %v839_v20 = vpop.eup %838 }
 0x317   : > { %v644_v22 = vmul.f32 %v839_v20, %v629_v10 }
 0x319   : > { %v652_v24 = vmul.f32 %v761_v21, %v644_v22 }
 0x31a   : > { %v841_v25 = vpop.eup %840 }
 0x31b   : > { %v660_v26 = vadd.f32 %v762_v23, %v652_v24  ;;  %v645_v27 = vmul.f32 %v841_v25, %v630_v9 }
 0x31d   : > { %662 = vst [vmem:[%s278_s19] sm:$0xff] %v660_v26  ;;  %v653_v28 = vmul.f32 %v761_v21, %v645_v27 }
 0x31f   : > { %v661_v29 = vadd.f32 %v762_v23, %v653_v28 }
 0x321   : > { %663 = vst [vmem:[%s278_s19 + $0x8] sm:$0x3] %v661_v29 }
 0x322 PF: > { %s17_s24 = sadd.s32 1, %s848_s24  }
 0x323   : > { %p14_p4 = scmp.ge.s32.totalorder %s17_s24, 4  }
 0x325   :  { %16 = sbr.rel (!%p14_p4) target bundleno = 1 (0x1), region = 78 }

// kernel: transformer_forward.12
= control target key start
LH: loop header
LB: loop body
LE: loop exit
PB: predicated region body
PF: predicated region fallthrough
CT: control target
= control target key end

     0   :  { %s1743_s24 = smov 0   ;;  %s2018_s0 = inlined_call_operand.vmem [shape: f32[2,10,128], index: 0, kind: input, shape index: {}]   ;;  %s2019_s1 = inlined_call_operand.vmem [shape: bf16[128,384], index: 1, kind: input, shape index: {}]   ;;  %s2020_s2 = inlined_call_operand.vmem [shape: f32[1,384], index: 2, kind: input, shape index: {}]   ;;  %s2021_s3 = inlined_call_operand.vmem [shape: bf16[128,128], index: 3, kind: input, shape index: {}]   ;;  %s2022_s4 = inlined_call_operand.vmem [shape: f32[1,128], index: 4, kind: input, shape index: {}]   ;;  %s2023_s5 = inlined_call_operand.vmem [shape: f32[1,128], index: 5, kind: input, shape index: {}]   ;;  %s2024_s6 = inlined_call_operand.vmem [shape: f32[1,128], index: 6, kind: input, shape index: {}]   ;;  %s2025_s7 = inlined_call_operand.vmem [shape: f32[2,10,128], index: 7, kind: output, shape index: {}]  }
   0x1 LB: > { %s1402_s25 = sadd.s32 4294967295, %s1695_s24   ;;  %p1406_p0 = scmp.ge.s32.totalorder %s1695_s24, 1  ;;  %s1695_s24 = sphi %s1743_s24, %s17_s24  }
   0x2   : > { %p237_p1 = scmp.lt.s32.totalorder %s1695_s24, 3 }
   0x4   : > { %p238_p2 = pnand %p1406_p0, %p237_p1 }
   0x5   : > { %v1613_v0 = vld [vmem:[%s2019_s1 + $0x4] ss:$12 sps:$4 sm:$0xff] (!%p238_p2)   ;;  %v1615_v1 = vld [vmem:[%s2019_s1] ss:$12 sps:$4 sm:$0xff] (!%p238_p2)   ;;  %v1697_v2 = vmov (!%p238_p2), 0   ;;  %p269_p3 = scmp.lt.s32.totalorder (!%p238_p2), %s1402_s25, 1  ;;  %v317_v21 = vlaneseq (!%p238_p2) }
   0x6   : > { %241 = sbr.rel (%p238_p2) target bundleno = 2965 (0xb95), region = 48  ;;  %492 = vmatprep.mubr.bf16.mxu0 (!%p238_p2), %v1697_v2  ;;  %460 = vmatprep.subr.bf16.mxu0 (!%p238_p2), %v1613_v0  ;;  %v1616_v3 = vld [vmem:[%s2019_s1 + $0x1c] ss:$12 sps:$4 sm:$0xff] (!%p238_p2)   ;;  %v1618_v4 = vld [vmem:[%s2019_s1 + $0x18] ss:$12 sps:$4 sm:$0xff] (!%p238_p2)   ;;  %v1698_v20 = vmov (!%p238_p2), 0.0  }
   0x7   : > { %461 = vmatpush1.bf16.msra.mxu0 (!%p238_p2), %v1615_v1  ;;  %v1619_v5 = vld [vmem:[%s2019_s1 + $0x34] ss:$12 sps:$4 sm:$0xff] (!%p238_p2)   ;;  %v1621_v6 = vld [vmem:[%s2019_s1 + $0x30] ss:$12 sps:$4 sm:$0xff] (!%p238_p2)   ;;  %v1622_v7 = vld [vmem:[%s2019_s1 + $0x4c] ss:$12 sps:$4 sm:$0xff] (!%p238_p2)   ;;  %1499 = vmatprep.subr.bf16.mxu1 (!%p238_p2), %v1698_v20 }
   0x8   : > { %462 = vmatprep.subr.bf16.mxu0 (!%p238_p2), %v1616_v3  ;;  %v1624_v8 = vld [vmem:[%s2019_s1 + $0x48] ss:$12 sps:$4 sm:$0xff] (!%p238_p2)   ;;  %v1625_v9 = vld [vmem:[%s2019_s1 + $0x64] ss:$12 sps:$4 sm:$0xff] (!%p238_p2)   ;;  %v1627_v10 = vld [vmem:[%s2019_s1 + $0x60] ss:$12 sps:$4 sm:$0xff] (!%p238_p2)  }
   0x9   : > { %v1628_v11 = vld [vmem:[%s2019_s1 + $0x7c] ss:$12 sps:$4 sm:$0xff] (!%p238_p2)   ;;  %v1630_v12 = vld [vmem:[%s2019_s1 + $0x78] ss:$12 sps:$4 sm:$0xff] (!%p238_p2)   ;;  %v1631_v13 = vld [vmem:[%s2019_s1 + $0x94] ss:$12 sps:$4 sm:$0xff] (!%p238_p2)  }
   0xa   : > { %v1633_v14 = vld [vmem:[%s2019_s1 + $0x90] ss:$12 sps:$4 sm:$0xff] (!%p238_p2)   ;;  %v1634_v15 = vld [vmem:[%s2019_s1 + $0xac] ss:$12 sps:$4 sm:$0xff] (!%p238_p2)   ;;  %v1636_v16 = vld [vmem:[%s2019_s1 + $0xa8] ss:$12 sps:$4 sm:$0xff] (!%p238_p2)  }
   0xb   : > { %463 = vmatpush1.bf16.msra.mxu0 (!%p238_p2), %v1618_v4  ;;  %vm1699_vm0 = vmmov (!%p238_p2), 0   ;;  %v1822_v22 = vshrl.u32 (!%p238_p2), %v317_v21, 7  ;;  %v1828_v24 = vld [vmem:[%s2020_s2] sm:$0x7] (!%p238_p2)  ;;  %vm549_vm1 = vcmask (!%p238_p2), 261120   ;;  %s1700_s21 = smov (!%p238_p2), 96  }
   0xc   : > { %464 = vmatprep.subr.bf16.mxu0 (!%p238_p2), %v1619_v5  ;;  %1515 = vmatprep.mubr.msk.bf16.mxu1 (!%p238_p2), %vm1699_vm0, %v1698_v20  ;;  %v1637_v41 = vld [vmem:[%s2019_s1 + $0x8] ss:$12 sps:$4 sm:$0xff] (!%p238_p2)   ;;  %v1638_v42 = vld [vmem:[%s2019_s1 + $0x20] ss:$12 sps:$4 sm:$0xff] (!%p238_p2)   ;;  %v1639_v43 = vld [vmem:[%s2019_s1 + $0x38] ss:$12 sps:$4 sm:$0xff] (!%p238_p2)  }
   0xd   : > { %s2027_s25 = smov (!%p269_p3, %s1402_s25), 1  ;;  %v319_v23 = vsub.s32 0, %v1822_v22  ;;  %v323_v25 = vsub.s32 1, %v1822_v22  ;;  %1500 = vmatpush3.bf16.msra.mxu1 %v1637_v41  ;;  %v1640_v44 = vld [vmem:[%s2019_s1 + $0x50] ss:$12 sps:$4 sm:$0xff]   ;;  %vm597_vm2 = vcmask 80896  }
   0xe   : > { %s1460_s17 = sshll.u32 %s2027_s25, 4  ;;  %1501 = vmatprep.subr.bf16.mxu1 %v1698_v20  ;;  %v1641_v45 = vld [vmem:[%s2019_s1 + $0x68] ss:$12 sps:$4 sm:$0xff]   ;;  %v1642_v48 = vld [vmem:[%s2019_s1 + $0x80] ss:$12 sps:$4 sm:$0xff]   ;;  %vm601_vm3 = vcmask 74752  }
   0xf   : > { %465 = vmatpush1.bf16.msra.mxu0 %v1621_v6  ;;  %s273_s15 = scalar_lea.vmem %s2018_s0, %s1460_s17  ;;  %v320_v26 = vrot.slane %v1828_v24, %v319_v23  ;;  %v324_v28 = vrot.slane %v1828_v24, %v323_v25  ;;  %v1643_v49 = vld [vmem:[%s2019_s1 + $0x98] ss:$12 sps:$4 sm:$0xff]   ;;  %v1644_v51 = vld [vmem:[%s2019_s1 + $0xb0] ss:$12 sps:$4 sm:$0xff]   ;;  %s1701_s18 = smov 64   ;;  %v327_v6 = vsub.s32 2, %v1822_v22 }
  0x10   : > { %466 = vmatprep.subr.bf16.mxu0 %v1622_v7  ;;  %v1807_v17 = vld [vmem:[%s273_s15] sm:$0xff]  ;;  %v1809_v18 = vld [vmem:[%s273_s15 + $0x8] sm:$0x3]  ;;  %vm625_vm4 = vcmask 1044480   ;;  %s1702_s29 = smov 32   ;;  %vm1305_vm5 = vcmask 1041408   ;;  %s278_s26 = scalar_lea.vmem %s2025_s7, %s1460_s17 }
  0x11   : > { %v1813_v19 = vpack.c.bf16 %v1809_v18, %v1807_v17  ;;  %1502 = vmatpush3.bf16.msra.mxu1 %v1638_v42  ;;  %v1647_v42 = vld [vmem:[%s2021_s3 + $0x10] sm:$0xff]  }
  0x12   : > { %1503 = vmatprep.subr.bf16.mxu1 %v1698_v20 }
  0x13   : > { %467 = vmatpush1.bf16.msra.mxu0 %v1624_v8 }
  0x14   : > { %468 = vmatprep.subr.bf16.mxu0 %v1625_v9  ;;  %v328_v9 = vrot.slane %v1828_v24, %v327_v6 }
  0x15   : > { %1504 = vmatpush3.bf16.msra.mxu1 %v1639_v43  ;;  %v1648_v43 = vld [vmem:[%s2021_s3 + $0x18] sm:$0xff]  }
  0x16   : > { %1505 = vmatprep.subr.bf16.mxu1 %v1698_v20 }
  0x17   : > { %469 = vmatpush1.bf16.msra.mxu0 %v1627_v10 }
  0x18   : > { %470 = vmatprep.subr.bf16.mxu0 %v1628_v11 }
  0x19   : > { %1506 = vmatpush3.bf16.msra.mxu1 %v1640_v44 }
  0x1a   : > { %1507 = vmatprep.subr.bf16.mxu1 %v1698_v20 }
  0x1b   : > { %471 = vmatpush1.bf16.msra.mxu0 %v1630_v12 }
  0x1c   : > { %472 = vmatprep.subr.bf16.mxu0 %v1631_v13 }
  0x1d   : > { %1508 = vmatpush3.bf16.msra.mxu1 %v1641_v45 }
  0x1e   : > { %1509 = vmatprep.subr.bf16.mxu1 %v1698_v20 }
  0x1f   : > { %473 = vmatpush1.bf16.msra.mxu0 %v1633_v14 }
  0x20   : > { %474 = vmatprep.subr.bf16.mxu0 %v1634_v15 }
  0x21   : > { %1510 = vmatpush3.bf16.msra.mxu1 %v1642_v48 }
  0x22   : > { %1511 = vmatprep.subr.bf16.mxu1 %v1698_v20 }
  0x23   : > { %475 = vmatpush1.bf16.msra.mxu0 %v1636_v16 }
  0x24   : > { %1519 = vmatprep.subr.bf16.mxu0 %v1698_v20 }
  0x25   : > { %1512 = vmatpush3.bf16.msra.mxu1 %v1643_v49 }
  0x26   : > { %493 = vmatmul.mubr.bf16.vlgmr.msra.gmra.mrb[0].mxu0 %v1813_v19  ;;  %1513 = vmatprep.subr.bf16.mxu1 %v1698_v20 }
  0x27   : > { %1521 = vmatprep.mubr.msk.bf16.mxu0 %vm1699_vm0, %v1698_v20 }
  0x29   : > { %1514 = vmatpush3.bf16.msra.mxu1 %v1644_v51 }
  0x2a   : > { %1525 = vmatprep.subr.bf16.mxu1 %v1698_v20 }
  0x2c   : > { %1516 = vmatmul.mubr.bf16.vlgmr.msra.gmra.mrb[0].mxu1 %v1813_v19 }
  0x2d   : > { %1527 = vmatprep.mubr.msk.bf16.mxu1 %vm1699_vm0, %v1698_v20 }
  0xf9   : > { %v494_v27 = vpop.f32.mrb[0].mxu0 }
  0xfa   : > { %v495_v29 = vadd.f32 %v494_v27, %v320_v26  ;;  %v496_v30 = vpop.f32.mrb[1].mxu0 }
  0xfb   : > { %v498_v31 = vpop.f32.mrb[2].mxu0  ;;  %v497_v34 = vadd.f32 %v496_v30, %v324_v28 }
  0xfc   : > { %v499_v32 = vadd.f32 %v498_v31, %v320_v26  ;;  %v500_v33 = vpop.f32.mrb[3].mxu0  ;;  %v544_v36 = vmul.f32 0.17677669, %v495_v29 }
  0xfd   : > { %v501_v35 = vadd.f32 %v500_v33, %v324_v28 }
  0xfe   : > { %v545_v37 = vmul.f32 0.17677669, %v499_v32 }
  0xff   : > { %v1833_v38 = vpack.c.bf16 %v501_v35, %v497_v34  ;;  %v537_v7 = vpop.f32.mrb[0].mxu1 }
 0x100   : > { %v1835_v39 = vpack.c.bf16 %v545_v37, %v544_v36  ;;  %v1517_v8 = vpop.f32.mrb[1].mxu1  ;;  %v538_v12 = vadd.f32 %v537_v7, %v328_v9 }
 0x101   : > { %679 = vrot.lane.b32.xlu0 %v1833_v38, %s1700_s21  ;;  %v554_v40 = vsel %vm549_vm1, %v1833_v38, 0  ;;  %v540_v10 = vpop.f32.mrb[2].mxu1 }
 0x102   : > { %1520 = vmatpush3.bf16.xpose.msra.mxu0 %v554_v40  ;;  %v1518_v11 = vpop.f32.mrb[3].mxu1  ;;  %v541_v13 = vadd.f32 %v540_v10, %v328_v9 }
 0x103   : > { %1531 = vmatprep.subr.bf16.mxu0 %v1698_v20 }
 0x104   : > { %v1896_v14 = vpack.c.bf16 %v541_v13, %v538_v12 }
 0x105   : > { %676 = vrot.lane.b32.xlu0 %v1835_v39, %s1700_s21 }
 0x106   : > { %v627_v22 = vsel %vm625_vm4, %v1896_v14, 0 }
 0x107   : > { %1526 = vmatpush3.bf16.msra.mxu1 %v627_v22 }
 0x108   : > { %1537 = vmatprep.subr.bf16.mxu1 %v1698_v20 }
 0x109   : > { %1522 = vmatmul.mubr.msk.bf16.vlgmr.msra.gmra.mrb[4].mxu0 %vm549_vm1, %v1835_v39 }
 0x10a   : > { %1533 = vmatprep.mubr.msk.bf16.mxu0 %vm1699_vm0, %v1698_v20 }
 0x173   : > { %v680_v46 = vpop.permute.xlu0 %679 }
 0x174   : > { %v685_v47 = vsel %vm549_vm1, %v680_v46, 0 }
 0x175   : > { %1532 = vmatpush3.bf16.xpose.msra.mxu0 %v685_v47 }
 0x176   : > { %1543 = vmatprep.subr.bf16.mxu0 %v1698_v20 }
 0x177   : > { %v677_v50 = vpop.permute.xlu0 %676 }
 0x17c   : > { %1534 = vmatmul.mubr.msk.bf16.vlgmr.msra.gmra.mrb[8].mxu0 %vm549_vm1, %v677_v50 }
 0x17d   : > { %1547 = vmatprep.mubr.msk.bf16.mxu0 %vm1699_vm0, %v1698_v20  ;;  %1544 = vmatpush3.bf16.msra.mxu0 %v1647_v42 }
 0x17e   : > { %1545 = vmatprep.subr.bf16.mxu0 %v1698_v20 }
 0x181   : > { %1546 = vmatpush3.bf16.msra.mxu0 %v1648_v43 }
 0x182   : > { %1559 = vmatprep.subr.bf16.mxu0 %v1698_v20 }
 0x1dc   : > { %v590_v52 = vpop.f32.mrb[4].mxu0 }
 0x1dd   : > { %v1523_v53 = vpop.f32.mrb[5].mxu0  ;;  %v598_v54 = vsel %vm597_vm2, %v590_v52, -inf }
 0x1de   : > { %599 = vmax.xlane.f32.xlu1 %v598_v54  ;;  %v593_v55 = vpop.f32.mrb[6].mxu0  ;;  %v1646_v54 = vld [vmem:[%s2021_s3 + $0x8] sm:$0xff]  }
 0x1df   : > { %v1524_v56 = vpop.f32.mrb[7].mxu0  ;;  %v602_v57 = vsel %vm601_vm3, %v593_v55, -inf }
 0x1e2   : > { %603 = vmax.xlane.f32.xlu1 %v602_v57 }
 0x24f   : > { %v721_v58 = vpop.f32.mrb[8].mxu0 }
 0x250   : > { %v1535_v59 = vpop.f32.mrb[9].mxu0  ;;  %v728_v60 = vsel %vm597_vm2, %v721_v58, -inf }
 0x251   : > { %729 = vmax.xlane.f32.xlu0 %v728_v60  ;;  %v724_v61 = vpop.f32.mrb[10].mxu0 }
 0x252   : > { %v1536_v62 = vpop.f32.mrb[11].mxu0  ;;  %v731_v63 = vsel %vm601_vm3, %v724_v61, -inf }
 0x253   : > { %732 = vmax.xlane.f32.xlu1 %v731_v63 }
 0x267   : > { %920 = vrot.lane.b32.xlu0 %v1833_v38, %s1701_s18 }
 0x26b   : > { %v600_v0 = vpop.xlane.xlu1 %599 }
 0x26c   : > { %v605_v1 = vsub.f32 %v590_v52, %v600_v0  ;;  %v1645_v52 = vld [vmem:[%s2021_s3] sm:$0xff]  }
 0x26e   : > { %v607_v2 = vmul.f32 1.442695, %v605_v1 }
 0x26f   : > { %v604_v3 = vpop.xlane.xlu1 %603 }
 0x270   : > { %1653 = vpow2.f32 %v607_v2  ;;  %v606_v4 = vsub.f32 %v593_v55, %v604_v3 }
 0x272   : > { %v609_v5 = vmul.f32 1.442695, %v606_v4 }
 0x274   : > { %1655 = vpow2.f32 %v609_v5 }
 0x27a   : > { %v1654_v15 = vpop.eup %1653 }
 0x27b   : > { %v611_v16 = vsel %vm597_vm2, %v1654_v15, 0.0 }
 0x27c   : > { %612 = vadd.xlane.f32.xlu1 %v611_v16 }
 0x27e   : > { %v1656_v19 = vpop.eup %1655 }
 0x27f   : > { %v614_v21 = vsel %vm601_vm3, %v1656_v19, 0.0 }
 0x280   : > { %615 = vadd.xlane.f32.xlu1 %v614_v21 }
 0x2de   : > { %v730_v23 = vpop.xlane.xlu0 %729 }
 0x2df   : > { %v734_v24 = vsub.f32 %v721_v58, %v730_v23 }
 0x2e0   : > { %v733_v25 = vpop.xlane.xlu1 %732 }
 0x2e1   : > { %v736_v26 = vmul.f32 1.442695, %v734_v24  ;;  %v735_v27 = vsub.f32 %v724_v61, %v733_v25 }
 0x2e2   : > { %v921_v62 = vpop.permute.xlu0 %920 }
 0x2e3   : > { %1657 = vpow2.f32 %v736_v26  ;;  %v738_v28 = vmul.f32 1.442695, %v735_v27  ;;  %v926_v2 = vsel %vm549_vm1, %v921_v62, 0 }
 0x2e5   : > { %1659 = vpow2.f32 %v738_v28 }
 0x2ed   : > { %v1658_v29 = vpop.eup %1657 }
 0x2ee   : > { %v740_v30 = vsel %vm597_vm2, %v1658_v29, 0.0 }
 0x2ef   : > { %v1660_v31 = vpop.eup %1659  ;;  %741 = vadd.xlane.f32.xlu1 %v740_v30 }
 0x2f0   : > { %v743_v32 = vsel %vm601_vm3, %v1660_v31, 0.0 }
 0x2f3   : > { %744 = vadd.xlane.f32.xlu1 %v743_v32 }
 0x304   : > { %752 = vrot.lane.b32.xlu1 %v1896_v14, %s1700_s21 }
 0x308   : > { %918 = vrot.lane.b32.xlu1 %v1835_v39, %s1701_s18 }
 0x309   : > { %v613_v33 = vpop.xlane.xlu1 %612 }
 0x30a   : > { %1661 = vrcp.f32 %v613_v33 }
 0x30d   : > { %v616_v34 = vpop.xlane.xlu1 %615 }
 0x30e   : > { %1663 = vrcp.f32 %v616_v34 }
 0x314   : > { %v1662_v35 = vpop.eup %1661 }
 0x315   : > { %v619_v37 = vmul.f32 %v1662_v35, %v1654_v15 }
 0x318   : > { %v1664_v36 = vpop.eup %1663 }
 0x319   : > { %v620_v40 = vmul.f32 %v1664_v36, %v1656_v19  ;;  %v1649_v36 = vld [vmem:[%s2021_s3 + $0x20] sm:$0xff]  }
 0x31b   : > { %v621_v41 = vpack.c.bf16 %v620_v40, %v619_v37 }
 0x31d   : > { %1528 = vmatmul.mubr.msk.bf16.vlgmr.msra.gmra.mrb[4].mxu1 %vm597_vm2, %v621_v41 }
 0x31e   : > { %1539 = vmatprep.mubr.msk.bf16.mxu1 %vm1699_vm0, %v1698_v20 }
 0x37c   : > { %v742_v44 = vpop.xlane.xlu1 %741 }
 0x37d   : > { %1665 = vrcp.f32 %v742_v44 }
 0x380   : > { %v745_v45 = vpop.xlane.xlu1 %744 }
 0x381   : > { %1667 = vrcp.f32 %v745_v45 }
 0x384   : > { %v753_v46 = vpop.permute.xlu1 %752 }
 0x385   : > { %v758_v47 = vsel %vm625_vm4, %v753_v46, 0 }
 0x386   : > { %1538 = vmatpush3.bf16.msra.mxu1 %v758_v47  ;;  %v1650_v47 = vld [vmem:[%s2021_s3 + $0x28] sm:$0xff]  }
 0x387   : > { %1551 = vmatprep.subr.bf16.mxu1 %v1698_v20  ;;  %v1666_v48 = vpop.eup %1665 }
 0x388   : > { %v748_v50 = vmul.f32 %v1666_v48, %v1658_v29  ;;  %v919_v3 = vpop.permute.xlu1 %918 }
 0x38b   : > { %v1668_v49 = vpop.eup %1667 }
 0x38c   : > { %v749_v51 = vmul.f32 %v1668_v49, %v1660_v31 }
 0x38e   : > { %v750_v53 = vpack.c.bf16 %v749_v51, %v748_v50 }
 0x390   : > { %1540 = vmatmul.mubr.msk.bf16.vlgmr.msra.gmra.mrb[8].mxu1 %vm597_vm2, %v750_v53 }
 0x391   : > { %1552 = vmatpush3.bf16.msra.mxu1 %v1645_v52  ;;  %1555 = vmatprep.mubr.msk.bf16.mxu1 %vm1699_vm0, %v1698_v20 }
 0x392   : > { %1553 = vmatprep.subr.bf16.mxu1 %v1698_v20 }
 0x395   : > { %1554 = vmatpush3.bf16.msra.mxu1 %v1646_v54 }
 0x396   : > { %1565 = vmatprep.subr.bf16.mxu1 %v1698_v20 }
 0x3f0   : > { %v663_v55 = vpop.f32.mrb[4].mxu1 }
 0x3f1   : > { %v1529_v56 = vpop.f32.mrb[5].mxu1 }
 0x3f2   : > { %v666_v57 = vpop.f32.mrb[6].mxu1 }
 0x3f3   : > { %v670_v58 = vpack.c.bf16 %v666_v57, %v663_v55  ;;  %v1530_v59 = vpop.f32.mrb[7].mxu1 }
 0x3f5   : > { %1556 = vmatmul.mubr.msk.bf16.vlgmr.msra.gmra.mrb[12].mxu1 %vm549_vm1, %v670_v58 }
 0x3f6   : > { %1567 = vmatprep.mubr.msk.bf16.mxu1 %vm1699_vm0, %v1698_v20 }
 0x463   : > { %v794_v60 = vpop.f32.mrb[8].mxu1 }
 0x464   : > { %v1541_v61 = vpop.f32.mrb[9].mxu1 }
 0x465   : > { %v797_v63 = vpop.f32.mrb[10].mxu1 }
 0x466   : > { %v801_v0 = vpack.c.bf16 %v797_v63, %v794_v60  ;;  %v1542_v1 = vpop.f32.mrb[11].mxu1 }
 0x468   : > { %1548 = vmatmul.mubr.msk.bf16.vlgmr.msra.gmra.mrb[12].mxu0 %vm549_vm1, %v801_v0 }
 0x469   : > { %1560 = vmatpush3.bf16.xpose.msra.mxu0 %v926_v2  ;;  %1561 = vmatprep.mubr.msk.bf16.mxu0 %vm1699_vm0, %v1698_v20 }
 0x46a   : > { %1571 = vmatprep.subr.bf16.mxu0 %v1698_v20 }
 0x470   : > { %1562 = vmatmul.mubr.msk.bf16.vlgmr.msra.gmra.mrb[16].mxu0 %vm549_vm1, %v919_v3 }
 0x471   : > { %1575 = vmatprep.mubr.msk.bf16.mxu0 %vm1699_vm0, %v1698_v20  ;;  %1572 = vmatpush3.bf16.msra.mxu0 %v1649_v36  ;;  %v1455_v36 = vld [vmem:[%s2022_s4] ss:$0 sm:$0xff] }
 0x472   : > { %1573 = vmatprep.subr.bf16.mxu0 %v1698_v20 }
 0x475   : > { %1574 = vmatpush3.bf16.msra.mxu0 %v1650_v47 }
 0x476   : > { %1585 = vmatprep.subr.bf16.mxu0 %v1698_v20 }
 0x4c8   : > { %v911_v4 = vpop.f32.mrb[12].mxu1 }
 0x4c9   : > { %v1557_v5 = vpop.f32.mrb[13].mxu1 }
 0x4ca   : > { %v914_v6 = vpop.f32.mrb[14].mxu1 }
 0x4cb   : > { %v1558_v7 = vpop.f32.mrb[15].mxu1 }
 0x53b   : > { %v855_v8 = vpop.f32.mrb[12].mxu0 }
 0x53c   : > { %v1944_v9 = vadd.f32 %v911_v4, %v855_v8  ;;  %v1549_v10 = vpop.f32.mrb[13].mxu0 }
 0x53d   : > { %v858_v11 = vpop.f32.mrb[14].mxu0 }
 0x53e   : > { %v1946_v12 = vadd.f32 %v914_v6, %v858_v11  ;;  %v1550_v13 = vpop.f32.mrb[15].mxu0 }
 0x543   : > { %v962_v15 = vpop.f32.mrb[16].mxu0 }
 0x544   : > { %v1563_v16 = vpop.f32.mrb[17].mxu0  ;;  %v969_v19 = vsel %vm597_vm2, %v962_v15, -inf }
 0x545   : > { %970 = vmax.xlane.f32.xlu1 %v969_v19  ;;  %v965_v21 = vpop.f32.mrb[18].mxu0 }
 0x546   : > { %v1564_v22 = vpop.f32.mrb[19].mxu0  ;;  %v972_v23 = vsel %vm601_vm3, %v965_v21, -inf }
 0x547   : > { %973 = vmax.xlane.f32.xlu0 %v972_v23 }
 0x55d   : > { %992 = vrot.lane.b32.xlu0 %v1896_v14, %s1701_s18 }
 0x5d2   : > { %v971_v24 = vpop.xlane.xlu1 %970 }
 0x5d3   : > { %v975_v25 = vsub.f32 %v962_v15, %v971_v24 }
 0x5d4   : > { %v974_v26 = vpop.xlane.xlu0 %973 }
 0x5d5   : > { %v977_v27 = vmul.f32 1.442695, %v975_v25  ;;  %v976_v28 = vsub.f32 %v965_v21, %v974_v26 }
 0x5d7   : > { %1669 = vpow2.f32 %v977_v27  ;;  %v979_v29 = vmul.f32 1.442695, %v976_v28 }
 0x5d8   : > { %v993_v30 = vpop.permute.xlu0 %992 }
 0x5d9   : > { %1671 = vpow2.f32 %v979_v29  ;;  %v998_v31 = vsel %vm625_vm4, %v993_v30, 0 }
 0x5da   : > { %1566 = vmatpush3.bf16.msra.mxu1 %v998_v31 }
 0x5db   : > { %1579 = vmatprep.subr.bf16.mxu1 %v1698_v20 }
 0x5e1   : > { %v1670_v32 = vpop.eup %1669 }
 0x5e2   : > { %v981_v33 = vsel %vm597_vm2, %v1670_v32, 0.0 }
 0x5e3   : > { %v1672_v34 = vpop.eup %1671  ;;  %982 = vadd.xlane.f32.xlu1 %v981_v33 }
 0x5e4   : > { %v984_v35 = vsel %vm601_vm3, %v1672_v34, 0.0 }
 0x5e7   : > { %985 = vadd.xlane.f32.xlu1 %v984_v35 }
 0x5f8   : > { %1106 = vrot.lane.b32.xlu1 %v1833_v38, %s1702_s29 }
 0x5fc   : > { %1104 = vrot.lane.b32.xlu1 %v1835_v39, %s1702_s29 }
 0x670   : > { %v983_v37 = vpop.xlane.xlu1 %982 }
 0x671   : > { %1673 = vrcp.f32 %v983_v37 }
 0x674   : > { %v986_v40 = vpop.xlane.xlu1 %985 }
 0x675   : > { %1675 = vrcp.f32 %v986_v40 }
 0x678   : > { %v1107_v45 = vpop.permute.xlu1 %1106 }
 0x679   : > { %v1112_v46 = vsel %vm549_vm1, %v1107_v45, 0 }
 0x67b   : > { %v1674_v41 = vpop.eup %1673 }
 0x67c   : > { %v989_v43 = vmul.f32 %v1674_v41, %v1670_v32  ;;  %v1105_v39 = vpop.permute.xlu1 %1104 }
 0x67f   : > { %v1676_v42 = vpop.eup %1675 }
 0x680   : > { %v990_v44 = vmul.f32 %v1676_v42, %v1672_v34 }
 0x682   : > { %v991_v38 = vpack.c.bf16 %v990_v44, %v989_v43 }
 0x684   : > { %1568 = vmatmul.mubr.msk.bf16.vlgmr.msra.gmra.mrb[16].mxu1 %vm597_vm2, %v991_v38 }
 0x685   : > { %1580 = vmatpush3.bf16.xpose.msra.mxu1 %v1112_v46  ;;  %1581 = vmatprep.mubr.msk.bf16.mxu1 %vm1699_vm0, %v1698_v20 }
 0x686   : > { %1591 = vmatprep.subr.bf16.mxu1 %v1698_v20 }
 0x68c   : > { %1582 = vmatmul.mubr.msk.bf16.vlgmr.msra.gmra.mrb[20].mxu1 %vm549_vm1, %v1105_v39 }
 0x68d   : > { %1595 = vmatprep.mubr.msk.bf16.mxu1 %vm1699_vm0, %v1698_v20 }
 0x757   : > { %v1034_v48 = vpop.f32.mrb[16].mxu1 }
 0x758   : > { %v1569_v49 = vpop.f32.mrb[17].mxu1 }
 0x759   : > { %v1037_v50 = vpop.f32.mrb[18].mxu1 }
 0x75a   : > { %v1041_v51 = vpack.c.bf16 %v1037_v50, %v1034_v48  ;;  %v1570_v52 = vpop.f32.mrb[19].mxu1 }
 0x75c   : > { %1576 = vmatmul.mubr.msk.bf16.vlgmr.msra.gmra.mrb[20].mxu0 %vm549_vm1, %v1041_v51 }
 0x75d   : > { %1587 = vmatprep.mubr.msk.bf16.mxu0 %vm1699_vm0, %v1698_v20 }
 0x75f   : > { %v1148_v53 = vpop.f32.mrb[20].mxu1 }
 0x760   : > { %v1583_v54 = vpop.f32.mrb[21].mxu1  ;;  %v1155_v55 = vsel %vm597_vm2, %v1148_v53, -inf }
 0x761   : > { %1156 = vmax.xlane.f32.xlu0 %v1155_v55  ;;  %v1151_v56 = vpop.f32.mrb[22].mxu1  ;;  %v1456_v55 = vld [vmem:[%s2023_s5] ss:$0 sm:$0xff] }
 0x762   : > { %v1584_v57 = vpop.f32.mrb[23].mxu1  ;;  %v1158_v58 = vsel %vm601_vm3, %v1151_v56, -inf }
 0x763   : > { %1159 = vmax.xlane.f32.xlu1 %v1158_v58  ;;  %v1457_v57 = vld [vmem:[%s2024_s6] ss:$0 sm:$0xff] }
 0x774   : > { %1178 = vrot.lane.b32.xlu1 %v1896_v14, %s1702_s29  ;;  %v1651_v14 = vld [vmem:[%s2021_s3 + $0x30] sm:$0xff]  }
 0x775   : > { %1592 = vmatpush3.bf16.msra.mxu1 %v1651_v14 }
 0x776   : > { %1593 = vmatprep.subr.bf16.mxu1 %v1698_v20  ;;  %v1652_v20 = vld [vmem:[%s2021_s3 + $0x38] sm:$0xff]  }
 0x779   : > { %1594 = vmatpush3.bf16.msra.mxu1 %v1652_v20 }
 0x7ee   : > { %v1157_v59 = vpop.xlane.xlu0 %1156 }
 0x7ef   : > { %v1161_v60 = vsub.f32 %v1148_v53, %v1157_v59 }
 0x7f0   : > { %v1160_v61 = vpop.xlane.xlu1 %1159 }
 0x7f1   : > { %v1163_v62 = vmul.f32 1.442695, %v1161_v60  ;;  %v1162_v63 = vsub.f32 %v1151_v56, %v1160_v61 }
 0x7f3   : > { %1677 = vpow2.f32 %v1163_v62  ;;  %v1165_v0 = vmul.f32 1.442695, %v1162_v63 }
 0x7f4   : > { %v1179_v1 = vpop.permute.xlu1 %1178 }
 0x7f5   : > { %1679 = vpow2.f32 %v1165_v0  ;;  %v1184_v2 = vsel %vm625_vm4, %v1179_v1, 0 }
 0x7f6   : > { %1586 = vmatpush3.bf16.msra.mxu0 %v1184_v2 }
 0x7fd   : > { %v1678_v3 = vpop.eup %1677 }
 0x7fe   : > { %v1167_v4 = vsel %vm597_vm2, %v1678_v3, 0.0 }
 0x7ff   : > { %v1680_v5 = vpop.eup %1679  ;;  %1168 = vadd.xlane.f32.xlu0 %v1167_v4 }
 0x800   : > { %v1170_v6 = vsel %vm601_vm3, %v1680_v5, 0.0 }
 0x803   : > { %1171 = vadd.xlane.f32.xlu0 %v1170_v6 }
 0x82f   : > { %v1095_v7 = vpop.f32.mrb[20].mxu0 }
 0x830   : > { %v1102_v8 = vadd.f32 %v1095_v7, %v1944_v9  ;;  %v1577_v10 = vpop.f32.mrb[21].mxu0 }
 0x831   : > { %v1098_v11 = vpop.f32.mrb[22].mxu0 }
 0x832   : > { %v1103_v13 = vadd.f32 %v1098_v11, %v1946_v12  ;;  %v1578_v15 = vpop.f32.mrb[23].mxu0 }
 0x88c   : > { %v1169_v16 = vpop.xlane.xlu0 %1168 }
 0x88d   : > { %1681 = vrcp.f32 %v1169_v16 }
 0x890   : > { %v1172_v19 = vpop.xlane.xlu0 %1171 }
 0x891   : > { %1683 = vrcp.f32 %v1172_v19 }
 0x897   : > { %v1682_v21 = vpop.eup %1681 }
 0x898   : > { %v1175_v23 = vmul.f32 %v1682_v21, %v1678_v3 }
 0x89b   : > { %v1684_v22 = vpop.eup %1683 }
 0x89c   : > { %v1176_v24 = vmul.f32 %v1684_v22, %v1680_v5 }
 0x89e   : > { %v1177_v25 = vpack.c.bf16 %v1176_v24, %v1175_v23 }
 0x8a0   : > { %1588 = vmatmul.mubr.msk.bf16.vlgmr.msra.gmra.mrb[24].mxu0 %vm597_vm2, %v1177_v25 }
 0x973   : > { %v1220_v9 = vpop.f32.mrb[24].mxu0 }
 0x974   : > { %v1589_v26 = vpop.f32.mrb[25].mxu0 }
 0x975   : > { %v1223_v12 = vpop.f32.mrb[26].mxu0 }
 0x976   : > { %v1227_v27 = vpack.c.bf16 %v1223_v12, %v1220_v9  ;;  %v1590_v28 = vpop.f32.mrb[27].mxu0 }
 0x978   : > { %1596 = vmatmul.mubr.msk.bf16.vlgmr.msra.gmra.mrb[24].mxu1 %vm549_vm1, %v1227_v27 }
 0xa4b   : > { %v1281_v29 = vpop.f32.mrb[24].mxu1 }
 0xa4c   : > { %v1288_v30 = vadd.f32 %v1281_v29, %v1102_v8  ;;  %v1597_v31 = vpop.f32.mrb[25].mxu1 }
 0xa4d   : > { %v1284_v32 = vpop.f32.mrb[26].mxu1 }
 0xa4e   : > { %v1289_v33 = vadd.f32 %v1284_v32, %v1103_v13  ;;  %v1598_v34 = vpop.f32.mrb[27].mxu1  ;;  %v1290_v40 = vadd.f32 %v1288_v30, %v1807_v17 }
 0xa50   : > { %v1291_v35 = vadd.f32 %v1289_v33, %v1809_v18  ;;  %v1299_v42 = vadd.f32 %v1455_v36, %v1290_v40 }
 0xa52   : > { %v1300_v37 = vadd.f32 %v1455_v36, %v1291_v35 }
 0xa54   : > { %v1306_v41 = vsel %vm1305_vm5, %v1300_v37, 0.0 }
 0xa55   : > { %1307 = vadd.xlane.f32.xlu0 %v1306_v41 }
 0xa59   : > { %1303 = vadd.xlane.f32.xlu0 %v1299_v42 }
 0xae2   : > { %v1308_v43 = vpop.xlane.xlu0 %1307 }
 0xae3   : > { %v1311_v44 = vmul.f32 0.0078125, %v1308_v43 }
 0xae5   : > { %v1313_v46 = vsub.f32 %v1300_v37, %v1311_v44 }
 0xae6   : > { %v1304_v45 = vpop.xlane.xlu0 %1303 }
 0xae7   : > { %v1310_v38 = vmul.f32 0.0078125, %v1304_v45  ;;  %v1315_v47 = vmul.f32 %v1313_v46, %v1313_v46 }
 0xae9   : > { %v1312_v39 = vsub.f32 %v1299_v42, %v1310_v38  ;;  %v1318_v48 = vsel %vm1305_vm5, %v1315_v47, 0.0 }
 0xaeb   : > { %v1314_v18 = vmul.f32 %v1312_v39, %v1312_v39 }
 0xaed   : > { %1316 = vadd.xlane.f32.xlu0 %v1314_v18 }
 0xaf1   : > { %1319 = vadd.xlane.f32.xlu0 %v1318_v48 }
 0xb7a   : > { %v1317_v49 = vpop.xlane.xlu0 %1316 }
 0xb7b   : > { %v1321_v17 = vmul.f32 0.0078125, %v1317_v49 }
 0xb7d   : > { %v1323_v50 = vadd.f32 1e-05, %v1321_v17 }
 0xb7e   : > { %v1320_v51 = vpop.xlane.xlu0 %1319 }
 0xb7f   : > { %1685 = vrsqrt.f32 %v1323_v50  ;;  %v1322_v52 = vmul.f32 0.0078125, %v1320_v51 }
 0xb81   : > { %v1324_v53 = vadd.f32 1e-05, %v1322_v52 }
 0xb83   : > { %1687 = vrsqrt.f32 %v1324_v53 }
 0xb89   : > { %v1686_v54 = vpop.eup %1685 }
 0xb8a   : > { %v1327_v56 = vmul.f32 %v1686_v54, %v1312_v39 }
 0xb8c   : > { %v1335_v58 = vmul.f32 %v1456_v55, %v1327_v56 }
 0xb8d   : > { %v1688_v59 = vpop.eup %1687 }
 0xb8e   : > { %v1343_v60 = vadd.f32 %v1457_v57, %v1335_v58  ;;  %v1328_v61 = vmul.f32 %v1688_v59, %v1313_v46 }
 0xb90   : > { %1345 = vst [vmem:[%s278_s26] sm:$0xff] %v1343_v60  ;;  %v1336_v62 = vmul.f32 %v1456_v55, %v1328_v61 }
 0xb92   : > { %v1344_v63 = vadd.f32 %v1457_v57, %v1336_v62 }
 0xb94   : > { %1346 = vst [vmem:[%s278_s26 + $0x8] sm:$0x3] %v1344_v63 }
 0xb95 PF: > { %s17_s24 = sadd.s32 1, %s1695_s24  }
 0xb96   : > { %p14_p4 = scmp.ge.s32.totalorder %s17_s24, 4  }
 0xb98   :  { %16 = sbr.rel (!%p14_p4) target bundleno = 1 (0x1), region = 78 }

// kernel: transformer_forward.17
= control target key start
LH: loop header
LB: loop body
LE: loop exit
PB: predicated region body
PF: predicated region fallthrough
CT: control target
= control target key end

     0   :  { %s1631_s24 = smov 0   ;;  %s1887_s0 = inlined_call_operand.vmem [shape: f32[2,8,128], index: 0, kind: input, shape index: {}]   ;;  %s1888_s1 = inlined_call_operand.vmem [shape: bf16[128,384], index: 1, kind: input, shape index: {}]   ;;  %s1889_s2 = inlined_call_operand.vmem [shape: f32[1,384], index: 2, kind: input, shape index: {}]   ;;  %s1890_s3 = inlined_call_operand.vmem [shape: bf16[128,128], index: 3, kind: input, shape index: {}]   ;;  %s1891_s4 = inlined_call_operand.vmem [shape: f32[1,128], index: 4, kind: input, shape index: {}]   ;;  %s1892_s5 = inlined_call_operand.vmem [shape: f32[1,128], index: 5, kind: input, shape index: {}]   ;;  %s1893_s6 = inlined_call_operand.vmem [shape: f32[1,128], index: 6, kind: input, shape index: {}]   ;;  %s1894_s7 = inlined_call_operand.vmem [shape: f32[2,8,128], index: 7, kind: output, shape index: {}]  }
   0x1 LB: > { %s1312_s25 = sadd.s32 4294967295, %s1583_s24   ;;  %p1316_p0 = scmp.ge.s32.totalorder %s1583_s24, 1  ;;  %s1583_s24 = sphi %s1631_s24, %s17_s24  }
   0x2   : > { %p236_p1 = scmp.lt.s32.totalorder %s1583_s24, 3 }
   0x4   : > { %p237_p2 = pnand %p1316_p0, %p236_p1 }
   0x5   : > { %v1519_v0 = vld [vmem:[%s1888_s1 + $0x4] ss:$12 sps:$4 sm:$0xff] (!%p237_p2)   ;;  %v1521_v1 = vld [vmem:[%s1888_s1] ss:$12 sps:$4 sm:$0xff] (!%p237_p2)   ;;  %v1585_v2 = vmov (!%p237_p2), 0   ;;  %p266_p3 = scmp.lt.s32.totalorder (!%p237_p2), %s1312_s25, 1  ;;  %v311_v20 = vlaneseq (!%p237_p2) }
   0x6   : > { %240 = sbr.rel (%p237_p2) target bundleno = 2936 (0xb78), region = 48  ;;  %486 = vmatprep.mubr.bf16.mxu0 (!%p237_p2), %v1585_v2  ;;  %454 = vmatprep.subr.bf16.mxu0 (!%p237_p2), %v1519_v0  ;;  %v1522_v3 = vld [vmem:[%s1888_s1 + $0x1c] ss:$12 sps:$4 sm:$0xff] (!%p237_p2)   ;;  %v1524_v4 = vld [vmem:[%s1888_s1 + $0x18] ss:$12 sps:$4 sm:$0xff] (!%p237_p2)   ;;  %v1586_v19 = vmov (!%p237_p2), 0.0  }
   0x7   : > { %455 = vmatpush1.bf16.msra.mxu0 (!%p237_p2), %v1521_v1  ;;  %v1525_v5 = vld [vmem:[%s1888_s1 + $0x34] ss:$12 sps:$4 sm:$0xff] (!%p237_p2)   ;;  %v1527_v6 = vld [vmem:[%s1888_s1 + $0x30] ss:$12 sps:$4 sm:$0xff] (!%p237_p2)   ;;  %v1528_v7 = vld [vmem:[%s1888_s1 + $0x4c] ss:$12 sps:$4 sm:$0xff] (!%p237_p2)   ;;  %1405 = vmatprep.subr.bf16.mxu1 (!%p237_p2), %v1586_v19 }
   0x8   : > { %456 = vmatprep.subr.bf16.mxu0 (!%p237_p2), %v1522_v3  ;;  %v1530_v8 = vld [vmem:[%s1888_s1 + $0x48] ss:$12 sps:$4 sm:$0xff] (!%p237_p2)   ;;  %v1531_v9 = vld [vmem:[%s1888_s1 + $0x64] ss:$12 sps:$4 sm:$0xff] (!%p237_p2)   ;;  %v1533_v10 = vld [vmem:[%s1888_s1 + $0x60] ss:$12 sps:$4 sm:$0xff] (!%p237_p2)  }
   0x9   : > { %v1534_v11 = vld [vmem:[%s1888_s1 + $0x7c] ss:$12 sps:$4 sm:$0xff] (!%p237_p2)   ;;  %v1536_v12 = vld [vmem:[%s1888_s1 + $0x78] ss:$12 sps:$4 sm:$0xff] (!%p237_p2)   ;;  %v1537_v13 = vld [vmem:[%s1888_s1 + $0x94] ss:$12 sps:$4 sm:$0xff] (!%p237_p2)  }
   0xa   : > { %v1539_v14 = vld [vmem:[%s1888_s1 + $0x90] ss:$12 sps:$4 sm:$0xff] (!%p237_p2)   ;;  %v1540_v15 = vld [vmem:[%s1888_s1 + $0xac] ss:$12 sps:$4 sm:$0xff] (!%p237_p2)   ;;  %v1542_v16 = vld [vmem:[%s1888_s1 + $0xa8] ss:$12 sps:$4 sm:$0xff] (!%p237_p2)  }
   0xb   : > { %457 = vmatpush1.bf16.msra.mxu0 (!%p237_p2), %v1524_v4  ;;  %vm1587_vm0 = vmmov (!%p237_p2), 0   ;;  %v1708_v21 = vshrl.u32 (!%p237_p2), %v311_v20, 7  ;;  %v1714_v23 = vld [vmem:[%s1889_s2] sm:$0x7] (!%p237_p2)  ;;  %vm539_vm1 = vcmask (!%p237_p2), 261120   ;;  %s1588_s21 = smov (!%p237_p2), 96  }
   0xc   : > { %458 = vmatprep.subr.bf16.mxu0 (!%p237_p2), %v1525_v5  ;;  %1421 = vmatprep.mubr.msk.bf16.mxu1 (!%p237_p2), %vm1587_vm0, %v1586_v19  ;;  %v1543_v37 = vld [vmem:[%s1888_s1 + $0x8] ss:$12 sps:$4 sm:$0xff] (!%p237_p2)   ;;  %v1544_v38 = vld [vmem:[%s1888_s1 + $0x20] ss:$12 sps:$4 sm:$0xff] (!%p237_p2)   ;;  %v1545_v39 = vld [vmem:[%s1888_s1 + $0x38] ss:$12 sps:$4 sm:$0xff] (!%p237_p2)  }
   0xd   : > { %s1896_s25 = smov (!%p266_p3, %s1312_s25), 1  ;;  %v313_v22 = vsub.s32 0, %v1708_v21  ;;  %v317_v24 = vsub.s32 1, %v1708_v21  ;;  %1406 = vmatpush3.bf16.msra.mxu1 %v1543_v37  ;;  %v1546_v40 = vld [vmem:[%s1888_s1 + $0x50] ss:$12 sps:$4 sm:$0xff]   ;;  %vm586_vm2 = vcmask 64512  }
   0xe   : > { %s1317_s19 = sshll.u32 %s1896_s25, 3  ;;  %1407 = vmatprep.subr.bf16.mxu1 %v1586_v19  ;;  %v1547_v41 = vld [vmem:[%s1888_s1 + $0x68] ss:$12 sps:$4 sm:$0xff]   ;;  %v1548_v42 = vld [vmem:[%s1888_s1 + $0x80] ss:$12 sps:$4 sm:$0xff]   ;;  %v321_v3 = vsub.s32 2, %v1708_v21 }
   0xf   : > { %459 = vmatpush1.bf16.msra.mxu0 %v1527_v6  ;;  %s269_s15 = scalar_lea.vmem %s1887_s0, %s1317_s19  ;;  %v314_v25 = vrot.slane %v1714_v23, %v313_v22  ;;  %v318_v26 = vrot.slane %v1714_v23, %v317_v24  ;;  %v1549_v45 = vld [vmem:[%s1888_s1 + $0x98] ss:$12 sps:$4 sm:$0xff]   ;;  %v1550_v46 = vld [vmem:[%s1888_s1 + $0xb0] ss:$12 sps:$4 sm:$0xff]   ;;  %s1589_s17 = smov 64   ;;  %vm602_vm3 = vcmask 1043456  }
  0x10   : > { %460 = vmatprep.subr.bf16.mxu0 %v1528_v7  ;;  %v1695_v17 = vld [vmem:[%s269_s15] sm:$0xff]  ;;  %v322_v4 = vrot.slane %v1714_v23, %v321_v3  ;;  %v1554_v20 = vld [vmem:[%s1890_s3 + $0x18] sm:$0xff]   ;;  %s1590_s29 = smov 32   ;;  %s273_s26 = scalar_lea.vmem %s1894_s7, %s1317_s19 }
  0x11   : > { %v1699_v18 = vpack.c.bf16 %v1695_v17, %v1695_v17  ;;  %1408 = vmatpush3.bf16.msra.mxu1 %v1544_v38 }
  0x12   : > { %1409 = vmatprep.subr.bf16.mxu1 %v1586_v19 }
  0x13   : > { %461 = vmatpush1.bf16.msra.mxu0 %v1530_v8 }
  0x14   : > { %462 = vmatprep.subr.bf16.mxu0 %v1531_v9 }
  0x15   : > { %1410 = vmatpush3.bf16.msra.mxu1 %v1545_v39 }
  0x16   : > { %1411 = vmatprep.subr.bf16.mxu1 %v1586_v19 }
  0x17   : > { %463 = vmatpush1.bf16.msra.mxu0 %v1533_v10 }
  0x18   : > { %464 = vmatprep.subr.bf16.mxu0 %v1534_v11 }
  0x19   : > { %1412 = vmatpush3.bf16.msra.mxu1 %v1546_v40 }
  0x1a   : > { %1413 = vmatprep.subr.bf16.mxu1 %v1586_v19 }
  0x1b   : > { %465 = vmatpush1.bf16.msra.mxu0 %v1536_v12 }
  0x1c   : > { %466 = vmatprep.subr.bf16.mxu0 %v1537_v13 }
  0x1d   : > { %1414 = vmatpush3.bf16.msra.mxu1 %v1547_v41 }
  0x1e   : > { %1415 = vmatprep.subr.bf16.mxu1 %v1586_v19 }
  0x1f   : > { %467 = vmatpush1.bf16.msra.mxu0 %v1539_v14 }
  0x20   : > { %468 = vmatprep.subr.bf16.mxu0 %v1540_v15 }
  0x21   : > { %1416 = vmatpush3.bf16.msra.mxu1 %v1548_v42 }
  0x22   : > { %1417 = vmatprep.subr.bf16.mxu1 %v1586_v19 }
  0x23   : > { %469 = vmatpush1.bf16.msra.mxu0 %v1542_v16 }
  0x24   : > { %1425 = vmatprep.subr.bf16.mxu0 %v1586_v19 }
  0x25   : > { %1418 = vmatpush3.bf16.msra.mxu1 %v1549_v45 }
  0x26   : > { %487 = vmatmul.mubr.bf16.vlgmr.msra.gmra.mrb[0].mxu0 %v1699_v18  ;;  %1419 = vmatprep.subr.bf16.mxu1 %v1586_v19 }
  0x27   : > { %1427 = vmatprep.mubr.msk.bf16.mxu0 %vm1587_vm0, %v1586_v19 }
  0x29   : > { %1420 = vmatpush3.bf16.msra.mxu1 %v1550_v46 }
  0x2a   : > { %1431 = vmatprep.subr.bf16.mxu1 %v1586_v19 }
  0x2c   : > { %1422 = vmatmul.mubr.bf16.vlgmr.msra.gmra.mrb[0].mxu1 %v1699_v18  ;;  %v1553_v18 = vld [vmem:[%s1890_s3 + $0x10] sm:$0xff]  }
  0x2d   : > { %1433 = vmatprep.mubr.msk.bf16.mxu1 %vm1587_vm0, %v1586_v19 }
  0xf9   : > { %v488_v27 = vpop.f32.mrb[0].mxu0 }
  0xfa   : > { %v489_v28 = vadd.f32 %v488_v27, %v314_v25  ;;  %v490_v29 = vpop.f32.mrb[1].mxu0 }
  0xfb   : > { %v491_v30 = vadd.f32 %v490_v29, %v318_v26  ;;  %v492_v31 = vpop.f32.mrb[2].mxu0  ;;  %v1551_v26 = vld [vmem:[%s1890_s3] sm:$0xff]  }
  0xfc   : > { %v493_v32 = vpop.f32.mrb[3].mxu0  ;;  %v535_v33 = vmul.f32 0.17677669, %v489_v28  ;;  %v1552_v28 = vld [vmem:[%s1890_s3 + $0x8] sm:$0xff]  }
  0xfd   : > { %v1719_v34 = vpack.c.bf16 %v491_v30, %v491_v30 }
  0xfe   : > { %v1725_v36 = vpack.c.bf16 %v535_v33, %v535_v33 }
  0xff   : > { %655 = vrot.lane.b32.xlu0 %v1719_v34, %s1588_s21  ;;  %v544_v35 = vsel %vm539_vm1, %v1719_v34, 0  ;;  %v529_v61 = vpop.f32.mrb[0].mxu1 }
 0x100   : > { %1426 = vmatpush3.bf16.xpose.msra.mxu0 %v544_v35  ;;  %v1423_v62 = vpop.f32.mrb[1].mxu1  ;;  %v530_v5 = vadd.f32 %v529_v61, %v322_v4 }
 0x101   : > { %1437 = vmatprep.subr.bf16.mxu0 %v1586_v19  ;;  %v532_v63 = vpop.f32.mrb[2].mxu1 }
 0x102   : > { %v1424_v0 = vpop.f32.mrb[3].mxu1  ;;  %v1779_v6 = vpack.c.bf16 %v530_v5, %v530_v5 }
 0x103   : > { %652 = vrot.lane.b32.xlu0 %v1725_v36, %s1588_s21 }
 0x104   : > { %v604_v7 = vsel %vm602_vm3, %v1779_v6, 0 }
 0x105   : > { %1432 = vmatpush3.bf16.msra.mxu1 %v604_v7 }
 0x106   : > { %1443 = vmatprep.subr.bf16.mxu1 %v1586_v19 }
 0x107   : > { %1428 = vmatmul.mubr.msk.bf16.vlgmr.msra.gmra.mrb[4].mxu0 %vm539_vm1, %v1725_v36 }
 0x108   : > { %1439 = vmatprep.mubr.msk.bf16.mxu0 %vm1587_vm0, %v1586_v19 }
 0x171   : > { %v656_v43 = vpop.permute.xlu0 %655 }
 0x172   : > { %v661_v44 = vsel %vm539_vm1, %v656_v43, 0 }
 0x173   : > { %1438 = vmatpush3.bf16.xpose.msra.mxu0 %v661_v44 }
 0x174   : > { %1449 = vmatprep.subr.bf16.mxu0 %v1586_v19 }
 0x175   : > { %v653_v47 = vpop.permute.xlu0 %652 }
 0x17a   : > { %1440 = vmatmul.mubr.msk.bf16.vlgmr.msra.gmra.mrb[8].mxu0 %vm539_vm1, %v653_v47 }
 0x17b   : > { %1453 = vmatprep.mubr.msk.bf16.mxu0 %vm1587_vm0, %v1586_v19  ;;  %1450 = vmatpush3.bf16.msra.mxu0 %v1553_v18 }
 0x17c   : > { %1451 = vmatprep.subr.bf16.mxu0 %v1586_v19 }
 0x17f   : > { %1452 = vmatpush3.bf16.msra.mxu0 %v1554_v20 }
 0x180   : > { %1465 = vmatprep.subr.bf16.mxu0 %v1586_v19 }
 0x1da   : > { %v580_v48 = vpop.f32.mrb[4].mxu0 }
 0x1db   : > { %v1429_v49 = vpop.f32.mrb[5].mxu0  ;;  %v587_v50 = vsel %vm586_vm2, %v580_v48, -inf }
 0x1dc   : > { %588 = vmax.xlane.f32.xlu1 %v587_v50  ;;  %v583_v51 = vpop.f32.mrb[6].mxu0 }
 0x1dd   : > { %v1430_v52 = vpop.f32.mrb[7].mxu0 }
 0x24d   : > { %v697_v53 = vpop.f32.mrb[8].mxu0 }
 0x24e   : > { %v1441_v54 = vpop.f32.mrb[9].mxu0  ;;  %v703_v55 = vsel %vm586_vm2, %v697_v53, -inf }
 0x24f   : > { %704 = vmax.xlane.f32.xlu1 %v703_v55  ;;  %v700_v56 = vpop.f32.mrb[10].mxu0 }
 0x250   : > { %v1442_v57 = vpop.f32.mrb[11].mxu0 }
 0x269   : > { %v589_v58 = vpop.xlane.xlu1 %588 }
 0x26a   : > { %v590_v59 = vsub.f32 %v580_v48, %v589_v58 }
 0x26c   : > { %v591_v60 = vmul.f32 1.442695, %v590_v59 }
 0x26e   : > { %1559 = vpow2.f32 %v591_v60 }
 0x278   : > { %v1560_v1 = vpop.eup %1559 }
 0x279   : > { %v593_v2 = vsel %vm586_vm2, %v1560_v1, 0.0 }
 0x27a   : > { %594 = vadd.xlane.f32.xlu0 %v593_v2 }
 0x290   : > { %941 = vrot.lane.b32.xlu0 %v1779_v6, %s1589_s17 }
 0x2dc   : > { %v705_v8 = vpop.xlane.xlu1 %704 }
 0x2dd   : > { %v706_v9 = vsub.f32 %v697_v53, %v705_v8 }
 0x2df   : > { %v707_v10 = vmul.f32 1.442695, %v706_v9 }
 0x2e1   : > { %1561 = vpow2.f32 %v707_v10 }
 0x2eb   : > { %v1562_v11 = vpop.eup %1561 }
 0x2ec   : > { %v709_v12 = vsel %vm586_vm2, %v1562_v11, 0.0 }
 0x2ed   : > { %710 = vadd.xlane.f32.xlu1 %v709_v12 }
 0x2fe   : > { %716 = vrot.lane.b32.xlu1 %v1779_v6, %s1588_s21 }
 0x302   : > { %881 = vrot.lane.b32.xlu1 %v1719_v34, %s1589_s17 }
 0x306   : > { %879 = vrot.lane.b32.xlu1 %v1725_v36, %s1589_s17 }
 0x307   : > { %v595_v13 = vpop.xlane.xlu0 %594 }
 0x308   : > { %1563 = vrcp.f32 %v595_v13 }
 0x30b   : > { %v942_v29 = vpop.permute.xlu0 %941 }
 0x30c   : > { %v947_v35 = vsel %vm602_vm3, %v942_v29, 0 }
 0x312   : > { %v1564_v14 = vpop.eup %1563 }
 0x313   : > { %v597_v15 = vmul.f32 %v1564_v14, %v1560_v1  ;;  %v1555_v1 = vld [vmem:[%s1890_s3 + $0x20] sm:$0xff]  }
 0x315   : > { %v598_v16 = vpack.c.bf16 %v597_v15, %v597_v15 }
 0x317   : > { %1434 = vmatmul.mubr.msk.bf16.vlgmr.msra.gmra.mrb[4].mxu1 %vm586_vm2, %v598_v16 }
 0x318   : > { %1445 = vmatprep.mubr.msk.bf16.mxu1 %vm1587_vm0, %v1586_v19 }
 0x37a   : > { %v711_v21 = vpop.xlane.xlu1 %710 }
 0x37b   : > { %1565 = vrcp.f32 %v711_v21 }
 0x37e   : > { %v717_v22 = vpop.permute.xlu1 %716 }
 0x37f   : > { %v722_v23 = vsel %vm602_vm3, %v717_v22, 0 }
 0x380   : > { %1444 = vmatpush3.bf16.msra.mxu1 %v722_v23 }
 0x381   : > { %1457 = vmatprep.subr.bf16.mxu1 %v1586_v19 }
 0x382   : > { %v882_v38 = vpop.permute.xlu1 %881 }
 0x383   : > { %v887_v43 = vsel %vm539_vm1, %v882_v38, 0 }
 0x385   : > { %v1566_v24 = vpop.eup %1565 }
 0x386   : > { %v713_v25 = vmul.f32 %v1566_v24, %v1562_v11  ;;  %v880_v45 = vpop.permute.xlu1 %879 }
 0x388   : > { %v714_v27 = vpack.c.bf16 %v713_v25, %v713_v25 }
 0x38a   : > { %1446 = vmatmul.mubr.msk.bf16.vlgmr.msra.gmra.mrb[8].mxu1 %vm586_vm2, %v714_v27 }
 0x38b   : > { %1458 = vmatpush3.bf16.msra.mxu1 %v1551_v26  ;;  %1461 = vmatprep.mubr.msk.bf16.mxu1 %vm1587_vm0, %v1586_v19  ;;  %v1557_v26 = vld [vmem:[%s1890_s3 + $0x30] sm:$0xff]  }
 0x38c   : > { %1459 = vmatprep.subr.bf16.mxu1 %v1586_v19 }
 0x38f   : > { %1460 = vmatpush3.bf16.msra.mxu1 %v1552_v28 }
 0x390   : > { %1471 = vmatprep.subr.bf16.mxu1 %v1586_v19 }
 0x3ea   : > { %v640_v30 = vpop.f32.mrb[4].mxu1 }
 0x3eb   : > { %v646_v31 = vpack.c.bf16 %v640_v30, %v640_v30  ;;  %v1435_v32 = vpop.f32.mrb[5].mxu1 }
 0x3ec   : > { %v643_v33 = vpop.f32.mrb[6].mxu1 }
 0x3ed   : > { %v1436_v37 = vpop.f32.mrb[7].mxu1  ;;  %1462 = vmatmul.mubr.msk.bf16.vlgmr.msra.gmra.mrb[12].mxu1 %vm539_vm1, %v646_v31 }
 0x3ee   : > { %1472 = vmatpush3.bf16.msra.mxu1 %v947_v35  ;;  %1473 = vmatprep.mubr.msk.bf16.mxu1 %vm1587_vm0, %v1586_v19 }
 0x3ef   : > { %1485 = vmatprep.subr.bf16.mxu1 %v1586_v19 }
 0x45d   : > { %v758_v39 = vpop.f32.mrb[8].mxu1 }
 0x45e   : > { %v764_v40 = vpack.c.bf16 %v758_v39, %v758_v39  ;;  %v1447_v41 = vpop.f32.mrb[9].mxu1 }
 0x45f   : > { %v761_v42 = vpop.f32.mrb[10].mxu1 }
 0x460   : > { %v1448_v44 = vpop.f32.mrb[11].mxu1  ;;  %1454 = vmatmul.mubr.msk.bf16.vlgmr.msra.gmra.mrb[12].mxu0 %vm539_vm1, %v764_v40 }
 0x461   : > { %1466 = vmatpush3.bf16.xpose.msra.mxu0 %v887_v43  ;;  %1467 = vmatprep.mubr.msk.bf16.mxu0 %vm1587_vm0, %v1586_v19 }
 0x462   : > { %1477 = vmatprep.subr.bf16.mxu0 %v1586_v19 }
 0x468   : > { %1468 = vmatmul.mubr.msk.bf16.vlgmr.msra.gmra.mrb[16].mxu0 %vm539_vm1, %v880_v45 }
 0x469   : > { %1481 = vmatprep.mubr.msk.bf16.mxu0 %vm1587_vm0, %v1586_v19  ;;  %1478 = vmatpush3.bf16.msra.mxu0 %v1555_v1 }
 0x46a   : > { %1479 = vmatprep.subr.bf16.mxu0 %v1586_v19 }
 0x4c0   : > { %v873_v46 = vpop.f32.mrb[12].mxu1 }
 0x4c1   : > { %v1463_v47 = vpop.f32.mrb[13].mxu1 }
 0x4c2   : > { %v876_v48 = vpop.f32.mrb[14].mxu1 }
 0x4c3   : > { %v1464_v49 = vpop.f32.mrb[15].mxu1  ;;  %v1363_v48 = vld [vmem:[%s1891_s4] ss:$0 sm:$0xff] }
 0x533   : > { %v818_v50 = vpop.f32.mrb[12].mxu0 }
 0x534   : > { %v1827_v51 = vadd.f32 %v873_v46, %v818_v50  ;;  %v1455_v52 = vpop.f32.mrb[13].mxu0 }
 0x535   : > { %v821_v53 = vpop.f32.mrb[14].mxu0 }
 0x536   : > { %v1456_v54 = vpop.f32.mrb[15].mxu0 }
 0x53b   : > { %v923_v55 = vpop.f32.mrb[16].mxu0 }
 0x53c   : > { %v1469_v56 = vpop.f32.mrb[17].mxu0  ;;  %v929_v57 = vsel %vm586_vm2, %v923_v55, -inf }
 0x53d   : > { %930 = vmax.xlane.f32.xlu1 %v929_v57  ;;  %v926_v58 = vpop.f32.mrb[18].mxu0 }
 0x53e   : > { %v1470_v59 = vpop.f32.mrb[19].mxu0 }
 0x5ca   : > { %v931_v60 = vpop.xlane.xlu1 %930 }
 0x5cb   : > { %v932_v61 = vsub.f32 %v923_v55, %v931_v60  ;;  %v1364_v60 = vld [vmem:[%s1892_s5] ss:$0 sm:$0xff] }
 0x5cd   : > { %v933_v62 = vmul.f32 1.442695, %v932_v61 }
 0x5cf   : > { %1567 = vpow2.f32 %v933_v62 }
 0x5d9   : > { %v1568_v63 = vpop.eup %1567 }
 0x5da   : > { %v935_v0 = vsel %vm586_vm2, %v1568_v63, 0.0 }
 0x5db   : > { %936 = vadd.xlane.f32.xlu0 %v935_v0 }
 0x5f1   : > { %1052 = vrot.lane.b32.xlu0 %v1719_v34, %s1590_s29 }
 0x5f5   : > { %1050 = vrot.lane.b32.xlu0 %v1725_v36, %s1590_s29  ;;  %v1556_v36 = vld [vmem:[%s1890_s3 + $0x28] sm:$0xff]  }
 0x5f6   : > { %1480 = vmatpush3.bf16.msra.mxu0 %v1556_v36 }
 0x5f7   : > { %1491 = vmatprep.subr.bf16.mxu0 %v1586_v19 }
 0x668   : > { %v937_v2 = vpop.xlane.xlu0 %936 }
 0x669   : > { %1569 = vrcp.f32 %v937_v2 }
 0x66c   : > { %v1053_v5 = vpop.permute.xlu0 %1052 }
 0x66d   : > { %v1058_v8 = vsel %vm539_vm1, %v1053_v5, 0 }
 0x670   : > { %v1051_v34 = vpop.permute.xlu0 %1050 }
 0x673   : > { %v1570_v3 = vpop.eup %1569 }
 0x674   : > { %v939_v4 = vmul.f32 %v1570_v3, %v1568_v63 }
 0x676   : > { %v940_v7 = vpack.c.bf16 %v939_v4, %v939_v4 }
 0x678   : > { %1474 = vmatmul.mubr.msk.bf16.vlgmr.msra.gmra.mrb[16].mxu1 %vm586_vm2, %v940_v7 }
 0x679   : > { %1486 = vmatpush3.bf16.xpose.msra.mxu1 %v1058_v8  ;;  %1487 = vmatprep.mubr.msk.bf16.mxu1 %vm1587_vm0, %v1586_v19 }
 0x67a   : > { %1497 = vmatprep.subr.bf16.mxu1 %v1586_v19 }
 0x680   : > { %1488 = vmatmul.mubr.msk.bf16.vlgmr.msra.gmra.mrb[20].mxu1 %vm539_vm1, %v1051_v34 }
 0x681   : > { %1501 = vmatprep.mubr.msk.bf16.mxu1 %vm1587_vm0, %v1586_v19  ;;  %1498 = vmatpush3.bf16.msra.mxu1 %v1557_v26 }
 0x682   : > { %1499 = vmatprep.subr.bf16.mxu1 %v1586_v19 }
 0x74b   : > { %v983_v9 = vpop.f32.mrb[16].mxu1 }
 0x74c   : > { %v989_v10 = vpack.c.bf16 %v983_v9, %v983_v9  ;;  %v1475_v11 = vpop.f32.mrb[17].mxu1 }
 0x74d   : > { %v986_v12 = vpop.f32.mrb[18].mxu1 }
 0x74e   : > { %v1476_v13 = vpop.f32.mrb[19].mxu1  ;;  %1482 = vmatmul.mubr.msk.bf16.vlgmr.msra.gmra.mrb[20].mxu0 %vm539_vm1, %v989_v10 }
 0x74f   : > { %1493 = vmatprep.mubr.msk.bf16.mxu0 %vm1587_vm0, %v1586_v19  ;;  %v1558_v19 = vld [vmem:[%s1890_s3 + $0x38] sm:$0xff]  }
 0x750   : > { %1500 = vmatpush3.bf16.msra.mxu1 %v1558_v19 }
 0x753   : > { %v1094_v14 = vpop.f32.mrb[20].mxu1 }
 0x754   : > { %v1489_v15 = vpop.f32.mrb[21].mxu1  ;;  %v1100_v16 = vsel %vm586_vm2, %v1094_v14, -inf }
 0x755   : > { %1101 = vmax.xlane.f32.xlu0 %v1100_v16  ;;  %v1097_v18 = vpop.f32.mrb[22].mxu1 }
 0x756   : > { %v1490_v20 = vpop.f32.mrb[23].mxu1 }
 0x7e2   : > { %v1102_v21 = vpop.xlane.xlu0 %1101 }
 0x7e3   : > { %v1103_v22 = vsub.f32 %v1094_v14, %v1102_v21 }
 0x7e5   : > { %v1104_v23 = vmul.f32 1.442695, %v1103_v22 }
 0x7e7   : > { %1571 = vpow2.f32 %v1104_v23 }
 0x7f1   : > { %v1572_v24 = vpop.eup %1571 }
 0x7f2   : > { %v1106_v25 = vsel %vm586_vm2, %v1572_v24, 0.0 }
 0x7f3   : > { %1107 = vadd.xlane.f32.xlu1 %v1106_v25 }
 0x804   : > { %1112 = vrot.lane.b32.xlu1 %v1779_v6, %s1590_s29 }
 0x821   : > { %v1043_v27 = vpop.f32.mrb[20].mxu0 }
 0x822   : > { %v1049_v28 = vadd.f32 %v1043_v27, %v1827_v51  ;;  %v1483_v29 = vpop.f32.mrb[21].mxu0 }
 0x823   : > { %v1046_v30 = vpop.f32.mrb[22].mxu0 }
 0x824   : > { %v1484_v31 = vpop.f32.mrb[23].mxu0 }
 0x880   : > { %v1108_v32 = vpop.xlane.xlu1 %1107 }
 0x881   : > { %1573 = vrcp.f32 %v1108_v32 }
 0x884   : > { %v1113_v33 = vpop.permute.xlu1 %1112 }
 0x885   : > { %v1118_v35 = vsel %vm602_vm3, %v1113_v33, 0 }
 0x886   : > { %1492 = vmatpush3.bf16.msra.mxu0 %v1118_v35 }
 0x88b   : > { %v1574_v6 = vpop.eup %1573 }
 0x88c   : > { %v1110_v37 = vmul.f32 %v1574_v6, %v1572_v24 }
 0x88e   : > { %v1111_v38 = vpack.c.bf16 %v1110_v37, %v1110_v37 }
 0x890   : > { %1494 = vmatmul.mubr.msk.bf16.vlgmr.msra.gmra.mrb[24].mxu0 %vm586_vm2, %v1111_v38 }
 0x963   : > { %v1154_v39 = vpop.f32.mrb[24].mxu0 }
 0x964   : > { %v1160_v40 = vpack.c.bf16 %v1154_v39, %v1154_v39  ;;  %v1495_v41 = vpop.f32.mrb[25].mxu0 }
 0x965   : > { %v1157_v42 = vpop.f32.mrb[26].mxu0 }
 0x966   : > { %v1496_v43 = vpop.f32.mrb[27].mxu0  ;;  %1502 = vmatmul.mubr.msk.bf16.vlgmr.msra.gmra.mrb[24].mxu1 %vm539_vm1, %v1160_v40 }
 0xa39   : > { %v1214_v44 = vpop.f32.mrb[24].mxu1 }
 0xa3a   : > { %v1220_v45 = vadd.f32 %v1214_v44, %v1049_v28  ;;  %v1503_v46 = vpop.f32.mrb[25].mxu1 }
 0xa3b   : > { %v1217_v47 = vpop.f32.mrb[26].mxu1 }
 0xa3c   : > { %v1221_v49 = vadd.f32 %v1220_v45, %v1695_v17  ;;  %v1504_v50 = vpop.f32.mrb[27].mxu1  ;;  %v1365_v17 = vld [vmem:[%s1893_s6] ss:$0 sm:$0xff] }
 0xa3e   : > { %v1229_v51 = vadd.f32 %v1363_v48, %v1221_v49 }
 0xa40   : > { %1232 = vadd.xlane.f32.xlu1 %v1229_v51 }
 0xacd   : > { %v1233_v52 = vpop.xlane.xlu1 %1232 }
 0xace   : > { %v1235_v53 = vmul.f32 0.0078125, %v1233_v52 }
 0xad0   : > { %v1236_v54 = vsub.f32 %v1229_v51, %v1235_v53 }
 0xad2   : > { %v1237_v55 = vmul.f32 %v1236_v54, %v1236_v54 }
 0xad4   : > { %1238 = vadd.xlane.f32.xlu0 %v1237_v55 }
 0xb61   : > { %v1239_v56 = vpop.xlane.xlu0 %1238 }
 0xb62   : > { %v1240_v57 = vmul.f32 0.0078125, %v1239_v56 }
 0xb64   : > { %v1241_v58 = vadd.f32 1e-05, %v1240_v57 }
 0xb66   : > { %1575 = vrsqrt.f32 %v1241_v58 }
 0xb70   : > { %v1576_v59 = vpop.eup %1575 }
 0xb71   : > { %v1243_v61 = vmul.f32 %v1576_v59, %v1236_v54 }
 0xb73   : > { %v1250_v62 = vmul.f32 %v1364_v60, %v1243_v61 }
 0xb75   : > { %v1257_v63 = vadd.f32 %v1365_v17, %v1250_v62 }
 0xb77   : > { %1258 = vst [vmem:[%s273_s26] sm:$0xff] %v1257_v63 }
 0xb78 PF: > { %s17_s24 = sadd.s32 1, %s1583_s24  }
 0xb79   : > { %p14_p4 = scmp.ge.s32.totalorder %s17_s24, 4  }
 0xb7b   :  { %16 = sbr.rel (!%p14_p4) target bundleno = 1 (0x1), region = 78 }

// kernel: transformer_forward.18
= control target key start
LH: loop header
LB: loop body
LE: loop exit
PB: predicated region body
PF: predicated region fallthrough
CT: control target
= control target key end

     0   :  { %s1770_s13 = smov 0   ;;  %s2023_s0 = inlined_call_operand.vmem [shape: f32[2,8,128], index: 0, kind: input, shape index: {}]   ;;  %s2024_s1 = inlined_call_operand.vmem [shape: f32[2,10,128], index: 1, kind: input, shape index: {}]   ;;  %s2025_s2 = inlined_call_operand.vmem [shape: bf16[128,128], index: 2, kind: input, shape index: {}]   ;;  %s2026_s3 = inlined_call_operand.vmem [shape: f32[1,128], index: 3, kind: input, shape index: {}]   ;;  %s2027_s4 = inlined_call_operand.vmem [shape: bf16[128,256], index: 4, kind: input, shape index: {}]   ;;  %s2028_s5 = inlined_call_operand.vmem [shape: f32[1,256], index: 5, kind: input, shape index: {}]   ;;  %s2029_s6 = inlined_call_operand.vmem [shape: bf16[128,128], index: 6, kind: input, shape index: {}]   ;;  %s2030_s7 = inlined_call_operand.vmem [shape: f32[1,128], index: 7, kind: input, shape index: {}]   ;;  %s2031_s8 = inlined_call_operand.vmem [shape: f32[1,128], index: 8, kind: input, shape index: {}]   ;;  %s2032_s9 = inlined_call_operand.vmem [shape: f32[1,128], index: 9, kind: input, shape index: {}]   ;;  %s2033_s10 = inlined_call_operand.vmem [shape: f32[2,8,128], index: 10, kind: output, shape index: {}]  }
   0x1 LB: > { %s1432_s14 = sadd.s32 4294967295, %s1707_s13   ;;  %p1436_p0 = scmp.ge.s32.totalorder %s1707_s13, 1  ;;  %s1707_s13 = sphi %s1770_s13, %s20_s13  }
   0x2   : > { %p321_p1 = scmp.lt.s32.totalorder %s1707_s13, 3 }
   0x4   : > { %p322_p2 = pnand %p1436_p0, %p321_p1 }
   0x5   : > { %v1643_v0 = vld [vmem:[%s2027_s4 + $0x4] ss:$8 sps:$4 sm:$0xff] (!%p322_p2)   ;;  %v1645_v1 = vld [vmem:[%s2027_s4] ss:$8 sps:$4 sm:$0xff] (!%p322_p2)   ;;  %v1709_v2 = vmov (!%p322_p2), 0.0   ;;  %v1710_v3 = vmov (!%p322_p2), 0   ;;  %v510_v31 = vlaneseq (!%p322_p2) }
   0x6   : > { %325 = sbr.rel (%p322_p2) target bundleno = 2938 (0xb7a), region = 60  ;;  %1529 = vmatprep.subr.bf16.mxu0 (!%p322_p2), %v1709_v2  ;;  %632 = vmatprep.mubr.bf16.mxu1 (!%p322_p2), %v1710_v3  ;;  %v1646_v4 = vld [vmem:[%s2027_s4 + $0x14] ss:$8 sps:$4 sm:$0xff] (!%p322_p2)   ;;  %v1648_v5 = vld [vmem:[%s2027_s4 + $0x10] ss:$8 sps:$4 sm:$0xff] (!%p322_p2)   ;;  %vm1711_vm0 = vmmov (!%p322_p2), 0  }
   0x7   : > { %600 = vmatprep.subr.bf16.mxu1 (!%p322_p2), %v1643_v0  ;;  %1545 = vmatprep.mubr.msk.bf16.mxu0 (!%p322_p2), %vm1711_vm0, %v1709_v2  ;;  %v1649_v6 = vld [vmem:[%s2025_s2] sm:$0xff] (!%p322_p2)   ;;  %v1653_v8 = vld [vmem:[%s2025_s2 + $0x8] sm:$0xff] (!%p322_p2)   ;;  %v1654_v10 = vld [vmem:[%s2027_s4 + $0x34] ss:$8 sps:$4 sm:$0xff] (!%p322_p2)   ;;  %p362_p3 = scmp.lt.s32.totalorder (!%p322_p2), %s1432_s14, 1  ;;  %v511_v32 = vshrl.u32 (!%p322_p2), %v510_v31, 7 }
   0x8   : > { %601 = vmatpush1.bf16.msra.mxu1 (!%p322_p2), %v1645_v1  ;;  %v1650_v7 = vld [vmem:[%s2027_s4 + $0x24] ss:$8 sps:$4 sm:$0xff] (!%p322_p2)   ;;  %1530 = vmatpush3.bf16.msra.mxu0 (!%p322_p2), %v1649_v6  ;;  %v1652_v9 = vld [vmem:[%s2027_s4 + $0x20] ss:$8 sps:$4 sm:$0xff] (!%p322_p2)   ;;  %v1657_v11 = vld [vmem:[%s2025_s2 + $0x10] sm:$0xff] (!%p322_p2)   ;;  %vm647_vm1 = vcmask (!%p322_p2), 261120  }
   0x9   : > { %602 = vmatprep.subr.bf16.mxu1 (!%p322_p2), %v1646_v4  ;;  %1531 = vmatprep.subr.bf16.mxu0 (!%p322_p2), %v1709_v2  ;;  %v1656_v12 = vld [vmem:[%s2027_s4 + $0x30] ss:$8 sps:$4 sm:$0xff] (!%p322_p2)   ;;  %v1658_v13 = vld [vmem:[%s2027_s4 + $0x44] ss:$8 sps:$4 sm:$0xff] (!%p322_p2)   ;;  %v1660_v15 = vld [vmem:[%s2027_s4 + $0x40] ss:$8 sps:$4 sm:$0xff] (!%p322_p2)  }
   0xa   : > { %v1661_v14 = vld [vmem:[%s2025_s2 + $0x18] sm:$0xff] (!%p322_p2)   ;;  %v1665_v17 = vld [vmem:[%s2025_s2 + $0x20] sm:$0xff] (!%p322_p2)   ;;  %v1669_v20 = vld [vmem:[%s2025_s2 + $0x28] sm:$0xff] (!%p322_p2)   ;;  %v512_v33 = vsub.s32 (!%p322_p2), 0, %v511_v32  ;;  %v516_v35 = vsub.s32 (!%p322_p2), 1, %v511_v32  ;;  %vm710_vm2 = vcmask (!%p322_p2), 1044480  }
   0xb   : > { %v1662_v16 = vld [vmem:[%s2027_s4 + $0x54] ss:$8 sps:$4 sm:$0xff] (!%p322_p2)   ;;  %v1664_v18 = vld [vmem:[%s2027_s4 + $0x50] ss:$8 sps:$4 sm:$0xff] (!%p322_p2)   ;;  %v1666_v19 = vld [vmem:[%s2027_s4 + $0x64] ss:$8 sps:$4 sm:$0xff] (!%p322_p2)  }
   0xc   : > { %603 = vmatpush1.bf16.msra.mxu1 (!%p322_p2), %v1648_v5  ;;  %1532 = vmatpush3.bf16.msra.mxu0 (!%p322_p2), %v1653_v8  ;;  %v1668_v21 = vld [vmem:[%s2027_s4 + $0x60] ss:$8 sps:$4 sm:$0xff] (!%p322_p2)   ;;  %v1670_v22 = vld [vmem:[%s2027_s4 + $0x74] ss:$8 sps:$4 sm:$0xff] (!%p322_p2)   ;;  %v1672_v24 = vld [vmem:[%s2027_s4 + $0x70] ss:$8 sps:$4 sm:$0xff] (!%p322_p2)  }
   0xd   : > { %604 = vmatprep.subr.bf16.mxu1 %v1650_v7  ;;  %1533 = vmatprep.subr.bf16.mxu0 %v1709_v2  ;;  %s2035_s14 = smov (!%p362_p3, %s1432_s14), 1  ;;  %v1673_v23 = vld [vmem:[%s2025_s2 + $0x30] sm:$0xff]   ;;  %v1674_v27 = vld [vmem:[%s2025_s2 + $0x38] sm:$0xff]   ;;  %v508_v34 = vld [vmem:[%s2028_s5] sm:$0x3]  ;;  %s1712_s22 = smov 96  }
   0xe   : > { %s1491_s29 = sshll.u32 %s2035_s14, 4  ;;  %s1437_s18 = sshll.u32 %s2035_s14, 3  ;;  %v513_v36 = vrot.slane %v508_v34, %v512_v33  ;;  %v517_v38 = vrot.slane %v508_v34, %v516_v35  ;;  %v1441_v39 = vld [vmem:[%s2026_s3] ss:$0 sm:$0xff]  ;;  %vm694_vm3 = vcmask 80896   ;;  %v1676_v32 = vld [vmem:[%s2029_s6 + $0x8] sm:$0xff]  }
   0xf   : > { %s370_s25 = scalar_lea.vmem %s2024_s1, %s1491_s29  ;;  %s365_s11 = scalar_lea.vmem %s2023_s0, %s1437_s18 }
  0x10   : > { %605 = vmatpush1.bf16.msra.mxu1 %v1652_v9  ;;  %1534 = vmatpush3.bf16.msra.mxu0 %v1657_v11  ;;  %v377_v25 = vld [vmem:[%s370_s25] sm:$0xff]  ;;  %v378_v26 = vld [vmem:[%s370_s25 + $0x8] sm:$0x3]  ;;  %s1713_s23 = smov 64   ;;  %s1714_s15 = smov 32  }
  0x11   : > { %606 = vmatprep.subr.bf16.mxu1 %v1654_v10  ;;  %1535 = vmatprep.subr.bf16.mxu0 %v1709_v2  ;;  %v1875_v28 = vld [vmem:[%s365_s11] sm:$0xff]  ;;  %v491_v29 = vpack.c.bf16 %v378_v26, %v377_v25 }
  0x12   : > { %v379_v30 = vpack.c.bf16 %v1875_v28, %v1875_v28 }
  0x14   : > { %607 = vmatpush1.bf16.msra.mxu1 %v1656_v12  ;;  %1536 = vmatpush3.bf16.msra.mxu0 %v1661_v14 }
  0x15   : > { %608 = vmatprep.subr.bf16.mxu1 %v1658_v13  ;;  %1537 = vmatprep.subr.bf16.mxu0 %v1709_v2 }
  0x18   : > { %609 = vmatpush1.bf16.msra.mxu1 %v1660_v15  ;;  %1538 = vmatpush3.bf16.msra.mxu0 %v1665_v17 }
  0x19   : > { %610 = vmatprep.subr.bf16.mxu1 %v1662_v16  ;;  %1539 = vmatprep.subr.bf16.mxu0 %v1709_v2 }
  0x1c   : > { %611 = vmatpush1.bf16.msra.mxu1 %v1664_v18  ;;  %1540 = vmatpush3.bf16.msra.mxu0 %v1669_v20 }
  0x1d   : > { %612 = vmatprep.subr.bf16.mxu1 %v1666_v19  ;;  %1541 = vmatprep.subr.bf16.mxu0 %v1709_v2 }
  0x20   : > { %613 = vmatpush1.bf16.msra.mxu1 %v1668_v21  ;;  %1542 = vmatpush3.bf16.msra.mxu0 %v1673_v23  ;;  %v1678_v23 = vld [vmem:[%s2029_s6 + $0x18] sm:$0xff]  }
  0x21   : > { %614 = vmatprep.subr.bf16.mxu1 %v1670_v22  ;;  %1543 = vmatprep.subr.bf16.mxu0 %v1709_v2  ;;  %v1677_v22 = vld [vmem:[%s2029_s6 + $0x10] sm:$0xff]  }
  0x24   : > { %615 = vmatpush1.bf16.msra.mxu1 %v1672_v24  ;;  %1544 = vmatpush3.bf16.msra.mxu0 %v1674_v27 }
  0x25   : > { %1555 = vmatprep.subr.bf16.mxu1 %v1709_v2  ;;  %1549 = vmatprep.subr.bf16.mxu0 %v1709_v2 }
  0x27   : > { %633 = vmatmul.mubr.bf16.vlgmr.msra.gmra.mrb[0].mxu1 %v491_v29  ;;  %1546 = vmatmul.mubr.bf16.vlgmr.msra.gmra.mrb[0].mxu0 %v379_v30  ;;  %v1675_v30 = vld [vmem:[%s2029_s6] sm:$0xff]  }
  0x28   : > { %1557 = vmatprep.mubr.msk.bf16.mxu1 %vm1711_vm0, %v1709_v2  ;;  %1551 = vmatprep.mubr.msk.bf16.mxu0 %vm1711_vm0, %v1709_v2 }
  0xfa   : > { %v634_v37 = vpop.f32.mrb[0].mxu1  ;;  %v485_v42 = vpop.f32.mrb[0].mxu0 }
  0xfb   : > { %v636_v40 = vpop.f32.mrb[1].mxu1  ;;  %v635_v43 = vadd.f32 %v634_v37, %v513_v36  ;;  %v486_v46 = vadd.f32 %v1441_v39, %v485_v42  ;;  %v1547_v47 = vpop.f32.mrb[1].mxu0 }
  0xfc   : > { %v638_v41 = vpop.f32.mrb[2].mxu1  ;;  %v637_v48 = vadd.f32 %v636_v40, %v517_v38  ;;  %v488_v50 = vpop.f32.mrb[2].mxu0 }
  0xfd   : > { %v639_v44 = vadd.f32 %v638_v41, %v513_v36  ;;  %v640_v45 = vpop.f32.mrb[3].mxu1  ;;  %v643_v52 = vmul.f32 0.17677669, %v486_v46  ;;  %v1548_v53 = vpop.f32.mrb[3].mxu0 }
  0xfe   : > { %v641_v49 = vadd.f32 %v640_v45, %v517_v38 }
  0xff   : > { %v1892_v51 = vpack.c.bf16 %v639_v44, %v635_v43  ;;  %v1896_v55 = vpack.c.bf16 %v643_v52, %v643_v52 }
 0x100   : > { %v1894_v54 = vpack.c.bf16 %v641_v49, %v637_v48 }
 0x101   : > { %763 = vrot.lane.b32.xlu0 %v1892_v51, %s1712_s22  ;;  %v652_v56 = vsel %vm647_vm1, %v1892_v51, 0 }
 0x102   : > { %1550 = vmatpush3.bf16.xpose.msra.mxu0 %v652_v56  ;;  %v712_v57 = vsel %vm710_vm2, %v1894_v54, 0 }
 0x103   : > { %1556 = vmatpush3.bf16.msra.mxu1 %v712_v57  ;;  %1561 = vmatprep.subr.bf16.mxu0 %v1709_v2 }
 0x104   : > { %1567 = vmatprep.subr.bf16.mxu1 %v1709_v2 }
 0x105   : > { %760 = vrot.lane.b32.xlu0 %v1896_v55, %s1712_s22 }
 0x109   : > { %1552 = vmatmul.mubr.msk.bf16.vlgmr.msra.gmra.mrb[4].mxu0 %vm647_vm1, %v1896_v55 }
 0x10a   : > { %1563 = vmatprep.mubr.msk.bf16.mxu0 %vm1711_vm0, %v1709_v2 }
 0x173   : > { %v764_v58 = vpop.permute.xlu0 %763 }
 0x174   : > { %v769_v59 = vsel %vm647_vm1, %v764_v58, 0 }
 0x175   : > { %1562 = vmatpush3.bf16.xpose.msra.mxu0 %v769_v59 }
 0x176   : > { %1573 = vmatprep.subr.bf16.mxu0 %v1709_v2 }
 0x177   : > { %v761_v60 = vpop.permute.xlu0 %760 }
 0x17c   : > { %1564 = vmatmul.mubr.msk.bf16.vlgmr.msra.gmra.mrb[8].mxu0 %vm647_vm1, %v761_v60 }
 0x17d   : > { %1577 = vmatprep.mubr.msk.bf16.mxu0 %vm1711_vm0, %v1709_v2  ;;  %1574 = vmatpush3.bf16.msra.mxu0 %v1677_v22 }
 0x17e   : > { %1575 = vmatprep.subr.bf16.mxu0 %v1709_v2 }
 0x181   : > { %1576 = vmatpush3.bf16.msra.mxu0 %v1678_v23 }
 0x182   : > { %1589 = vmatprep.subr.bf16.mxu0 %v1709_v2 }
 0x1dc   : > { %v688_v61 = vpop.f32.mrb[4].mxu0 }
 0x1dd   : > { %v1553_v62 = vpop.f32.mrb[5].mxu0  ;;  %v695_v63 = vsel %vm694_vm3, %v688_v61, -inf }
 0x1de   : > { %696 = vmax.xlane.f32.xlu1 %v695_v63  ;;  %v691_v0 = vpop.f32.mrb[6].mxu0 }
 0x1df   : > { %v1554_v1 = vpop.f32.mrb[7].mxu0 }
 0x24f   : > { %v805_v3 = vpop.f32.mrb[8].mxu0 }
 0x250   : > { %v1565_v4 = vpop.f32.mrb[9].mxu0  ;;  %v811_v5 = vsel %vm694_vm3, %v805_v3, -inf }
 0x251   : > { %812 = vmax.xlane.f32.xlu1 %v811_v5  ;;  %v808_v6 = vpop.f32.mrb[10].mxu0 }
 0x252   : > { %v1566_v7 = vpop.f32.mrb[11].mxu0 }
 0x253   : > { %v1679_v7 = vld [vmem:[%s2029_s6 + $0x20] sm:$0xff]  }
 0x26b   : > { %v697_v8 = vpop.xlane.xlu1 %696 }
 0x26c   : > { %v698_v9 = vsub.f32 %v688_v61, %v697_v8 }
 0x26e   : > { %v699_v10 = vmul.f32 1.442695, %v698_v9 }
 0x270   : > { %1683 = vpow2.f32 %v699_v10 }
 0x27a   : > { %v1684_v11 = vpop.eup %1683 }
 0x27b   : > { %v701_v12 = vsel %vm694_vm3, %v1684_v11, 0.0 }
 0x27c   : > { %702 = vadd.xlane.f32.xlu0 %v701_v12 }
 0x292   : > { %1049 = vrot.lane.b32.xlu0 %v1894_v54, %s1713_s23 }
 0x2de   : > { %v813_v13 = vpop.xlane.xlu1 %812 }
 0x2df   : > { %v814_v14 = vsub.f32 %v805_v3, %v813_v13 }
 0x2e1   : > { %v815_v15 = vmul.f32 1.442695, %v814_v14 }
 0x2e3   : > { %1685 = vpow2.f32 %v815_v15 }
 0x2ed   : > { %v1686_v16 = vpop.eup %1685 }
 0x2ee   : > { %v817_v17 = vsel %vm694_vm3, %v1686_v16, 0.0 }
 0x2ef   : > { %818 = vadd.xlane.f32.xlu1 %v817_v17 }
 0x300   : > { %824 = vrot.lane.b32.xlu1 %v1894_v54, %s1712_s22 }
 0x304   : > { %989 = vrot.lane.b32.xlu1 %v1892_v51, %s1713_s23 }
 0x308   : > { %987 = vrot.lane.b32.xlu1 %v1896_v55, %s1713_s23 }
 0x309   : > { %v703_v18 = vpop.xlane.xlu0 %702 }
 0x30a   : > { %1687 = vrcp.f32 %v703_v18 }
 0x30d   : > { %v1050_v33 = vpop.permute.xlu0 %1049 }
 0x30e   : > { %v1055_v38 = vsel %vm710_vm2, %v1050_v33, 0 }
 0x314   : > { %v1688_v19 = vpop.eup %1687 }
 0x315   : > { %v705_v20 = vmul.f32 %v1688_v19, %v1684_v11 }
 0x317   : > { %v706_v21 = vpack.c.bf16 %v705_v20, %v705_v20 }
 0x319   : > { %1558 = vmatmul.mubr.msk.bf16.vlgmr.msra.gmra.mrb[4].mxu1 %vm694_vm3, %v706_v21 }
 0x31a   : > { %1569 = vmatprep.mubr.msk.bf16.mxu1 %vm1711_vm0, %v1709_v2 }
 0x37c   : > { %v819_v24 = vpop.xlane.xlu1 %818 }
 0x37d   : > { %1689 = vrcp.f32 %v819_v24 }
 0x380   : > { %v825_v25 = vpop.permute.xlu1 %824 }
 0x381   : > { %v830_v26 = vsel %vm710_vm2, %v825_v25, 0 }
 0x382   : > { %1568 = vmatpush3.bf16.msra.mxu1 %v830_v26 }
 0x383   : > { %1581 = vmatprep.subr.bf16.mxu1 %v1709_v2 }
 0x384   : > { %v990_v40 = vpop.permute.xlu1 %989 }
 0x385   : > { %v995_v45 = vsel %vm647_vm1, %v990_v40, 0 }
 0x387   : > { %v1690_v27 = vpop.eup %1689 }
 0x388   : > { %v821_v29 = vmul.f32 %v1690_v27, %v1686_v16  ;;  %v988_v47 = vpop.permute.xlu1 %987 }
 0x38a   : > { %v822_v31 = vpack.c.bf16 %v821_v29, %v821_v29 }
 0x38c   : > { %1570 = vmatmul.mubr.msk.bf16.vlgmr.msra.gmra.mrb[8].mxu1 %vm694_vm3, %v822_v31 }
 0x38d   : > { %1582 = vmatpush3.bf16.msra.mxu1 %v1675_v30  ;;  %1585 = vmatprep.mubr.msk.bf16.mxu1 %vm1711_vm0, %v1709_v2  ;;  %v1681_v30 = vld [vmem:[%s2029_s6 + $0x30] sm:$0xff]  }
 0x38e   : > { %1583 = vmatprep.subr.bf16.mxu1 %v1709_v2 }
 0x391   : > { %1584 = vmatpush3.bf16.msra.mxu1 %v1676_v32 }
 0x392   : > { %1595 = vmatprep.subr.bf16.mxu1 %v1709_v2 }
 0x3ec   : > { %v748_v34 = vpop.f32.mrb[4].mxu1 }
 0x3ed   : > { %v754_v35 = vpack.c.bf16 %v748_v34, %v748_v34  ;;  %v1559_v36 = vpop.f32.mrb[5].mxu1 }
 0x3ee   : > { %v751_v37 = vpop.f32.mrb[6].mxu1 }
 0x3ef   : > { %v1560_v39 = vpop.f32.mrb[7].mxu1  ;;  %1586 = vmatmul.mubr.msk.bf16.vlgmr.msra.gmra.mrb[12].mxu1 %vm647_vm1, %v754_v35 }
 0x3f0   : > { %1596 = vmatpush3.bf16.msra.mxu1 %v1055_v38  ;;  %1597 = vmatprep.mubr.msk.bf16.mxu1 %vm1711_vm0, %v1709_v2 }
 0x3f1   : > { %1609 = vmatprep.subr.bf16.mxu1 %v1709_v2 }
 0x45f   : > { %v866_v41 = vpop.f32.mrb[8].mxu1 }
 0x460   : > { %v872_v42 = vpack.c.bf16 %v866_v41, %v866_v41  ;;  %v1571_v43 = vpop.f32.mrb[9].mxu1 }
 0x461   : > { %v869_v44 = vpop.f32.mrb[10].mxu1 }
 0x462   : > { %v1572_v46 = vpop.f32.mrb[11].mxu1  ;;  %1578 = vmatmul.mubr.msk.bf16.vlgmr.msra.gmra.mrb[12].mxu0 %vm647_vm1, %v872_v42 }
 0x463   : > { %1590 = vmatpush3.bf16.xpose.msra.mxu0 %v995_v45  ;;  %1591 = vmatprep.mubr.msk.bf16.mxu0 %vm1711_vm0, %v1709_v2 }
 0x464   : > { %1601 = vmatprep.subr.bf16.mxu0 %v1709_v2 }
 0x46a   : > { %1592 = vmatmul.mubr.msk.bf16.vlgmr.msra.gmra.mrb[16].mxu0 %vm647_vm1, %v988_v47 }
 0x46b   : > { %1605 = vmatprep.mubr.msk.bf16.mxu0 %vm1711_vm0, %v1709_v2  ;;  %1602 = vmatpush3.bf16.msra.mxu0 %v1679_v7 }
 0x46c   : > { %1603 = vmatprep.subr.bf16.mxu0 %v1709_v2 }
 0x4c2   : > { %v981_v48 = vpop.f32.mrb[12].mxu1 }
 0x4c3   : > { %v1587_v49 = vpop.f32.mrb[13].mxu1 }
 0x4c4   : > { %v984_v50 = vpop.f32.mrb[14].mxu1 }
 0x4c5   : > { %v1588_v52 = vpop.f32.mrb[15].mxu1  ;;  %v1486_v50 = vld [vmem:[%s2030_s7] ss:$0 sm:$0xff] }
 0x535   : > { %v926_v53 = vpop.f32.mrb[12].mxu0 }
 0x536   : > { %v1963_v56 = vadd.f32 %v981_v48, %v926_v53  ;;  %v1579_v57 = vpop.f32.mrb[13].mxu0 }
 0x537   : > { %v929_v58 = vpop.f32.mrb[14].mxu0 }
 0x538   : > { %v1580_v59 = vpop.f32.mrb[15].mxu0 }
 0x53d   : > { %v1031_v60 = vpop.f32.mrb[16].mxu0 }
 0x53e   : > { %v1593_v61 = vpop.f32.mrb[17].mxu0  ;;  %v1037_v62 = vsel %vm694_vm3, %v1031_v60, -inf }
 0x53f   : > { %1038 = vmax.xlane.f32.xlu1 %v1037_v62  ;;  %v1034_v63 = vpop.f32.mrb[18].mxu0 }
 0x540   : > { %v1594_v0 = vpop.f32.mrb[19].mxu0 }
 0x5cc   : > { %v1039_v1 = vpop.xlane.xlu1 %1038 }
 0x5cd   : > { %v1040_v3 = vsub.f32 %v1031_v60, %v1039_v1  ;;  %v1487_v1 = vld [vmem:[%s2031_s8] ss:$0 sm:$0xff] }
 0x5cf   : > { %v1041_v4 = vmul.f32 1.442695, %v1040_v3 }
 0x5d1   : > { %1691 = vpow2.f32 %v1041_v4 }
 0x5db   : > { %v1692_v5 = vpop.eup %1691 }
 0x5dc   : > { %v1043_v6 = vsel %vm694_vm3, %v1692_v5, 0.0 }
 0x5dd   : > { %1044 = vadd.xlane.f32.xlu0 %v1043_v6 }
 0x5f3   : > { %1160 = vrot.lane.b32.xlu0 %v1892_v51, %s1714_s15 }
 0x5f7   : > { %1158 = vrot.lane.b32.xlu0 %v1896_v55, %s1714_s15  ;;  %v1680_v55 = vld [vmem:[%s2029_s6 + $0x28] sm:$0xff]  }
 0x5f8   : > { %1604 = vmatpush3.bf16.msra.mxu0 %v1680_v55 }
 0x5f9   : > { %1615 = vmatprep.subr.bf16.mxu0 %v1709_v2 }
 0x66a   : > { %v1045_v8 = vpop.xlane.xlu0 %1044 }
 0x66b   : > { %1693 = vrcp.f32 %v1045_v8 }
 0x66e   : > { %v1161_v11 = vpop.permute.xlu0 %1160 }
 0x66f   : > { %v1166_v13 = vsel %vm647_vm1, %v1161_v11, 0 }
 0x672   : > { %v1159_v51 = vpop.permute.xlu0 %1158 }
 0x675   : > { %v1694_v9 = vpop.eup %1693 }
 0x676   : > { %v1047_v10 = vmul.f32 %v1694_v9, %v1692_v5 }
 0x678   : > { %v1048_v12 = vpack.c.bf16 %v1047_v10, %v1047_v10 }
 0x67a   : > { %1598 = vmatmul.mubr.msk.bf16.vlgmr.msra.gmra.mrb[16].mxu1 %vm694_vm3, %v1048_v12 }
 0x67b   : > { %1610 = vmatpush3.bf16.xpose.msra.mxu1 %v1166_v13  ;;  %1611 = vmatprep.mubr.msk.bf16.mxu1 %vm1711_vm0, %v1709_v2 }
 0x67c   : > { %1621 = vmatprep.subr.bf16.mxu1 %v1709_v2 }
 0x682   : > { %1612 = vmatmul.mubr.msk.bf16.vlgmr.msra.gmra.mrb[20].mxu1 %vm647_vm1, %v1159_v51 }
 0x683   : > { %1625 = vmatprep.mubr.msk.bf16.mxu1 %vm1711_vm0, %v1709_v2  ;;  %1622 = vmatpush3.bf16.msra.mxu1 %v1681_v30 }
 0x684   : > { %1623 = vmatprep.subr.bf16.mxu1 %v1709_v2 }
 0x74d   : > { %v1091_v14 = vpop.f32.mrb[16].mxu1 }
 0x74e   : > { %v1097_v15 = vpack.c.bf16 %v1091_v14, %v1091_v14  ;;  %v1599_v16 = vpop.f32.mrb[17].mxu1 }
 0x74f   : > { %v1094_v17 = vpop.f32.mrb[18].mxu1 }
 0x750   : > { %v1600_v18 = vpop.f32.mrb[19].mxu1  ;;  %1606 = vmatmul.mubr.msk.bf16.vlgmr.msra.gmra.mrb[20].mxu0 %vm647_vm1, %v1097_v15 }
 0x751   : > { %1617 = vmatprep.mubr.msk.bf16.mxu0 %vm1711_vm0, %v1709_v2  ;;  %v1682_v2 = vld [vmem:[%s2029_s6 + $0x38] sm:$0xff]  }
 0x752   : > { %1624 = vmatpush3.bf16.msra.mxu1 %v1682_v2 }
 0x755   : > { %v1202_v19 = vpop.f32.mrb[20].mxu1 }
 0x756   : > { %v1613_v20 = vpop.f32.mrb[21].mxu1  ;;  %v1208_v21 = vsel %vm694_vm3, %v1202_v19, -inf }
 0x757   : > { %1209 = vmax.xlane.f32.xlu0 %v1208_v21  ;;  %v1205_v22 = vpop.f32.mrb[22].mxu1 }
 0x758   : > { %v1614_v23 = vpop.f32.mrb[23].mxu1 }
 0x7e4   : > { %v1210_v24 = vpop.xlane.xlu0 %1209 }
 0x7e5   : > { %v1211_v25 = vsub.f32 %v1202_v19, %v1210_v24 }
 0x7e7   : > { %v1212_v26 = vmul.f32 1.442695, %v1211_v25 }
 0x7e9   : > { %1695 = vpow2.f32 %v1212_v26 }
 0x7f3   : > { %v1696_v27 = vpop.eup %1695 }
 0x7f4   : > { %v1214_v29 = vsel %vm694_vm3, %v1696_v27, 0.0 }
 0x7f5   : > { %1215 = vadd.xlane.f32.xlu1 %v1214_v29 }
 0x806   : > { %1220 = vrot.lane.b32.xlu1 %v1894_v54, %s1714_s15  ;;  %s374_s15 = scalar_lea.vmem %s2033_s10, %s1437_s18 }
 0x823   : > { %v1151_v31 = vpop.f32.mrb[20].mxu0 }
 0x824   : > { %v1157_v32 = vadd.f32 %v1151_v31, %v1963_v56  ;;  %v1607_v33 = vpop.f32.mrb[21].mxu0 }
 0x825   : > { %v1154_v34 = vpop.f32.mrb[22].mxu0 }
 0x826   : > { %v1608_v35 = vpop.f32.mrb[23].mxu0 }
 0x882   : > { %v1216_v36 = vpop.xlane.xlu1 %1215 }
 0x883   : > { %1697 = vrcp.f32 %v1216_v36 }
 0x886   : > { %v1221_v37 = vpop.permute.xlu1 %1220 }
 0x887   : > { %v1226_v38 = vsel %vm710_vm2, %v1221_v37, 0 }
 0x888   : > { %1616 = vmatpush3.bf16.msra.mxu0 %v1226_v38 }
 0x88d   : > { %v1698_v54 = vpop.eup %1697 }
 0x88e   : > { %v1218_v39 = vmul.f32 %v1698_v54, %v1696_v27 }
 0x890   : > { %v1219_v40 = vpack.c.bf16 %v1218_v39, %v1218_v39 }
 0x892   : > { %1618 = vmatmul.mubr.msk.bf16.vlgmr.msra.gmra.mrb[24].mxu0 %vm694_vm3, %v1219_v40 }
 0x965   : > { %v1262_v41 = vpop.f32.mrb[24].mxu0 }
 0x966   : > { %v1268_v42 = vpack.c.bf16 %v1262_v41, %v1262_v41  ;;  %v1619_v43 = vpop.f32.mrb[25].mxu0 }
 0x967   : > { %v1265_v44 = vpop.f32.mrb[26].mxu0 }
 0x968   : > { %v1620_v45 = vpop.f32.mrb[27].mxu0  ;;  %1626 = vmatmul.mubr.msk.bf16.vlgmr.msra.gmra.mrb[24].mxu1 %vm647_vm1, %v1268_v42 }
 0xa3b   : > { %v1322_v46 = vpop.f32.mrb[24].mxu1 }
 0xa3c   : > { %v1328_v47 = vadd.f32 %v1322_v46, %v1157_v32  ;;  %v1627_v48 = vpop.f32.mrb[25].mxu1 }
 0xa3d   : > { %v1325_v49 = vpop.f32.mrb[26].mxu1 }
 0xa3e   : > { %v1329_v52 = vadd.f32 %v1328_v47, %v1875_v28  ;;  %v1628_v53 = vpop.f32.mrb[27].mxu1  ;;  %v1488_v28 = vld [vmem:[%s2032_s9] ss:$0 sm:$0xff] }
 0xa40   : > { %v1337_v56 = vadd.f32 %v1486_v50, %v1329_v52 }
 0xa42   : > { %1340 = vadd.xlane.f32.xlu1 %v1337_v56 }
 0xacf   : > { %v1341_v57 = vpop.xlane.xlu1 %1340 }
 0xad0   : > { %v1343_v58 = vmul.f32 0.0078125, %v1341_v57 }
 0xad2   : > { %v1344_v59 = vsub.f32 %v1337_v56, %v1343_v58 }
 0xad4   : > { %v1345_v60 = vmul.f32 %v1344_v59, %v1344_v59 }
 0xad6   : > { %1346 = vadd.xlane.f32.xlu0 %v1345_v60 }
 0xb63   : > { %v1347_v61 = vpop.xlane.xlu0 %1346 }
 0xb64   : > { %v1348_v62 = vmul.f32 0.0078125, %v1347_v61 }
 0xb66   : > { %v1349_v63 = vadd.f32 1e-05, %v1348_v62 }
 0xb68   : > { %1699 = vrsqrt.f32 %v1349_v63 }
 0xb72   : > { %v1700_v0 = vpop.eup %1699 }
 0xb73   : > { %v1351_v3 = vmul.f32 %v1700_v0, %v1344_v59 }
 0xb75   : > { %v1358_v4 = vmul.f32 %v1487_v1, %v1351_v3 }
 0xb77   : > { %v1365_v5 = vadd.f32 %v1488_v28, %v1358_v4 }
 0xb79   : > { %1366 = vst [vmem:[%s374_s15] sm:$0xff] %v1365_v5 }
 0xb7a PF: > { %s20_s13 = sadd.s32 1, %s1707_s13  }
 0xb7b   : > { %p17_p4 = scmp.ge.s32.totalorder %s20_s13, 4  }
 0xb7d   :  { %19 = sbr.rel (!%p17_p4) target bundleno = 1 (0x1), region = 93 }

// kernel: transformer_forward.19
= control target key start
LH: loop header
LB: loop body
LE: loop exit
PB: predicated region body
PF: predicated region fallthrough
CT: control target
= control target key end

     0   :  { %s854_s24 = smov 0   ;;  %s990_s0 = inlined_call_operand.vmem [shape: f32[2,8,128], index: 0, kind: input, shape index: {}]   ;;  %s991_s1 = inlined_call_operand.vmem [shape: bf16[128,256], index: 1, kind: input, shape index: {}]   ;;  %s992_s2 = inlined_call_operand.vmem [shape: f32[1,256], index: 2, kind: input, shape index: {}]   ;;  %s993_s3 = inlined_call_operand.vmem [shape: bf16[256,128], index: 3, kind: input, shape index: {}]   ;;  %s994_s4 = inlined_call_operand.vmem [shape: f32[1,128], index: 4, kind: input, shape index: {}]   ;;  %s995_s5 = inlined_call_operand.vmem [shape: f32[1,128], index: 5, kind: input, shape index: {}]   ;;  %s996_s6 = inlined_call_operand.vmem [shape: f32[1,128], index: 6, kind: input, shape index: {}]   ;;  %s997_s7 = inlined_call_operand.vmem [shape: f32[2,8,128], index: 7, kind: output, shape index: {}]  }
   0x1 LB: > { %s688_s25 = sadd.s32 4294967295, %s811_s24   ;;  %p692_p0 = scmp.ge.s32.totalorder %s811_s24, 1  ;;  %s811_s24 = sphi %s854_s24, %s17_s24  }
   0x2   : > { %p236_p1 = scmp.lt.s32.totalorder %s811_s24, 3 }
   0x4   : > { %p237_p2 = pnand %p692_p0, %p236_p1 }
   0x5   : > { %v763_v0 = vld [vmem:[%s991_s1 + $0x4] ss:$8 sps:$4 sm:$0xff] (!%p237_p2)   ;;  %v765_v1 = vld [vmem:[%s991_s1] ss:$8 sps:$4 sm:$0xff] (!%p237_p2)   ;;  %v813_v2 = vmov (!%p237_p2), 0   ;;  %p266_p3 = scmp.lt.s32.totalorder (!%p237_p2), %s688_s25, 1  ;;  %v295_v35 = vlaneseq (!%p237_p2) }
   0x6   : > { %240 = sbr.rel (%p237_p2) target bundleno = 789 (0x315), region = 48  ;;  %417 = vmatprep.mubr.bf16.mxu0 (!%p237_p2), %v813_v2  ;;  %385 = vmatprep.subr.bf16.mxu0 (!%p237_p2), %v763_v0  ;;  %v766_v3 = vld [vmem:[%s991_s1 + $0x14] ss:$8 sps:$4 sm:$0xff] (!%p237_p2)   ;;  %v768_v4 = vld [vmem:[%s991_s1 + $0x10] ss:$8 sps:$4 sm:$0xff] (!%p237_p2)   ;;  %v787_v10 = vld [vmem:[%s993_s3 + $0x40] sm:$0xff] (!%p237_p2)  }
   0x7   : > { %386 = vmatpush1.bf16.msra.mxu0 (!%p237_p2), %v765_v1  ;;  %v769_v5 = vld [vmem:[%s991_s1 + $0x24] ss:$8 sps:$4 sm:$0xff] (!%p237_p2)   ;;  %v771_v6 = vld [vmem:[%s991_s1 + $0x20] ss:$8 sps:$4 sm:$0xff] (!%p237_p2)   ;;  %v772_v7 = vld [vmem:[%s991_s1 + $0x34] ss:$8 sps:$4 sm:$0xff] (!%p237_p2)   ;;  %732 = vmatprep.subr.bf16.mxu1 (!%p237_p2), %v787_v10 }
   0x8   : > { %387 = vmatprep.subr.bf16.mxu0 (!%p237_p2), %v766_v3  ;;  %v774_v8 = vld [vmem:[%s991_s1 + $0x30] ss:$8 sps:$4 sm:$0xff] (!%p237_p2)   ;;  %v775_v9 = vld [vmem:[%s991_s1 + $0x44] ss:$8 sps:$4 sm:$0xff] (!%p237_p2)   ;;  %v777_v12 = vld [vmem:[%s991_s1 + $0x40] ss:$8 sps:$4 sm:$0xff] (!%p237_p2)  }
   0x9   : > { %v788_v11 = vld [vmem:[%s993_s3] sm:$0xff] (!%p237_p2)   ;;  %v789_v13 = vld [vmem:[%s993_s3 + $0x48] sm:$0xff] (!%p237_p2)   ;;  %v791_v15 = vld [vmem:[%s993_s3 + $0x50] sm:$0xff] (!%p237_p2)   ;;  %v296_v36 = vshrl.u32 (!%p237_p2), %v295_v35, 7 }
   0xa   : > { %733 = vmatpush3.bf16.msra.mxu1 (!%p237_p2), %v788_v11  ;;  %v790_v14 = vld [vmem:[%s993_s3 + $0x8] sm:$0xff] (!%p237_p2)   ;;  %v778_v16 = vld [vmem:[%s991_s1 + $0x54] ss:$8 sps:$4 sm:$0xff] (!%p237_p2)   ;;  %v780_v17 = vld [vmem:[%s991_s1 + $0x50] ss:$8 sps:$4 sm:$0xff] (!%p237_p2)  }
   0xb   : > { %388 = vmatpush1.bf16.msra.mxu0 (!%p237_p2), %v768_v4  ;;  %734 = vmatprep.subr.bf16.mxu1 (!%p237_p2), %v789_v13  ;;  %v792_v18 = vld [vmem:[%s993_s3 + $0x10] sm:$0xff] (!%p237_p2)   ;;  %v793_v19 = vld [vmem:[%s993_s3 + $0x58] sm:$0xff] (!%p237_p2)   ;;  %v781_v20 = vld [vmem:[%s991_s1 + $0x64] ss:$8 sps:$4 sm:$0xff] (!%p237_p2)   ;;  %v297_v37 = vsub.s32 (!%p237_p2), 0, %v296_v36  ;;  %v301_v39 = vsub.s32 (!%p237_p2), 1, %v296_v36 }
   0xc   : > { %389 = vmatprep.subr.bf16.mxu0 (!%p237_p2), %v769_v5  ;;  %v783_v21 = vld [vmem:[%s991_s1 + $0x60] ss:$8 sps:$4 sm:$0xff] (!%p237_p2)   ;;  %v784_v22 = vld [vmem:[%s991_s1 + $0x74] ss:$8 sps:$4 sm:$0xff] (!%p237_p2)   ;;  %v786_v26 = vld [vmem:[%s991_s1 + $0x70] ss:$8 sps:$4 sm:$0xff] (!%p237_p2)  }
   0xd   : > { %s999_s25 = smov (!%p266_p3, %s688_s25), 1  ;;  %v794_v23 = vld [vmem:[%s993_s3 + $0x18] sm:$0xff]   ;;  %v795_v24 = vld [vmem:[%s993_s3 + $0x60] sm:$0xff]   ;;  %v797_v28 = vld [vmem:[%s993_s3 + $0x68] sm:$0xff]  }
   0xe   : > { %735 = vmatpush3.bf16.msra.mxu1 %v790_v14  ;;  %s693_s18 = sshll.u32 %s999_s25, 3  ;;  %v796_v25 = vld [vmem:[%s993_s3 + $0x20] sm:$0xff]   ;;  %v798_v30 = vld [vmem:[%s993_s3 + $0x28] sm:$0xff]   ;;  %v799_v31 = vld [vmem:[%s993_s3 + $0x70] sm:$0xff]  }
   0xf   : > { %390 = vmatpush1.bf16.msra.mxu0 %v771_v6  ;;  %736 = vmatprep.subr.bf16.mxu1 %v791_v15  ;;  %s269_s12 = scalar_lea.vmem %s990_s0, %s693_s18  ;;  %v800_v32 = vld [vmem:[%s993_s3 + $0x30] sm:$0xff]   ;;  %v801_v33 = vld [vmem:[%s993_s3 + $0x78] sm:$0xff]   ;;  %v293_v38 = vld [vmem:[%s992_s2] sm:$0x3]  ;;  %s273_s20 = scalar_lea.vmem %s997_s7, %s693_s18 }
  0x10   : > { %391 = vmatprep.subr.bf16.mxu0 %v772_v7  ;;  %v275_v27 = vld [vmem:[%s269_s12] sm:$0xff]  ;;  %v802_v34 = vld [vmem:[%s993_s3 + $0x38] sm:$0xff]   ;;  %v298_v40 = vrot.slane %v293_v38, %v297_v37  ;;  %v302_v41 = vrot.slane %v293_v38, %v301_v39 }
  0x11   : > { %v276_v29 = vpack.c.bf16 %v275_v27, %v275_v27  ;;  %v711_v53 = vld [vmem:[%s994_s4] ss:$0 sm:$0xff] }
  0x12   : > { %737 = vmatpush3.bf16.msra.mxu1 %v792_v18  ;;  %v728_v4 = vld [vmem:[%s995_s5] ss:$0 sm:$0xff] }
  0x13   : > { %392 = vmatpush1.bf16.msra.mxu0 %v774_v8  ;;  %738 = vmatprep.subr.bf16.mxu1 %v793_v19  ;;  %v729_v6 = vld [vmem:[%s996_s6] ss:$0 sm:$0xff] }
  0x14   : > { %393 = vmatprep.subr.bf16.mxu0 %v775_v9 }
  0x16   : > { %739 = vmatpush3.bf16.msra.mxu1 %v794_v23 }
  0x17   : > { %394 = vmatpush1.bf16.msra.mxu0 %v777_v12  ;;  %740 = vmatprep.subr.bf16.mxu1 %v795_v24 }
  0x18   : > { %395 = vmatprep.subr.bf16.mxu0 %v778_v16 }
  0x1a   : > { %741 = vmatpush3.bf16.msra.mxu1 %v796_v25 }
  0x1b   : > { %396 = vmatpush1.bf16.msra.mxu0 %v780_v17  ;;  %742 = vmatprep.subr.bf16.mxu1 %v797_v28 }
  0x1c   : > { %397 = vmatprep.subr.bf16.mxu0 %v781_v20 }
  0x1e   : > { %743 = vmatpush3.bf16.msra.mxu1 %v798_v30 }
  0x1f   : > { %398 = vmatpush1.bf16.msra.mxu0 %v783_v21  ;;  %744 = vmatprep.subr.bf16.mxu1 %v799_v31 }
  0x20   : > { %399 = vmatprep.subr.bf16.mxu0 %v784_v22 }
  0x22   : > { %745 = vmatpush3.bf16.msra.mxu1 %v800_v32 }
  0x23   : > { %400 = vmatpush1.bf16.msra.mxu0 %v786_v26  ;;  %746 = vmatprep.subr.bf16.mxu1 %v801_v33 }
  0x26   : > { %418 = vmatmul.mubr.bf16.vlgmr.msra.gmra.mrb[0].mxu0 %v276_v29  ;;  %747 = vmatpush3.bf16.msra.mxu1 %v802_v34 }
  0xf9   : > { %v419_v42 = vpop.f32.mrb[0].mxu0 }
  0xfa   : > { %v420_v43 = vadd.f32 %v419_v42, %v298_v40  ;;  %v421_v44 = vpop.f32.mrb[1].mxu0 }
  0xfb   : > { %v422_v45 = vadd.f32 %v421_v44, %v302_v41  ;;  %v423_v46 = vpop.f32.mrb[2].mxu0 }
  0xfc   : > { %v426_v47 = vmax.f32 %v420_v43, 0.0  ;;  %v424_v48 = vpop.f32.mrb[3].mxu0 }
  0xfd   : > { %v427_v49 = vmax.f32 %v422_v45, 0.0 }
  0xfe   : > { %v428_v51 = vpack.c.bf16 %v426_v47, %v426_v47 }
  0xff   : > { %v429_v50 = vpack.c.bf16 %v427_v49, %v427_v49 }
 0x101   : > { %597 = vmatprep.mubr.bf16.mxu1 %v429_v50 }
 0x102   : > { %598 = vmatmul.mubr.bf16.vlgmr.msra.gmra.mrb[0].mxu1 %v428_v51 }
 0x1d5   : > { %v748_v52 = vpop.f32.mrb[0].mxu1 }
 0x1d6   : > { %v749_v54 = vpop.f32.mrb[1].mxu1 }
 0x1d7   : > { %v750_v55 = vadd.f32 %v749_v54, %v748_v52  ;;  %v751_v56 = vpop.f32.mrb[2].mxu1 }
 0x1d8   : > { %v752_v57 = vpop.f32.mrb[3].mxu1 }
 0x1d9   : > { %v600_v58 = vadd.f32 %v750_v55, %v711_v53 }
 0x1db   : > { %v605_v59 = vadd.f32 %v600_v58, %v275_v27 }
 0x1dd   : > { %608 = vadd.xlane.f32.xlu0 %v605_v59 }
 0x26a   : > { %v609_v60 = vpop.xlane.xlu0 %608 }
 0x26b   : > { %v611_v61 = vmul.f32 0.0078125, %v609_v60 }
 0x26d   : > { %v612_v62 = vsub.f32 %v605_v59, %v611_v61 }
 0x26f   : > { %v613_v63 = vmul.f32 %v612_v62, %v612_v62 }
 0x271   : > { %614 = vadd.xlane.f32.xlu0 %v613_v63 }
 0x2fe   : > { %v615_v0 = vpop.xlane.xlu0 %614 }
 0x2ff   : > { %v616_v1 = vmul.f32 0.0078125, %v615_v0 }
 0x301   : > { %v617_v2 = vadd.f32 1e-05, %v616_v1 }
 0x303   : > { %803 = vrsqrt.f32 %v617_v2 }
 0x30d   : > { %v804_v3 = vpop.eup %803 }
 0x30e   : > { %v619_v5 = vmul.f32 %v804_v3, %v612_v62 }
 0x310   : > { %v626_v7 = vmul.f32 %v728_v4, %v619_v5 }
 0x312   : > { %v633_v8 = vadd.f32 %v729_v6, %v626_v7 }
 0x314   : > { %634 = vst [vmem:[%s273_s20] sm:$0xff] %v633_v8 }
 0x315 PF: > { %s17_s24 = sadd.s32 1, %s811_s24  }
 0x316   : > { %p14_p4 = scmp.ge.s32.totalorder %s17_s24, 4  }
 0x318   :  { %16 = sbr.rel (!%p14_p4) target bundleno = 1 (0x1), region = 78 }

// kernel: transformer_forward.23
= control target key start
LH: loop header
LB: loop body
LE: loop exit
PB: predicated region body
PF: predicated region fallthrough
CT: control target
= control target key end

     0   :  { %s656_s18 = smov 0   ;;  %s658_s19 = smov 0   ;;  %s729_s0 = inlined_call_operand.vmem [shape: f32[16,128], index: 0, kind: input, shape index: {}]   ;;  %s730_s1 = inlined_call_operand.vmem [shape: f32[1,128], index: 1, kind: input, shape index: {}]   ;;  %s731_s2 = inlined_call_operand.vmem [shape: f32[1,128], index: 2, kind: input, shape index: {}]   ;;  %s732_s3 = inlined_call_operand.vmem [shape: bf16[128,128], index: 3, kind: input, shape index: {}]   ;;  %s733_s4 = inlined_call_operand.vmem [shape: f32[1,128], index: 4, kind: input, shape index: {}]   ;;  %s734_s5 = inlined_call_operand.vmem [shape: f32[16,128], index: 5, kind: output, shape index: {}]  }
   0x1   :  { %s660_s20 = smov 0  }
   0x2 LB: > { %s27_s21 = sadd.s32 1, %s618_s19  ;;  %p519_p0 = scmp.ge.s32.totalorder %s622_s20, 1  ;;  %s622_s20 = sphi %s660_s20, %s15_s20   ;;  %s618_s19 = sphi %s658_s19, %s736_s19   ;;  %s614_s18 = sphi %s656_s18, %s735_s18  }
   0x3   : > { %p29_p1 = scmp.ge.s32.totalorder %s27_s21, 2  ;;  %p217_p2 = scmp.lt.s32.totalorder %s622_s20, 3 }
   0x5   : > { %s738_s21 = smov (%p29_p1, %s27_s21), 0  ;;  %p218_p3 = pnand %p519_p0, %p217_p2 }
   0x6   : > { %p253_p4 = scmp.lt.s32.totalorder (!%p218_p3), %s614_s18, 1  ;;  %v590_v1 = vld [vmem:[%s732_s3] sm:$0xff] (!%p218_p3)   ;;  %v624_v2 = vmov (!%p218_p3), 0.0   ;;  %v591_v3 = vld [vmem:[%s732_s3 + $0x8] sm:$0xff] (!%p218_p3)   ;;  %v592_v8 = vld [vmem:[%s732_s3 + $0x10] sm:$0xff] (!%p218_p3)   ;;  %vm625_vm0 = vmmov (!%p218_p3), 0  }
   0x7   : > { %221 = sbr.rel (%p218_p3) target bundleno = 546 (0x222), region = 40  ;;  %544 = vmatprep.subr.bf16.mxu0 (!%p218_p3), %v624_v2  ;;  %v593_v9 = vld [vmem:[%s732_s3 + $0x18] sm:$0xff] (!%p218_p3)   ;;  %v594_v10 = vld [vmem:[%s732_s3 + $0x20] sm:$0xff] (!%p218_p3)   ;;  %560 = vmatprep.mubr.msk.bf16.mxu0 (!%p218_p3), %vm625_vm0, %v624_v2  ;;  %v595_v11 = vld [vmem:[%s732_s3 + $0x28] sm:$0xff] (!%p218_p3)  }
   0x8   : > { %545 = vmatpush3.bf16.msra.mxu0 (!%p218_p3), %v590_v1  ;;  %v596_v12 = vld [vmem:[%s732_s3 + $0x30] sm:$0xff] (!%p218_p3)   ;;  %v597_v13 = vld [vmem:[%s732_s3 + $0x38] sm:$0xff] (!%p218_p3)   ;;  %v522_v18 = vld [vmem:[%s730_s1] ss:$0 sm:$0xff] (!%p218_p3) }
   0x9   : > { %546 = vmatprep.subr.bf16.mxu0 (!%p218_p3), %v624_v2  ;;  %v523_v20 = vld [vmem:[%s731_s2] ss:$0 sm:$0xff] (!%p218_p3) }
   0xa   : > { %v524_v24 = vld [vmem:[%s733_s4] ss:$0 sm:$0xff] (!%p218_p3) }
   0xc   : > { %547 = vmatpush3.bf16.msra.mxu0 (!%p218_p3), %v591_v3 }
   0xd   : > { %548 = vmatprep.subr.bf16.mxu0 (!%p218_p3), %v624_v2 }
   0xe   : > { %s740_s18 = smov (!%p253_p4, %s614_s18), 1 }
   0xf   : > { %s520_s22 = sshll.u32 %s740_s18, 3 }
  0x10   : > { %s256_s25 = scalar_lea.vmem %s729_s0, %s520_s22  ;;  %549 = vmatpush3.bf16.msra.mxu0 %v592_v8  ;;  %s270_s30 = scalar_lea.vmem %s734_s5, %s520_s22 }
  0x11   : > { %v272_v0 = vld [vmem:[%s256_s25] sm:$0xff]  ;;  %550 = vmatprep.subr.bf16.mxu0 %v624_v2 }
  0x12   : > { %275 = vadd.xlane.f32.xlu0 %v272_v0 }
  0x14   : > { %551 = vmatpush3.bf16.msra.mxu0 %v593_v9 }
  0x15   : > { %552 = vmatprep.subr.bf16.mxu0 %v624_v2 }
  0x18   : > { %553 = vmatpush3.bf16.msra.mxu0 %v594_v10 }
  0x19   : > { %554 = vmatprep.subr.bf16.mxu0 %v624_v2 }
  0x1c   : > { %555 = vmatpush3.bf16.msra.mxu0 %v595_v11 }
  0x1d   : > { %556 = vmatprep.subr.bf16.mxu0 %v624_v2 }
  0x20   : > { %557 = vmatpush3.bf16.msra.mxu0 %v596_v12 }
  0x21   : > { %558 = vmatprep.subr.bf16.mxu0 %v624_v2 }
  0x24   : > { %559 = vmatpush3.bf16.msra.mxu0 %v597_v13 }
  0x9f   : > { %v276_v4 = vpop.xlane.xlu0 %275 }
  0xa0   : > { %v278_v5 = vmul.f32 0.0078125, %v276_v4 }
  0xa2   : > { %v279_v6 = vsub.f32 %v272_v0, %v278_v5 }
  0xa4   : > { %v280_v7 = vmul.f32 %v279_v6, %v279_v6 }
  0xa6   : > { %281 = vadd.xlane.f32.xlu0 %v280_v7 }
 0x133   : > { %v282_v14 = vpop.xlane.xlu0 %281 }
 0x134   : > { %v283_v15 = vmul.f32 0.0078125, %v282_v14 }
 0x136   : > { %v284_v16 = vadd.f32 1e-05, %v283_v15 }
 0x138   : > { %598 = vrsqrt.f32 %v284_v16 }
 0x142   : > { %v599_v17 = vpop.eup %598 }
 0x143   : > { %v286_v19 = vmul.f32 %v599_v17, %v279_v6 }
 0x145   : > { %v293_v21 = vmul.f32 %v522_v18, %v286_v19 }
 0x147   : > { %v300_v22 = vadd.f32 %v523_v20, %v293_v21 }
 0x149   : > { %v301_v23 = vpack.c.bf16 %v300_v22, %v300_v22 }
 0x14b   : > { %561 = vmatmul.mubr.bf16.vlgmr.msra.gmra.mrb[0].mxu0 %v301_v23 }
 0x21e   : > { %v407_v25 = vpop.f32.mrb[0].mxu0 }
 0x21f   : > { %v408_v26 = vadd.f32 %v524_v24, %v407_v25  ;;  %v562_v27 = vpop.f32.mrb[1].mxu0 }
 0x220   : > { %v410_v28 = vpop.f32.mrb[2].mxu0 }
 0x221   : > { %413 = vst [vmem:[%s270_s30] sm:$0xff] %v408_v26  ;;  %v563_v29 = vpop.f32.mrb[3].mxu0 }
 0x222 PF: > { %s15_s20 = sadd.s32 1, %s622_s20   ;;  %s735_s18 = smov %s618_s19 }
 0x223   : > { %p12_p5 = scmp.ge.s32.totalorder %s15_s20, 4   ;;  %s736_s19 = smov %s738_s21 }
 0x225   :  { %14 = sbr.rel (!%p12_p5) target bundleno = 2 (0x2), region = 76 }

</bundles_post_ra>
